<compile_context>
chip_gen: v7x
topology: tpu7x:2x2x1
jax: 0.10.0
libtpu: 0.0.40
codegen_flags: <defaults>
</compile_context>

<pallas_src>
import functools

import jax
import jax.numpy as jnp
from jax import lax
from jax.experimental import pallas as pl
from jax.experimental.pallas import tpu as pltpu

FEAT = 128   # stand-in for the hard-coded 2001 feature == hidden dim


# ----------------------------------------------------------------------------
# Fused CRNN kernel: hoisted input projection + bidirectional GRU recurrence
# + final Linear, all inside one pallas_call (no grid, whole arrays in VMEM).
# ----------------------------------------------------------------------------
def _gru_cell(gi, gh, h_prev, H):
    """PyTorch GRU cell (bias=False), gate order [r, z, n]; all f32."""
    r = jax.nn.sigmoid(gi[:, 0 * H:1 * H] + gh[:, 0 * H:1 * H])
    z = jax.nn.sigmoid(gi[:, 1 * H:2 * H] + gh[:, 1 * H:2 * H])
    n = jnp.tanh(gi[:, 2 * H:3 * H] + r * gh[:, 2 * H:3 * H])
    return (1.0 - z) * n + z * h_prev


def _crnn_kernel(x_ref, wih_ref, whhf_ref, whhb_ref, wlin_ref,
                 y_ref, gi_scr, hs_scr, *, seq_len, batch, hidden):
    S, Bp, H = seq_len, batch, hidden

    # ---- Hoisted input projection: both directions in one bf16 matmul. ----
    # (S*Bp, D) @ (D, 6H) -> f32 (S*Bp, 6H); cols 0:3H = forward, 3H:6H = bwd.
    gi_scr[...] = jnp.dot(x_ref[...], wih_ref[...],
                          preferred_element_type=jnp.float32)

    # ---- Recurrence: only h_prev @ W_hh remains on the serial path. ----
    def step(t, carry):
        h_f, h_b = carry                                  # (Bp, H) f32
        tb = S - 1 - t
        off_f = pl.multiple_of(t * Bp, Bp)
        off_b = pl.multiple_of(tb * Bp, Bp)

        # Ref-level slices: load only the 3H columns each direction needs.
        gi_f = gi_scr[pl.ds(off_f, Bp), 0:3 * H]          # (Bp, 3H) fwd, time t
        gi_b = gi_scr[pl.ds(off_b, Bp), 3 * H:6 * H]      # (Bp, 3H) bwd, time S-1-t

        # W_hh read from VMEM refs inside the body (no vreg pinning across
        # the unrolled loop); bf16 MXU operands, f32 accumulation.
        gh_f = jnp.dot(h_f.astype(jnp.bfloat16), whhf_ref[...],
                       preferred_element_type=jnp.float32)
        gh_b = jnp.dot(h_b.astype(jnp.bfloat16), whhb_ref[...],
                       preferred_element_type=jnp.float32)

        h_f_new = _gru_cell(gi_f, gh_f, h_f, H)
        h_b_new = _gru_cell(gi_b, gh_b, h_b, H)

        # Merged hidden-state scratch: fwd -> cols 0:H, bwd -> cols H:2H.
        hs_scr[pl.ds(off_f, Bp), 0:H] = h_f_new
        hs_scr[pl.ds(off_b, Bp), H:2 * H] = h_b_new
        return h_f_new, h_b_new

    h0 = jnp.zeros((Bp, H), jnp.float32)
    # S=8 here: full unroll is fine.  TODO(synk): unroll by 2-4 at long S.
    lax.fori_loop(0, S, step, (h0, h0), unroll=True)

    # ---- Fused final Linear epilogue: one K=2H matmul. ----
    y_ref[...] = jnp.dot(hs_scr[...].astype(jnp.bfloat16), wlin_ref[...],
                         preferred_element_type=jnp.float32)


# ----------------------------------------------------------------------------
# CRNN forward (wrapper)
# ----------------------------------------------------------------------------
def crnn_forward(x, params):
    """x: (B, S, D) batch-first, like the torch module."""
    B, S, D = x.shape
    H = D
    Bp = 8 * ((B + 7) // 8)                       # pad batch to full sublanes

    out = x                                       # permute(0, 1, 2) == identity
    x_tm = jnp.transpose(out, (1, 0, 2))          # (S, B, D) time-major
    if Bp != B:
        x_tm = jnp.pad(x_tm, ((0, 0), (0, Bp - B), (0, 0)))
    x2d = x_tm.reshape(S * Bp, D).astype(jnp.bfloat16)

    # Weights: bf16 MXU operands (f32 accumulation happens inside the kernel).
    wih_cat = jnp.concatenate(
        [params["w_ih_f"].T, params["w_ih_b"].T], axis=1).astype(jnp.bfloat16)  # (D, 6H)
    whh_f_t = params["w_hh_f"].T.astype(jnp.bfloat16)                           # (H, 3H)
    whh_b_t = params["w_hh_b"].T.astype(jnp.bfloat16)                           # (H, 3H)
    wlin_t = params["w_lin"].T.astype(jnp.bfloat16)                             # (2H, D)

    kernel = functools.partial(_crnn_kernel, seq_len=S, batch=Bp, hidden=H)

    vmem_spec = pl.BlockSpec(memory_space=pltpu.MemorySpace.VMEM)
    y2d = pl.pallas_call(
        kernel,
        out_shape=jax.ShapeDtypeStruct((S * Bp, D), jnp.float32),
        in_specs=[vmem_spec] * 5,
        out_specs=vmem_spec,
        scratch_shapes=[
            pltpu.VMEM((S * Bp, 6 * H), jnp.float32),   # hoisted gi, both dirs
            pltpu.VMEM((S * Bp, 2 * H), jnp.float32),   # merged hidden states
        ],
        compiler_params=pltpu.CompilerParams(
            vmem_limit_bytes=48 * 1024 * 1024,          # safe on v7x's 64 MiB
        ),
    )(x2d, wih_cat, whh_f_t, whh_b_t, wlin_t)

    y = y2d.reshape(S, Bp, D)[:, :B, :]           # drop batch padding
    return jnp.transpose(y, (1, 0, 2))            # (B, S, D)


# ----------------------------------------------------------------------------
# Pure-JAX f32 reference (for correctness check)
# ----------------------------------------------------------------------------
def _gru_ref(x_tm, w_ih, w_hh, reverse):
    S, B, D = x_tm.shape
    H = w_hh.shape[1]
    xs = x_tm[::-1] if reverse else x_tm

    def step(h, x_t):
        gi = x_t @ w_ih.T
        gh = h @ w_hh.T
        r = jax.nn.sigmoid(gi[:, :H] + gh[:, :H])
        z = jax.nn.sigmoid(gi[:, H:2 * H] + gh[:, H:2 * H])
        n = jnp.tanh(gi[:, 2 * H:] + r * gh[:, 2 * H:])
        h_new = (1.0 - z) * n + z * h
        return h_new, h_new

    _, hs = lax.scan(step, jnp.zeros((B, H), jnp.float32), xs)
    return hs[::-1] if reverse else hs


def _crnn_ref(x, params):
    x_tm = jnp.transpose(x, (1, 0, 2))
    h_f = _gru_ref(x_tm, params["w_ih_f"], params["w_hh_f"], False)
    h_b = _gru_ref(x_tm, params["w_ih_b"], params["w_hh_b"], True)
    h = jnp.concatenate([h_f, h_b], axis=-1)
    S, B, H2 = h.shape
    y2d = h.reshape(S * B, H2) @ params["w_lin"].T
    return y2d.reshape(S, B, -1).transpose(1, 0, 2)


# ----------------------------------------------------------------------------
if __name__ == "__main__":
    key = jax.random.PRNGKey(0)
    B, S, D, H = 2, 8, FEAT, FEAT
    scale = 1.0 / jnp.sqrt(jnp.float32(H))

    keys = jax.random.split(key, 7)
    params = {
        # PyTorch GRU weight layout: (3*H, in) / (3*H, H), gate order [r, z, n]
        "w_ih_f": (jax.random.uniform(keys[0], (3 * H, D), jnp.float32, -1, 1) * scale),
        "w_hh_f": (jax.random.uniform(keys[1], (3 * H, H), jnp.float32, -1, 1) * scale),
        "w_ih_b": (jax.random.uniform(keys[2], (3 * H, D), jnp.float32, -1, 1) * scale),
        "w_hh_b": (jax.random.uniform(keys[3], (3 * H, H), jnp.float32, -1, 1) * scale),
        # PyTorch Linear weight layout: (out, in) = (D, 2H)
        "w_lin": (jax.random.uniform(keys[4], (D, 2 * H), jnp.float32, -1, 1) * scale),
    }

    x = jax.random.normal(keys[5], (B, S, D), jnp.float32)

    y = crnn_forward(x, params)
    y = jax.block_until_ready(y)

    y_ref = _crnn_ref(x, params)
    assert y.shape == (B, S, D)
    # bf16 MXU operands with f32 accumulation -> looser tolerance than pure f32.
    assert jnp.allclose(y, y_ref, atol=2e-2, rtol=2e-2), "mismatch vs reference"

    print("KERNEL_OK")
</pallas_src>

<mosaic_0001>
module attributes {stable_mosaic.version = 11 : i64} {
  func.func @_crnn_kernel(%arg0: memref<64x128xbf16, #tpu.memory_space<vmem>>, %arg1: memref<128x768xbf16, #tpu.memory_space<vmem>>, %arg2: memref<128x384xbf16, #tpu.memory_space<vmem>>, %arg3: memref<128x384xbf16, #tpu.memory_space<vmem>>, %arg4: memref<256x128xbf16, #tpu.memory_space<vmem>>, %arg5: memref<64x128xf32, #tpu.memory_space<vmem>>, %arg6: memref<64x768xf32, #tpu.memory_space<vmem>>, %arg7: memref<64x256xf32, #tpu.memory_space<vmem>>) attributes {dimension_semantics = [], scalar_prefetch = 0 : i64, scratch_operands = 2 : i64, tpu.core_type = #tpu.core_type<tc>} {
    %c0 = arith.constant 0 : index
    %c0_0 = arith.constant 0 : index
    %0 = vector.load %arg0[%c0, %c0_0] : memref<64x128xbf16, #tpu.memory_space<vmem>>, vector<64x128xbf16>
    %c0_1 = arith.constant 0 : index
    %c0_2 = arith.constant 0 : index
    %1 = vector.load %arg1[%c0_1, %c0_2] : memref<128x768xbf16, #tpu.memory_space<vmem>>, vector<128x768xbf16>
    %cst = arith.constant dense<0.000000e+00> : vector<64x768xf32>
    %2 = tpu.matmul %0, %1, %cst {dimension_numbers = #tpu.dot_dimension_numbers<[1], [0], [0], [1], [0, 0, 1, 1], [], []>} : vector<64x128xbf16>, vector<128x768xbf16>, vector<64x768xf32> -> vector<64x768xf32>
    %c0_3 = arith.constant 0 : index
    %c0_4 = arith.constant 0 : index
    %3 = vector.load %arg6[%c0_3, %c0_4] : memref<64x768xf32, #tpu.memory_space<vmem>>, vector<64x768xf32>
    tpu.vector_store %arg6[%c0_3, %c0_4], %2 {strides = array<i32>} : memref<64x768xf32, #tpu.memory_space<vmem>>, vector<64x768xf32>,
    %cst_5 = arith.constant 0.000000e+00 : f32
    %4 = vector.broadcast %cst_5 : f32 to vector<8x128xf32>
    %c0_i32 = arith.constant 0 : i32
    %c7_i32 = arith.constant 7 : i32
    %5 = arith.subi %c7_i32, %c0_i32 : i32
    %c8_i32 = arith.constant 8 : i32
    %6 = arith.muli %c0_i32, %c8_i32 : i32
    %7 = tpu.assume_multiple %6, 8 : i32
    %c8_i32_6 = arith.constant 8 : i32
    %8 = arith.muli %5, %c8_i32_6 : i32
    %9 = tpu.assume_multiple %8, 8 : i32
    %10 = arith.index_cast %7 : i32 to index
    %c0_7 = arith.constant 0 : index
    %11 = vector.load %arg6[%10, %c0_7] : memref<64x768xf32, #tpu.memory_space<vmem>>, vector<8x384xf32>
    %12 = arith.index_cast %9 : i32 to index
    %c384 = arith.constant 384 : index
    %13 = vector.load %arg6[%12, %c384] : memref<64x768xf32, #tpu.memory_space<vmem>>, vector<8x384xf32>
    %14 = arith.truncf %4 : vector<8x128xf32> to vector<8x128xbf16>
    %c0_8 = arith.constant 0 : index
    %c0_9 = arith.constant 0 : index
    %15 = vector.load %arg2[%c0_8, %c0_9] : memref<128x384xbf16, #tpu.memory_space<vmem>>, vector<128x384xbf16>
    %cst_10 = arith.constant dense<0.000000e+00> : vector<8x384xf32>
    %16 = tpu.matmul %14, %15, %cst_10 {dimension_numbers = #tpu.dot_dimension_numbers<[1], [0], [0], [1], [0, 0, 1, 1], [], []>} : vector<8x128xbf16>, vector<128x384xbf16>, vector<8x384xf32> -> vector<8x384xf32>
    %17 = arith.truncf %4 : vector<8x128xf32> to vector<8x128xbf16>
    %c0_11 = arith.constant 0 : index
    %c0_12 = arith.constant 0 : index
    %18 = vector.load %arg3[%c0_11, %c0_12] : memref<128x384xbf16, #tpu.memory_space<vmem>>, vector<128x384xbf16>
    %cst_13 = arith.constant dense<0.000000e+00> : vector<8x384xf32>
    %19 = tpu.matmul %17, %18, %cst_13 {dimension_numbers = #tpu.dot_dimension_numbers<[1], [0], [0], [1], [0, 0, 1, 1], [], []>} : vector<8x128xbf16>, vector<128x384xbf16>, vector<8x384xf32> -> vector<8x384xf32>
    %20 = vector.extract_strided_slice %11 {offsets = [0, 0], sizes = [8, 128], strides = [1, 1]} : vector<8x384xf32> to vector<8x128xf32>
    %21 = vector.extract_strided_slice %16 {offsets = [0, 0], sizes = [8, 128], strides = [1, 1]} : vector<8x384xf32> to vector<8x128xf32>
    %22 = arith.addf %20, %21 : vector<8x128xf32>
    %23 = arith.negf %22 : vector<8x128xf32>
    %24 = math.exp %23 : vector<8x128xf32>
    %cst_14 = arith.constant 1.000000e+00 : f32
    %25 = vector.broadcast %cst_14 : f32 to vector<8x128xf32>
    %26 = arith.addf %25, %24 : vector<8x128xf32>
    %27 = arith.divf %25, %26 : vector<8x128xf32>
    %28 = vector.extract_strided_slice %11 {offsets = [0, 128], sizes = [8, 128], strides = [1, 1]} : vector<8x384xf32> to vector<8x128xf32>
    %29 = vector.extract_strided_slice %16 {offsets = [0, 128], sizes = [8, 128], strides = [1, 1]} : vector<8x384xf32> to vector<8x128xf32>
    %30 = arith.addf %28, %29 : vector<8x128xf32>
    %31 = arith.negf %30 : vector<8x128xf32>
    %32 = math.exp %31 : vector<8x128xf32>
    %cst_15 = arith.constant 1.000000e+00 : f32
    %33 = vector.broadcast %cst_15 : f32 to vector<8x128xf32>
    %34 = arith.addf %33, %32 : vector<8x128xf32>
    %35 = arith.divf %33, %34 : vector<8x128xf32>
    %36 = vector.extract_strided_slice %11 {offsets = [0, 256], sizes = [8, 128], strides = [1, 1]} : vector<8x384xf32> to vector<8x128xf32>
    %37 = vector.extract_strided_slice %16 {offsets = [0, 256], sizes = [8, 128], strides = [1, 1]} : vector<8x384xf32> to vector<8x128xf32>
    %38 = arith.mulf %27, %37 : vector<8x128xf32>
    %39 = arith.addf %36, %38 : vector<8x128xf32>
    %40 = math.tanh %39 : vector<8x128xf32>
    %cst_16 = arith.constant 1.000000e+00 : f32
    %41 = vector.broadcast %cst_16 : f32 to vector<8x128xf32>
    %42 = arith.subf %41, %35 : vector<8x128xf32>
    %43 = arith.mulf %42, %40 : vector<8x128xf32>
    %44 = arith.mulf %35, %4 : vector<8x128xf32>
    %45 = arith.addf %43, %44 : vector<8x128xf32>
    %46 = vector.extract_strided_slice %13 {offsets = [0, 0], sizes = [8, 128], strides = [1, 1]} : vector<8x384xf32> to vector<8x128xf32>
    %47 = vector.extract_strided_slice %19 {offsets = [0, 0], sizes = [8, 128], strides = [1, 1]} : vector<8x384xf32> to vector<8x128xf32>
    %48 = arith.addf %46, %47 : vector<8x128xf32>
    %49 = arith.negf %48 : vector<8x128xf32>
    %50 = math.exp %49 : vector<8x128xf32>
    %cst_17 = arith.constant 1.000000e+00 : f32
    %51 = vector.broadcast %cst_17 : f32 to vector<8x128xf32>
    %52 = arith.addf %51, %50 : vector<8x128xf32>
    %53 = arith.divf %51, %52 : vector<8x128xf32>
    %54 = vector.extract_strided_slice %13 {offsets = [0, 128], sizes = [8, 128], strides = [1, 1]} : vector<8x384xf32> to vector<8x128xf32>
    %55 = vector.extract_strided_slice %19 {offsets = [0, 128], sizes = [8, 128], strides = [1, 1]} : vector<8x384xf32> to vector<8x128xf32>
    %56 = arith.addf %54, %55 : vector<8x128xf32>
    %57 = arith.negf %56 : vector<8x128xf32>
    %58 = math.exp %57 : vector<8x128xf32>
    %cst_18 = arith.constant 1.000000e+00 : f32
    %59 = vector.broadcast %cst_18 : f32 to vector<8x128xf32>
    %60 = arith.addf %59, %58 : vector<8x128xf32>
    %61 = arith.divf %59, %60 : vector<8x128xf32>
    %62 = vector.extract_strided_slice %13 {offsets = [0, 256], sizes = [8, 128], strides = [1, 1]} : vector<8x384xf32> to vector<8x128xf32>
    %63 = vector.extract_strided_slice %19 {offsets = [0, 256], sizes = [8, 128], strides = [1, 1]} : vector<8x384xf32> to vector<8x128xf32>
    %64 = arith.mulf %53, %63 : vector<8x128xf32>
    %65 = arith.addf %62, %64 : vector<8x128xf32>
    %66 = math.tanh %65 : vector<8x128xf32>
    %cst_19 = arith.constant 1.000000e+00 : f32
    %67 = vector.broadcast %cst_19 : f32 to vector<8x128xf32>
    %68 = arith.subf %67, %61 : vector<8x128xf32>
    %69 = arith.mulf %68, %66 : vector<8x128xf32>
    %70 = arith.mulf %61, %4 : vector<8x128xf32>
    %71 = arith.addf %69, %70 : vector<8x128xf32>
    %72 = arith.index_cast %7 : i32 to index
    %c0_20 = arith.constant 0 : index
    %73 = vector.load %arg7[%72, %c0_20] : memref<64x256xf32, #tpu.memory_space<vmem>>, vector<8x128xf32>
    tpu.vector_store %arg7[%72, %c0_20], %45 {strides = array<i32>} : memref<64x256xf32, #tpu.memory_space<vmem>>, vector<8x128xf32>,
    %74 = arith.index_cast %9 : i32 to index
    %c128 = arith.constant 128 : index
    %75 = vector.load %arg7[%74, %c128] : memref<64x256xf32, #tpu.memory_space<vmem>>, vector<8x128xf32>
    tpu.vector_store %arg7[%74, %c128], %71 {strides = array<i32>} : memref<64x256xf32, #tpu.memory_space<vmem>>, vector<8x128xf32>,
    %c1_i32 = arith.constant 1 : i32
    %c7_i32_21 = arith.constant 7 : i32
    %76 = arith.subi %c7_i32_21, %c1_i32 : i32
    %c8_i32_22 = arith.constant 8 : i32
    %77 = arith.muli %c1_i32, %c8_i32_22 : i32
    %78 = tpu.assume_multiple %77, 8 : i32
    %c8_i32_23 = arith.constant 8 : i32
    %79 = arith.muli %76, %c8_i32_23 : i32
    %80 = tpu.assume_multiple %79, 8 : i32
    %81 = arith.index_cast %78 : i32 to index
    %c0_24 = arith.constant 0 : index
    %82 = vector.load %arg6[%81, %c0_24] : memref<64x768xf32, #tpu.memory_space<vmem>>, vector<8x384xf32>
    %83 = arith.index_cast %80 : i32 to index
    %c384_25 = arith.constant 384 : index
    %84 = vector.load %arg6[%83, %c384_25] : memref<64x768xf32, #tpu.memory_space<vmem>>, vector<8x384xf32>
    %85 = arith.truncf %45 : vector<8x128xf32> to vector<8x128xbf16>
    %c0_26 = arith.constant 0 : index
    %c0_27 = arith.constant 0 : index
    %86 = vector.load %arg2[%c0_26, %c0_27] : memref<128x384xbf16, #tpu.memory_space<vmem>>, vector<128x384xbf16>
    %cst_28 = arith.constant dense<0.000000e+00> : vector<8x384xf32>
    %87 = tpu.matmul %85, %86, %cst_28 {dimension_numbers = #tpu.dot_dimension_numbers<[1], [0], [0], [1], [0, 0, 1, 1], [], []>} : vector<8x128xbf16>, vector<128x384xbf16>, vector<8x384xf32> -> vector<8x384xf32>
    %88 = arith.truncf %71 : vector<8x128xf32> to vector<8x128xbf16>
    %c0_29 = arith.constant 0 : index
    %c0_30 = arith.constant 0 : index
    %89 = vector.load %arg3[%c0_29, %c0_30] : memref<128x384xbf16, #tpu.memory_space<vmem>>, vector<128x384xbf16>
    %cst_31 = arith.constant dense<0.000000e+00> : vector<8x384xf32>
    %90 = tpu.matmul %88, %89, %cst_31 {dimension_numbers = #tpu.dot_dimension_numbers<[1], [0], [0], [1], [0, 0, 1, 1], [], []>} : vector<8x128xbf16>, vector<128x384xbf16>, vector<8x384xf32> -> vector<8x384xf32>
    %91 = vector.extract_strided_slice %82 {offsets = [0, 0], sizes = [8, 128], strides = [1, 1]} : vector<8x384xf32> to vector<8x128xf32>
    %92 = vector.extract_strided_slice %87 {offsets = [0, 0], sizes = [8, 128], strides = [1, 1]} : vector<8x384xf32> to vector<8x128xf32>
    %93 = arith.addf %91, %92 : vector<8x128xf32>
    %94 = arith.negf %93 : vector<8x128xf32>
    %95 = math.exp %94 : vector<8x128xf32>
    %cst_32 = arith.constant 1.000000e+00 : f32
    %96 = vector.broadcast %cst_32 : f32 to vector<8x128xf32>
    %97 = arith.addf %96, %95 : vector<8x128xf32>
    %98 = arith.divf %96, %97 : vector<8x128xf32>
    %99 = vector.extract_strided_slice %82 {offsets = [0, 128], sizes = [8, 128], strides = [1, 1]} : vector<8x384xf32> to vector<8x128xf32>
    %100 = vector.extract_strided_slice %87 {offsets = [0, 128], sizes = [8, 128], strides = [1, 1]} : vector<8x384xf32> to vector<8x128xf32>
    %101 = arith.addf %99, %100 : vector<8x128xf32>
    %102 = arith.negf %101 : vector<8x128xf32>
    %103 = math.exp %102 : vector<8x128xf32>
    %cst_33 = arith.constant 1.000000e+00 : f32
    %104 = vector.broadcast %cst_33 : f32 to vector<8x128xf32>
    %105 = arith.addf %104, %103 : vector<8x128xf32>
    %106 = arith.divf %104, %105 : vector<8x128xf32>
    %107 = vector.extract_strided_slice %82 {offsets = [0, 256], sizes = [8, 128], strides = [1, 1]} : vector<8x384xf32> to vector<8x128xf32>
    %108 = vector.extract_strided_slice %87 {offsets = [0, 256], sizes = [8, 128], strides = [1, 1]} : vector<8x384xf32> to vector<8x128xf32>
    %109 = arith.mulf %98, %108 : vector<8x128xf32>
    %110 = arith.addf %107, %109 : vector<8x128xf32>
    %111 = math.tanh %110 : vector<8x128xf32>
    %cst_34 = arith.constant 1.000000e+00 : f32
    %112 = vector.broadcast %cst_34 : f32 to vector<8x128xf32>
    %113 = arith.subf %112, %106 : vector<8x128xf32>
    %114 = arith.mulf %113, %111 : vector<8x128xf32>
    %115 = arith.mulf %106, %45 : vector<8x128xf32>
    %116 = arith.addf %114, %115 : vector<8x128xf32>
    %117 = vector.extract_strided_slice %84 {offsets = [0, 0], sizes = [8, 128], strides = [1, 1]} : vector<8x384xf32> to vector<8x128xf32>
    %118 = vector.extract_strided_slice %90 {offsets = [0, 0], sizes = [8, 128], strides = [1, 1]} : vector<8x384xf32> to vector<8x128xf32>
    %119 = arith.addf %117, %118 : vector<8x128xf32>
    %120 = arith.negf %119 : vector<8x128xf32>
    %121 = math.exp %120 : vector<8x128xf32>
    %cst_35 = arith.constant 1.000000e+00 : f32
    %122 = vector.broadcast %cst_35 : f32 to vector<8x128xf32>
    %123 = arith.addf %122, %121 : vector<8x128xf32>
    %124 = arith.divf %122, %123 : vector<8x128xf32>
    %125 = vector.extract_strided_slice %84 {offsets = [0, 128], sizes = [8, 128], strides = [1, 1]} : vector<8x384xf32> to vector<8x128xf32>
    %126 = vector.extract_strided_slice %90 {offsets = [0, 128], sizes = [8, 128], strides = [1, 1]} : vector<8x384xf32> to vector<8x128xf32>
    %127 = arith.addf %125, %126 : vector<8x128xf32>
    %128 = arith.negf %127 : vector<8x128xf32>
    %129 = math.exp %128 : vector<8x128xf32>
    %cst_36 = arith.constant 1.000000e+00 : f32
    %130 = vector.broadcast %cst_36 : f32 to vector<8x128xf32>
    %131 = arith.addf %130, %129 : vector<8x128xf32>
    %132 = arith.divf %130, %131 : vector<8x128xf32>
    %133 = vector.extract_strided_slice %84 {offsets = [0, 256], sizes = [8, 128], strides = [1, 1]} : vector<8x384xf32> to vector<8x128xf32>
    %134 = vector.extract_strided_slice %90 {offsets = [0, 256], sizes = [8, 128], strides = [1, 1]} : vector<8x384xf32> to vector<8x128xf32>
    %135 = arith.mulf %124, %134 : vector<8x128xf32>
    %136 = arith.addf %133, %135 : vector<8x128xf32>
    %137 = math.tanh %136 : vector<8x128xf32>
    %cst_37 = arith.constant 1.000000e+00 : f32
    %138 = vector.broadcast %cst_37 : f32 to vector<8x128xf32>
    %139 = arith.subf %138, %132 : vector<8x128xf32>
    %140 = arith.mulf %139, %137 : vector<8x128xf32>
    %141 = arith.mulf %132, %71 : vector<8x128xf32>
    %142 = arith.addf %140, %141 : vector<8x128xf32>
    %143 = arith.index_cast %78 : i32 to index
    %c0_38 = arith.constant 0 : index
    %144 = vector.load %arg7[%143, %c0_38] : memref<64x256xf32, #tpu.memory_space<vmem>>, vector<8x128xf32>
    tpu.vector_store %arg7[%143, %c0_38], %116 {strides = array<i32>} : memref<64x256xf32, #tpu.memory_space<vmem>>, vector<8x128xf32>,
    %145 = arith.index_cast %80 : i32 to index
    %c128_39 = arith.constant 128 : index
    %146 = vector.load %arg7[%145, %c128_39] : memref<64x256xf32, #tpu.memory_space<vmem>>, vector<8x128xf32>
    tpu.vector_store %arg7[%145, %c128_39], %142 {strides = array<i32>} : memref<64x256xf32, #tpu.memory_space<vmem>>, vector<8x128xf32>,
    %c2_i32 = arith.constant 2 : i32
    %c7_i32_40 = arith.constant 7 : i32
    %147 = arith.subi %c7_i32_40, %c2_i32 : i32
    %c8_i32_41 = arith.constant 8 : i32
    %148 = arith.muli %c2_i32, %c8_i32_41 : i32
    %149 = tpu.assume_multiple %148, 8 : i32
    %c8_i32_42 = arith.constant 8 : i32
    %150 = arith.muli %147, %c8_i32_42 : i32
    %151 = tpu.assume_multiple %150, 8 : i32
    %152 = arith.index_cast %149 : i32 to index
    %c0_43 = arith.constant 0 : index
    %153 = vector.load %arg6[%152, %c0_43] : memref<64x768xf32, #tpu.memory_space<vmem>>, vector<8x384xf32>
    %154 = arith.index_cast %151 : i32 to index
    %c384_44 = arith.constant 384 : index
    %155 = vector.load %arg6[%154, %c384_44] : memref<64x768xf32, #tpu.memory_space<vmem>>, vector<8x384xf32>
    %156 = arith.truncf %116 : vector<8x128xf32> to vector<8x128xbf16>
    %c0_45 = arith.constant 0 : index
    %c0_46 = arith.constant 0 : index
    %157 = vector.load %arg2[%c0_45, %c0_46] : memref<128x384xbf16, #tpu.memory_space<vmem>>, vector<128x384xbf16>
    %cst_47 = arith.constant dense<0.000000e+00> : vector<8x384xf32>
    %158 = tpu.matmul %156, %157, %cst_47 {dimension_numbers = #tpu.dot_dimension_numbers<[1], [0], [0], [1], [0, 0, 1, 1], [], []>} : vector<8x128xbf16>, vector<128x384xbf16>, vector<8x384xf32> -> vector<8x384xf32>
    %159 = arith.truncf %142 : vector<8x128xf32> to vector<8x128xbf16>
    %c0_48 = arith.constant 0 : index
    %c0_49 = arith.constant 0 : index
    %160 = vector.load %arg3[%c0_48, %c0_49] : memref<128x384xbf16, #tpu.memory_space<vmem>>, vector<128x384xbf16>
    %cst_50 = arith.constant dense<0.000000e+00> : vector<8x384xf32>
    %161 = tpu.matmul %159, %160, %cst_50 {dimension_numbers = #tpu.dot_dimension_numbers<[1], [0], [0], [1], [0, 0, 1, 1], [], []>} : vector<8x128xbf16>, vector<128x384xbf16>, vector<8x384xf32> -> vector<8x384xf32>
    %162 = vector.extract_strided_slice %153 {offsets = [0, 0], sizes = [8, 128], strides = [1, 1]} : vector<8x384xf32> to vector<8x128xf32>
    %163 = vector.extract_strided_slice %158 {offsets = [0, 0], sizes = [8, 128], strides = [1, 1]} : vector<8x384xf32> to vector<8x128xf32>
    %164 = arith.addf %162, %163 : vector<8x128xf32>
    %165 = arith.negf %164 : vector<8x128xf32>
    %166 = math.exp %165 : vector<8x128xf32>
    %cst_51 = arith.constant 1.000000e+00 : f32
    %167 = vector.broadcast %cst_51 : f32 to vector<8x128xf32>
    %168 = arith.addf %167, %166 : vector<8x128xf32>
    %169 = arith.divf %167, %168 : vector<8x128xf32>
    %170 = vector.extract_strided_slice %153 {offsets = [0, 128], sizes = [8, 128], strides = [1, 1]} : vector<8x384xf32> to vector<8x128xf32>
    %171 = vector.extract_strided_slice %158 {offsets = [0, 128], sizes = [8, 128], strides = [1, 1]} : vector<8x384xf32> to vector<8x128xf32>
    %172 = arith.addf %170, %171 : vector<8x128xf32>
    %173 = arith.negf %172 : vector<8x128xf32>
    %174 = math.exp %173 : vector<8x128xf32>
    %cst_52 = arith.constant 1.000000e+00 : f32
    %175 = vector.broadcast %cst_52 : f32 to vector<8x128xf32>
    %176 = arith.addf %175, %174 : vector<8x128xf32>
    %177 = arith.divf %175, %176 : vector<8x128xf32>
    %178 = vector.extract_strided_slice %153 {offsets = [0, 256], sizes = [8, 128], strides = [1, 1]} : vector<8x384xf32> to vector<8x128xf32>
    %179 = vector.extract_strided_slice %158 {offsets = [0, 256], sizes = [8, 128], strides = [1, 1]} : vector<8x384xf32> to vector<8x128xf32>
    %180 = arith.mulf %169, %179 : vector<8x128xf32>
    %181 = arith.addf %178, %180 : vector<8x128xf32>
    %182 = math.tanh %181 : vector<8x128xf32>
    %cst_53 = arith.constant 1.000000e+00 : f32
    %183 = vector.broadcast %cst_53 : f32 to vector<8x128xf32>
    %184 = arith.subf %183, %177 : vector<8x128xf32>
    %185 = arith.mulf %184, %182 : vector<8x128xf32>
    %186 = arith.mulf %177, %116 : vector<8x128xf32>
    %187 = arith.addf %185, %186 : vector<8x128xf32>
    %188 = vector.extract_strided_slice %155 {offsets = [0, 0], sizes = [8, 128], strides = [1, 1]} : vector<8x384xf32> to vector<8x128xf32>
    %189 = vector.extract_strided_slice %161 {offsets = [0, 0], sizes = [8, 128], strides = [1, 1]} : vector<8x384xf32> to vector<8x128xf32>
    %190 = arith.addf %188, %189 : vector<8x128xf32>
    %191 = arith.negf %190 : vector<8x128xf32>
    %192 = math.exp %191 : vector<8x128xf32>
    %cst_54 = arith.constant 1.000000e+00 : f32
    %193 = vector.broadcast %cst_54 : f32 to vector<8x128xf32>
    %194 = arith.addf %193, %192 : vector<8x128xf32>
    %195 = arith.divf %193, %194 : vector<8x128xf32>
    %196 = vector.extract_strided_slice %155 {offsets = [0, 128], sizes = [8, 128], strides = [1, 1]} : vector<8x384xf32> to vector<8x128xf32>
    %197 = vector.extract_strided_slice %161 {offsets = [0, 128], sizes = [8, 128], strides = [1, 1]} : vector<8x384xf32> to vector<8x128xf32>
    %198 = arith.addf %196, %197 : vector<8x128xf32>
    %199 = arith.negf %198 : vector<8x128xf32>
    %200 = math.exp %199 : vector<8x128xf32>
    %cst_55 = arith.constant 1.000000e+00 : f32
    %201 = vector.broadcast %cst_55 : f32 to vector<8x128xf32>
    %202 = arith.addf %201, %200 : vector<8x128xf32>
    %203 = arith.divf %201, %202 : vector<8x128xf32>
    %204 = vector.extract_strided_slice %155 {offsets = [0, 256], sizes = [8, 128], strides = [1, 1]} : vector<8x384xf32> to vector<8x128xf32>
    %205 = vector.extract_strided_slice %161 {offsets = [0, 256], sizes = [8, 128], strides = [1, 1]} : vector<8x384xf32> to vector<8x128xf32>
    %206 = arith.mulf %195, %205 : vector<8x128xf32>
    %207 = arith.addf %204, %206 : vector<8x128xf32>
    %208 = math.tanh %207 : vector<8x128xf32>
    %cst_56 = arith.constant 1.000000e+00 : f32
    %209 = vector.broadcast %cst_56 : f32 to vector<8x128xf32>
    %210 = arith.subf %209, %203 : vector<8x128xf32>
    %211 = arith.mulf %210, %208 : vector<8x128xf32>
    %212 = arith.mulf %203, %142 : vector<8x128xf32>
    %213 = arith.addf %211, %212 : vector<8x128xf32>
    %214 = arith.index_cast %149 : i32 to index
    %c0_57 = arith.constant 0 : index
    %215 = vector.load %arg7[%214, %c0_57] : memref<64x256xf32, #tpu.memory_space<vmem>>, vector<8x128xf32>
    tpu.vector_store %arg7[%214, %c0_57], %187 {strides = array<i32>} : memref<64x256xf32, #tpu.memory_space<vmem>>, vector<8x128xf32>,
    %216 = arith.index_cast %151 : i32 to index
    %c128_58 = arith.constant 128 : index
    %217 = vector.load %arg7[%216, %c128_58] : memref<64x256xf32, #tpu.memory_space<vmem>>, vector<8x128xf32>
    tpu.vector_store %arg7[%216, %c128_58], %213 {strides = array<i32>} : memref<64x256xf32, #tpu.memory_space<vmem>>, vector<8x128xf32>,
    %c3_i32 = arith.constant 3 : i32
    %c7_i32_59 = arith.constant 7 : i32
    %218 = arith.subi %c7_i32_59, %c3_i32 : i32
    %c8_i32_60 = arith.constant 8 : i32
    %219 = arith.muli %c3_i32, %c8_i32_60 : i32
    %220 = tpu.assume_multiple %219, 8 : i32
    %c8_i32_61 = arith.constant 8 : i32
    %221 = arith.muli %218, %c8_i32_61 : i32
    %222 = tpu.assume_multiple %221, 8 : i32
    %223 = arith.index_cast %220 : i32 to index
    %c0_62 = arith.constant 0 : index
    %224 = vector.load %arg6[%223, %c0_62] : memref<64x768xf32, #tpu.memory_space<vmem>>, vector<8x384xf32>
    %225 = arith.index_cast %222 : i32 to index
    %c384_63 = arith.constant 384 : index
    %226 = vector.load %arg6[%225, %c384_63] : memref<64x768xf32, #tpu.memory_space<vmem>>, vector<8x384xf32>
    %227 = arith.truncf %187 : vector<8x128xf32> to vector<8x128xbf16>
    %c0_64 = arith.constant 0 : index
    %c0_65 = arith.constant 0 : index
    %228 = vector.load %arg2[%c0_64, %c0_65] : memref<128x384xbf16, #tpu.memory_space<vmem>>, vector<128x384xbf16>
    %cst_66 = arith.constant dense<0.000000e+00> : vector<8x384xf32>
    %229 = tpu.matmul %227, %228, %cst_66 {dimension_numbers = #tpu.dot_dimension_numbers<[1], [0], [0], [1], [0, 0, 1, 1], [], []>} : vector<8x128xbf16>, vector<128x384xbf16>, vector<8x384xf32> -> vector<8x384xf32>
    %230 = arith.truncf %213 : vector<8x128xf32> to vector<8x128xbf16>
    %c0_67 = arith.constant 0 : index
    %c0_68 = arith.constant 0 : index
    %231 = vector.load %arg3[%c0_67, %c0_68] : memref<128x384xbf16, #tpu.memory_space<vmem>>, vector<128x384xbf16>
    %cst_69 = arith.constant dense<0.000000e+00> : vector<8x384xf32>
    %232 = tpu.matmul %230, %231, %cst_69 {dimension_numbers = #tpu.dot_dimension_numbers<[1], [0], [0], [1], [0, 0, 1, 1], [], []>} : vector<8x128xbf16>, vector<128x384xbf16>, vector<8x384xf32> -> vector<8x384xf32>
    %233 = vector.extract_strided_slice %224 {offsets = [0, 0], sizes = [8, 128], strides = [1, 1]} : vector<8x384xf32> to vector<8x128xf32>
    %234 = vector.extract_strided_slice %229 {offsets = [0, 0], sizes = [8, 128], strides = [1, 1]} : vector<8x384xf32> to vector<8x128xf32>
    %235 = arith.addf %233, %234 : vector<8x128xf32>
    %236 = arith.negf %235 : vector<8x128xf32>
    %237 = math.exp %236 : vector<8x128xf32>
    %cst_70 = arith.constant 1.000000e+00 : f32
    %238 = vector.broadcast %cst_70 : f32 to vector<8x128xf32>
    %239 = arith.addf %238, %237 : vector<8x128xf32>
    %240 = arith.divf %238, %239 : vector<8x128xf32>
    %241 = vector.extract_strided_slice %224 {offsets = [0, 128], sizes = [8, 128], strides = [1, 1]} : vector<8x384xf32> to vector<8x128xf32>
    %242 = vector.extract_strided_slice %229 {offsets = [0, 128], sizes = [8, 128], strides = [1, 1]} : vector<8x384xf32> to vector<8x128xf32>
    %243 = arith.addf %241, %242 : vector<8x128xf32>
    %244 = arith.negf %243 : vector<8x128xf32>
    %245 = math.exp %244 : vector<8x128xf32>
    %cst_71 = arith.constant 1.000000e+00 : f32
    %246 = vector.broadcast %cst_71 : f32 to vector<8x128xf32>
    %247 = arith.addf %246, %245 : vector<8x128xf32>
    %248 = arith.divf %246, %247 : vector<8x128xf32>
    %249 = vector.extract_strided_slice %224 {offsets = [0, 256], sizes = [8, 128], strides = [1, 1]} : vector<8x384xf32> to vector<8x128xf32>
    %250 = vector.extract_strided_slice %229 {offsets = [0, 256], sizes = [8, 128], strides = [1, 1]} : vector<8x384xf32> to vector<8x128xf32>
    %251 = arith.mulf %240, %250 : vector<8x128xf32>
    %252 = arith.addf %249, %251 : vector<8x128xf32>
    %253 = math.tanh %252 : vector<8x128xf32>
    %cst_72 = arith.constant 1.000000e+00 : f32
    %254 = vector.broadcast %cst_72 : f32 to vector<8x128xf32>
    %255 = arith.subf %254, %248 : vector<8x128xf32>
    %256 = arith.mulf %255, %253 : vector<8x128xf32>
    %257 = arith.mulf %248, %187 : vector<8x128xf32>
    %258 = arith.addf %256, %257 : vector<8x128xf32>
    %259 = vector.extract_strided_slice %226 {offsets = [0, 0], sizes = [8, 128], strides = [1, 1]} : vector<8x384xf32> to vector<8x128xf32>
    %260 = vector.extract_strided_slice %232 {offsets = [0, 0], sizes = [8, 128], strides = [1, 1]} : vector<8x384xf32> to vector<8x128xf32>
    %261 = arith.addf %259, %260 : vector<8x128xf32>
    %262 = arith.negf %261 : vector<8x128xf32>
    %263 = math.exp %262 : vector<8x128xf32>
    %cst_73 = arith.constant 1.000000e+00 : f32
    %264 = vector.broadcast %cst_73 : f32 to vector<8x128xf32>
    %265 = arith.addf %264, %263 : vector<8x128xf32>
    %266 = arith.divf %264, %265 : vector<8x128xf32>
    %267 = vector.extract_strided_slice %226 {offsets = [0, 128], sizes = [8, 128], strides = [1, 1]} : vector<8x384xf32> to vector<8x128xf32>
    %268 = vector.extract_strided_slice %232 {offsets = [0, 128], sizes = [8, 128], strides = [1, 1]} : vector<8x384xf32> to vector<8x128xf32>
    %269 = arith.addf %267, %268 : vector<8x128xf32>
    %270 = arith.negf %269 : vector<8x128xf32>
    %271 = math.exp %270 : vector<8x128xf32>
    %cst_74 = arith.constant 1.000000e+00 : f32
    %272 = vector.broadcast %cst_74 : f32 to vector<8x128xf32>
    %273 = arith.addf %272, %271 : vector<8x128xf32>
    %274 = arith.divf %272, %273 : vector<8x128xf32>
    %275 = vector.extract_strided_slice %226 {offsets = [0, 256], sizes = [8, 128], strides = [1, 1]} : vector<8x384xf32> to vector<8x128xf32>
    %276 = vector.extract_strided_slice %232 {offsets = [0, 256], sizes = [8, 128], strides = [1, 1]} : vector<8x384xf32> to vector<8x128xf32>
    %277 = arith.mulf %266, %276 : vector<8x128xf32>
    %278 = arith.addf %275, %277 : vector<8x128xf32>
    %279 = math.tanh %278 : vector<8x128xf32>
    %cst_75 = arith.constant 1.000000e+00 : f32
    %280 = vector.broadcast %cst_75 : f32 to vector<8x128xf32>
    %281 = arith.subf %280, %274 : vector<8x128xf32>
    %282 = arith.mulf %281, %279 : vector<8x128xf32>
    %283 = arith.mulf %274, %213 : vector<8x128xf32>
    %284 = arith.addf %282, %283 : vector<8x128xf32>
    %285 = arith.index_cast %220 : i32 to index
    %c0_76 = arith.constant 0 : index
    %286 = vector.load %arg7[%285, %c0_76] : memref<64x256xf32, #tpu.memory_space<vmem>>, vector<8x128xf32>
    tpu.vector_store %arg7[%285, %c0_76], %258 {strides = array<i32>} : memref<64x256xf32, #tpu.memory_space<vmem>>, vector<8x128xf32>,
    %287 = arith.index_cast %222 : i32 to index
    %c128_77 = arith.constant 128 : index
    %288 = vector.load %arg7[%287, %c128_77] : memref<64x256xf32, #tpu.memory_space<vmem>>, vector<8x128xf32>
    tpu.vector_store %arg7[%287, %c128_77], %284 {strides = array<i32>} : memref<64x256xf32, #tpu.memory_space<vmem>>, vector<8x128xf32>,
    %c4_i32 = arith.constant 4 : i32
    %c7_i32_78 = arith.constant 7 : i32
    %289 = arith.subi %c7_i32_78, %c4_i32 : i32
    %c8_i32_79 = arith.constant 8 : i32
    %290 = arith.muli %c4_i32, %c8_i32_79 : i32
    %291 = tpu.assume_multiple %290, 8 : i32
    %c8_i32_80 = arith.constant 8 : i32
    %292 = arith.muli %289, %c8_i32_80 : i32
    %293 = tpu.assume_multiple %292, 8 : i32
    %294 = arith.index_cast %291 : i32 to index
    %c0_81 = arith.constant 0 : index
    %295 = vector.load %arg6[%294, %c0_81] : memref<64x768xf32, #tpu.memory_space<vmem>>, vector<8x384xf32>
    %296 = arith.index_cast %293 : i32 to index
    %c384_82 = arith.constant 384 : index
    %297 = vector.load %arg6[%296, %c384_82] : memref<64x768xf32, #tpu.memory_space<vmem>>, vector<8x384xf32>
    %298 = arith.truncf %258 : vector<8x128xf32> to vector<8x128xbf16>
    %c0_83 = arith.constant 0 : index
    %c0_84 = arith.constant 0 : index
    %299 = vector.load %arg2[%c0_83, %c0_84] : memref<128x384xbf16, #tpu.memory_space<vmem>>, vector<128x384xbf16>
    %cst_85 = arith.constant dense<0.000000e+00> : vector<8x384xf32>
    %300 = tpu.matmul %298, %299, %cst_85 {dimension_numbers = #tpu.dot_dimension_numbers<[1], [0], [0], [1], [0, 0, 1, 1], [], []>} : vector<8x128xbf16>, vector<128x384xbf16>, vector<8x384xf32> -> vector<8x384xf32>
    %301 = arith.truncf %284 : vector<8x128xf32> to vector<8x128xbf16>
    %c0_86 = arith.constant 0 : index
    %c0_87 = arith.constant 0 : index
    %302 = vector.load %arg3[%c0_86, %c0_87] : memref<128x384xbf16, #tpu.memory_space<vmem>>, vector<128x384xbf16>
    %cst_88 = arith.constant dense<0.000000e+00> : vector<8x384xf32>
    %303 = tpu.matmul %301, %302, %cst_88 {dimension_numbers = #tpu.dot_dimension_numbers<[1], [0], [0], [1], [0, 0, 1, 1], [], []>} : vector<8x128xbf16>, vector<128x384xbf16>, vector<8x384xf32> -> vector<8x384xf32>
    %304 = vector.extract_strided_slice %295 {offsets = [0, 0], sizes = [8, 128], strides = [1, 1]} : vector<8x384xf32> to vector<8x128xf32>
    %305 = vector.extract_strided_slice %300 {offsets = [0, 0], sizes = [8, 128], strides = [1, 1]} : vector<8x384xf32> to vector<8x128xf32>
    %306 = arith.addf %304, %305 : vector<8x128xf32>
    %307 = arith.negf %306 : vector<8x128xf32>
    %308 = math.exp %307 : vector<8x128xf32>
    %cst_89 = arith.constant 1.000000e+00 : f32
    %309 = vector.broadcast %cst_89 : f32 to vector<8x128xf32>
    %310 = arith.addf %309, %308 : vector<8x128xf32>
    %311 = arith.divf %309, %310 : vector<8x128xf32>
    %312 = vector.extract_strided_slice %295 {offsets = [0, 128], sizes = [8, 128], strides = [1, 1]} : vector<8x384xf32> to vector<8x128xf32>
    %313 = vector.extract_strided_slice %300 {offsets = [0, 128], sizes = [8, 128], strides = [1, 1]} : vector<8x384xf32> to vector<8x128xf32>
    %314 = arith.addf %312, %313 : vector<8x128xf32>
    %315 = arith.negf %314 : vector<8x128xf32>
    %316 = math.exp %315 : vector<8x128xf32>
    %cst_90 = arith.constant 1.000000e+00 : f32
    %317 = vector.broadcast %cst_90 : f32 to vector<8x128xf32>
    %318 = arith.addf %317, %316 : vector<8x128xf32>
    %319 = arith.divf %317, %318 : vector<8x128xf32>
    %320 = vector.extract_strided_slice %295 {offsets = [0, 256], sizes = [8, 128], strides = [1, 1]} : vector<8x384xf32> to vector<8x128xf32>
    %321 = vector.extract_strided_slice %300 {offsets = [0, 256], sizes = [8, 128], strides = [1, 1]} : vector<8x384xf32> to vector<8x128xf32>
    %322 = arith.mulf %311, %321 : vector<8x128xf32>
    %323 = arith.addf %320, %322 : vector<8x128xf32>
    %324 = math.tanh %323 : vector<8x128xf32>
    %cst_91 = arith.constant 1.000000e+00 : f32
    %325 = vector.broadcast %cst_91 : f32 to vector<8x128xf32>
    %326 = arith.subf %325, %319 : vector<8x128xf32>
    %327 = arith.mulf %326, %324 : vector<8x128xf32>
    %328 = arith.mulf %319, %258 : vector<8x128xf32>
    %329 = arith.addf %327, %328 : vector<8x128xf32>
    %330 = vector.extract_strided_slice %297 {offsets = [0, 0], sizes = [8, 128], strides = [1, 1]} : vector<8x384xf32> to vector<8x128xf32>
    %331 = vector.extract_strided_slice %303 {offsets = [0, 0], sizes = [8, 128], strides = [1, 1]} : vector<8x384xf32> to vector<8x128xf32>
    %332 = arith.addf %330, %331 : vector<8x128xf32>
    %333 = arith.negf %332 : vector<8x128xf32>
    %334 = math.exp %333 : vector<8x128xf32>
    %cst_92 = arith.constant 1.000000e+00 : f32
    %335 = vector.broadcast %cst_92 : f32 to vector<8x128xf32>
    %336 = arith.addf %335, %334 : vector<8x128xf32>
    %337 = arith.divf %335, %336 : vector<8x128xf32>
    %338 = vector.extract_strided_slice %297 {offsets = [0, 128], sizes = [8, 128], strides = [1, 1]} : vector<8x384xf32> to vector<8x128xf32>
    %339 = vector.extract_strided_slice %303 {offsets = [0, 128], sizes = [8, 128], strides = [1, 1]} : vector<8x384xf32> to vector<8x128xf32>
    %340 = arith.addf %338, %339 : vector<8x128xf32>
    %341 = arith.negf %340 : vector<8x128xf32>
    %342 = math.exp %341 : vector<8x128xf32>
    %cst_93 = arith.constant 1.000000e+00 : f32
    %343 = vector.broadcast %cst_93 : f32 to vector<8x128xf32>
    %344 = arith.addf %343, %342 : vector<8x128xf32>
    %345 = arith.divf %343, %344 : vector<8x128xf32>
    %346 = vector.extract_strided_slice %297 {offsets = [0, 256], sizes = [8, 128], strides = [1, 1]} : vector<8x384xf32> to vector<8x128xf32>
    %347 = vector.extract_strided_slice %303 {offsets = [0, 256], sizes = [8, 128], strides = [1, 1]} : vector<8x384xf32> to vector<8x128xf32>
    %348 = arith.mulf %337, %347 : vector<8x128xf32>
    %349 = arith.addf %346, %348 : vector<8x128xf32>
    %350 = math.tanh %349 : vector<8x128xf32>
    %cst_94 = arith.constant 1.000000e+00 : f32
    %351 = vector.broadcast %cst_94 : f32 to vector<8x128xf32>
    %352 = arith.subf %351, %345 : vector<8x128xf32>
    %353 = arith.mulf %352, %350 : vector<8x128xf32>
    %354 = arith.mulf %345, %284 : vector<8x128xf32>
    %355 = arith.addf %353, %354 : vector<8x128xf32>
    %356 = arith.index_cast %291 : i32 to index
    %c0_95 = arith.constant 0 : index
    %357 = vector.load %arg7[%356, %c0_95] : memref<64x256xf32, #tpu.memory_space<vmem>>, vector<8x128xf32>
    tpu.vector_store %arg7[%356, %c0_95], %329 {strides = array<i32>} : memref<64x256xf32, #tpu.memory_space<vmem>>, vector<8x128xf32>,
    %358 = arith.index_cast %293 : i32 to index
    %c128_96 = arith.constant 128 : index
    %359 = vector.load %arg7[%358, %c128_96] : memref<64x256xf32, #tpu.memory_space<vmem>>, vector<8x128xf32>
    tpu.vector_store %arg7[%358, %c128_96], %355 {strides = array<i32>} : memref<64x256xf32, #tpu.memory_space<vmem>>, vector<8x128xf32>,
    %c5_i32 = arith.constant 5 : i32
    %c7_i32_97 = arith.constant 7 : i32
    %360 = arith.subi %c7_i32_97, %c5_i32 : i32
    %c8_i32_98 = arith.constant 8 : i32
    %361 = arith.muli %c5_i32, %c8_i32_98 : i32
    %362 = tpu.assume_multiple %361, 8 : i32
    %c8_i32_99 = arith.constant 8 : i32
    %363 = arith.muli %360, %c8_i32_99 : i32
    %364 = tpu.assume_multiple %363, 8 : i32
    %365 = arith.index_cast %362 : i32 to index
    %c0_100 = arith.constant 0 : index
    %366 = vector.load %arg6[%365, %c0_100] : memref<64x768xf32, #tpu.memory_space<vmem>>, vector<8x384xf32>
    %367 = arith.index_cast %364 : i32 to index
    %c384_101 = arith.constant 384 : index
    %368 = vector.load %arg6[%367, %c384_101] : memref<64x768xf32, #tpu.memory_space<vmem>>, vector<8x384xf32>
    %369 = arith.truncf %329 : vector<8x128xf32> to vector<8x128xbf16>
    %c0_102 = arith.constant 0 : index
    %c0_103 = arith.constant 0 : index
    %370 = vector.load %arg2[%c0_102, %c0_103] : memref<128x384xbf16, #tpu.memory_space<vmem>>, vector<128x384xbf16>
    %cst_104 = arith.constant dense<0.000000e+00> : vector<8x384xf32>
    %371 = tpu.matmul %369, %370, %cst_104 {dimension_numbers = #tpu.dot_dimension_numbers<[1], [0], [0], [1], [0, 0, 1, 1], [], []>} : vector<8x128xbf16>, vector<128x384xbf16>, vector<8x384xf32> -> vector<8x384xf32>
    %372 = arith.truncf %355 : vector<8x128xf32> to vector<8x128xbf16>
    %c0_105 = arith.constant 0 : index
    %c0_106 = arith.constant 0 : index
    %373 = vector.load %arg3[%c0_105, %c0_106] : memref<128x384xbf16, #tpu.memory_space<vmem>>, vector<128x384xbf16>
    %cst_107 = arith.constant dense<0.000000e+00> : vector<8x384xf32>
    %374 = tpu.matmul %372, %373, %cst_107 {dimension_numbers = #tpu.dot_dimension_numbers<[1], [0], [0], [1], [0, 0, 1, 1], [], []>} : vector<8x128xbf16>, vector<128x384xbf16>, vector<8x384xf32> -> vector<8x384xf32>
    %375 = vector.extract_strided_slice %366 {offsets = [0, 0], sizes = [8, 128], strides = [1, 1]} : vector<8x384xf32> to vector<8x128xf32>
    %376 = vector.extract_strided_slice %371 {offsets = [0, 0], sizes = [8, 128], strides = [1, 1]} : vector<8x384xf32> to vector<8x128xf32>
    %377 = arith.addf %375, %376 : vector<8x128xf32>
    %378 = arith.negf %377 : vector<8x128xf32>
    %379 = math.exp %378 : vector<8x128xf32>
    %cst_108 = arith.constant 1.000000e+00 : f32
    %380 = vector.broadcast %cst_108 : f32 to vector<8x128xf32>
    %381 = arith.addf %380, %379 : vector<8x128xf32>
    %382 = arith.divf %380, %381 : vector<8x128xf32>
    %383 = vector.extract_strided_slice %366 {offsets = [0, 128], sizes = [8, 128], strides = [1, 1]} : vector<8x384xf32> to vector<8x128xf32>
    %384 = vector.extract_strided_slice %371 {offsets = [0, 128], sizes = [8, 128], strides = [1, 1]} : vector<8x384xf32> to vector<8x128xf32>
    %385 = arith.addf %383, %384 : vector<8x128xf32>
    %386 = arith.negf %385 : vector<8x128xf32>
    %387 = math.exp %386 : vector<8x128xf32>
    %cst_109 = arith.constant 1.000000e+00 : f32
    %388 = vector.broadcast %cst_109 : f32 to vector<8x128xf32>
    %389 = arith.addf %388, %387 : vector<8x128xf32>
    %390 = arith.divf %388, %389 : vector<8x128xf32>
    %391 = vector.extract_strided_slice %366 {offsets = [0, 256], sizes = [8, 128], strides = [1, 1]} : vector<8x384xf32> to vector<8x128xf32>
    %392 = vector.extract_strided_slice %371 {offsets = [0, 256], sizes = [8, 128], strides = [1, 1]} : vector<8x384xf32> to vector<8x128xf32>
    %393 = arith.mulf %382, %392 : vector<8x128xf32>
    %394 = arith.addf %391, %393 : vector<8x128xf32>
    %395 = math.tanh %394 : vector<8x128xf32>
    %cst_110 = arith.constant 1.000000e+00 : f32
    %396 = vector.broadcast %cst_110 : f32 to vector<8x128xf32>
    %397 = arith.subf %396, %390 : vector<8x128xf32>
    %398 = arith.mulf %397, %395 : vector<8x128xf32>
    %399 = arith.mulf %390, %329 : vector<8x128xf32>
    %400 = arith.addf %398, %399 : vector<8x128xf32>
    %401 = vector.extract_strided_slice %368 {offsets = [0, 0], sizes = [8, 128], strides = [1, 1]} : vector<8x384xf32> to vector<8x128xf32>
    %402 = vector.extract_strided_slice %374 {offsets = [0, 0], sizes = [8, 128], strides = [1, 1]} : vector<8x384xf32> to vector<8x128xf32>
    %403 = arith.addf %401, %402 : vector<8x128xf32>
    %404 = arith.negf %403 : vector<8x128xf32>
    %405 = math.exp %404 : vector<8x128xf32>
    %cst_111 = arith.constant 1.000000e+00 : f32
    %406 = vector.broadcast %cst_111 : f32 to vector<8x128xf32>
    %407 = arith.addf %406, %405 : vector<8x128xf32>
    %408 = arith.divf %406, %407 : vector<8x128xf32>
    %409 = vector.extract_strided_slice %368 {offsets = [0, 128], sizes = [8, 128], strides = [1, 1]} : vector<8x384xf32> to vector<8x128xf32>
    %410 = vector.extract_strided_slice %374 {offsets = [0, 128], sizes = [8, 128], strides = [1, 1]} : vector<8x384xf32> to vector<8x128xf32>
    %411 = arith.addf %409, %410 : vector<8x128xf32>
    %412 = arith.negf %411 : vector<8x128xf32>
    %413 = math.exp %412 : vector<8x128xf32>
    %cst_112 = arith.constant 1.000000e+00 : f32
    %414 = vector.broadcast %cst_112 : f32 to vector<8x128xf32>
    %415 = arith.addf %414, %413 : vector<8x128xf32>
    %416 = arith.divf %414, %415 : vector<8x128xf32>
    %417 = vector.extract_strided_slice %368 {offsets = [0, 256], sizes = [8, 128], strides = [1, 1]} : vector<8x384xf32> to vector<8x128xf32>
    %418 = vector.extract_strided_slice %374 {offsets = [0, 256], sizes = [8, 128], strides = [1, 1]} : vector<8x384xf32> to vector<8x128xf32>
    %419 = arith.mulf %408, %418 : vector<8x128xf32>
    %420 = arith.addf %417, %419 : vector<8x128xf32>
    %421 = math.tanh %420 : vector<8x128xf32>
    %cst_113 = arith.constant 1.000000e+00 : f32
    %422 = vector.broadcast %cst_113 : f32 to vector<8x128xf32>
    %423 = arith.subf %422, %416 : vector<8x128xf32>
    %424 = arith.mulf %423, %421 : vector<8x128xf32>
    %425 = arith.mulf %416, %355 : vector<8x128xf32>
    %426 = arith.addf %424, %425 : vector<8x128xf32>
    %427 = arith.index_cast %362 : i32 to index
    %c0_114 = arith.constant 0 : index
    %428 = vector.load %arg7[%427, %c0_114] : memref<64x256xf32, #tpu.memory_space<vmem>>, vector<8x128xf32>
    tpu.vector_store %arg7[%427, %c0_114], %400 {strides = array<i32>} : memref<64x256xf32, #tpu.memory_space<vmem>>, vector<8x128xf32>,
    %429 = arith.index_cast %364 : i32 to index
    %c128_115 = arith.constant 128 : index
    %430 = vector.load %arg7[%429, %c128_115] : memref<64x256xf32, #tpu.memory_space<vmem>>, vector<8x128xf32>
    tpu.vector_store %arg7[%429, %c128_115], %426 {strides = array<i32>} : memref<64x256xf32, #tpu.memory_space<vmem>>, vector<8x128xf32>,
    %c6_i32 = arith.constant 6 : i32
    %c7_i32_116 = arith.constant 7 : i32
    %431 = arith.subi %c7_i32_116, %c6_i32 : i32
    %c8_i32_117 = arith.constant 8 : i32
    %432 = arith.muli %c6_i32, %c8_i32_117 : i32
    %433 = tpu.assume_multiple %432, 8 : i32
    %c8_i32_118 = arith.constant 8 : i32
    %434 = arith.muli %431, %c8_i32_118 : i32
    %435 = tpu.assume_multiple %434, 8 : i32
    %436 = arith.index_cast %433 : i32 to index
    %c0_119 = arith.constant 0 : index
    %437 = vector.load %arg6[%436, %c0_119] : memref<64x768xf32, #tpu.memory_space<vmem>>, vector<8x384xf32>
    %438 = arith.index_cast %435 : i32 to index
    %c384_120 = arith.constant 384 : index
    %439 = vector.load %arg6[%438, %c384_120] : memref<64x768xf32, #tpu.memory_space<vmem>>, vector<8x384xf32>
    %440 = arith.truncf %400 : vector<8x128xf32> to vector<8x128xbf16>
    %c0_121 = arith.constant 0 : index
    %c0_122 = arith.constant 0 : index
    %441 = vector.load %arg2[%c0_121, %c0_122] : memref<128x384xbf16, #tpu.memory_space<vmem>>, vector<128x384xbf16>
    %cst_123 = arith.constant dense<0.000000e+00> : vector<8x384xf32>
    %442 = tpu.matmul %440, %441, %cst_123 {dimension_numbers = #tpu.dot_dimension_numbers<[1], [0], [0], [1], [0, 0, 1, 1], [], []>} : vector<8x128xbf16>, vector<128x384xbf16>, vector<8x384xf32> -> vector<8x384xf32>
    %443 = arith.truncf %426 : vector<8x128xf32> to vector<8x128xbf16>
    %c0_124 = arith.constant 0 : index
    %c0_125 = arith.constant 0 : index
    %444 = vector.load %arg3[%c0_124, %c0_125] : memref<128x384xbf16, #tpu.memory_space<vmem>>, vector<128x384xbf16>
    %cst_126 = arith.constant dense<0.000000e+00> : vector<8x384xf32>
    %445 = tpu.matmul %443, %444, %cst_126 {dimension_numbers = #tpu.dot_dimension_numbers<[1], [0], [0], [1], [0, 0, 1, 1], [], []>} : vector<8x128xbf16>, vector<128x384xbf16>, vector<8x384xf32> -> vector<8x384xf32>
    %446 = vector.extract_strided_slice %437 {offsets = [0, 0], sizes = [8, 128], strides = [1, 1]} : vector<8x384xf32> to vector<8x128xf32>
    %447 = vector.extract_strided_slice %442 {offsets = [0, 0], sizes = [8, 128], strides = [1, 1]} : vector<8x384xf32> to vector<8x128xf32>
    %448 = arith.addf %446, %447 : vector<8x128xf32>
    %449 = arith.negf %448 : vector<8x128xf32>
    %450 = math.exp %449 : vector<8x128xf32>
    %cst_127 = arith.constant 1.000000e+00 : f32
    %451 = vector.broadcast %cst_127 : f32 to vector<8x128xf32>
    %452 = arith.addf %451, %450 : vector<8x128xf32>
    %453 = arith.divf %451, %452 : vector<8x128xf32>
    %454 = vector.extract_strided_slice %437 {offsets = [0, 128], sizes = [8, 128], strides = [1, 1]} : vector<8x384xf32> to vector<8x128xf32>
    %455 = vector.extract_strided_slice %442 {offsets = [0, 128], sizes = [8, 128], strides = [1, 1]} : vector<8x384xf32> to vector<8x128xf32>
    %456 = arith.addf %454, %455 : vector<8x128xf32>
    %457 = arith.negf %456 : vector<8x128xf32>
    %458 = math.exp %457 : vector<8x128xf32>
    %cst_128 = arith.constant 1.000000e+00 : f32
    %459 = vector.broadcast %cst_128 : f32 to vector<8x128xf32>
    %460 = arith.addf %459, %458 : vector<8x128xf32>
    %461 = arith.divf %459, %460 : vector<8x128xf32>
    %462 = vector.extract_strided_slice %437 {offsets = [0, 256], sizes = [8, 128], strides = [1, 1]} : vector<8x384xf32> to vector<8x128xf32>
    %463 = vector.extract_strided_slice %442 {offsets = [0, 256], sizes = [8, 128], strides = [1, 1]} : vector<8x384xf32> to vector<8x128xf32>
    %464 = arith.mulf %453, %463 : vector<8x128xf32>
    %465 = arith.addf %462, %464 : vector<8x128xf32>
    %466 = math.tanh %465 : vector<8x128xf32>
    %cst_129 = arith.constant 1.000000e+00 : f32
    %467 = vector.broadcast %cst_129 : f32 to vector<8x128xf32>
    %468 = arith.subf %467, %461 : vector<8x128xf32>
    %469 = arith.mulf %468, %466 : vector<8x128xf32>
    %470 = arith.mulf %461, %400 : vector<8x128xf32>
    %471 = arith.addf %469, %470 : vector<8x128xf32>
    %472 = vector.extract_strided_slice %439 {offsets = [0, 0], sizes = [8, 128], strides = [1, 1]} : vector<8x384xf32> to vector<8x128xf32>
    %473 = vector.extract_strided_slice %445 {offsets = [0, 0], sizes = [8, 128], strides = [1, 1]} : vector<8x384xf32> to vector<8x128xf32>
    %474 = arith.addf %472, %473 : vector<8x128xf32>
    %475 = arith.negf %474 : vector<8x128xf32>
    %476 = math.exp %475 : vector<8x128xf32>
    %cst_130 = arith.constant 1.000000e+00 : f32
    %477 = vector.broadcast %cst_130 : f32 to vector<8x128xf32>
    %478 = arith.addf %477, %476 : vector<8x128xf32>
    %479 = arith.divf %477, %478 : vector<8x128xf32>
    %480 = vector.extract_strided_slice %439 {offsets = [0, 128], sizes = [8, 128], strides = [1, 1]} : vector<8x384xf32> to vector<8x128xf32>
    %481 = vector.extract_strided_slice %445 {offsets = [0, 128], sizes = [8, 128], strides = [1, 1]} : vector<8x384xf32> to vector<8x128xf32>
    %482 = arith.addf %480, %481 : vector<8x128xf32>
    %483 = arith.negf %482 : vector<8x128xf32>
    %484 = math.exp %483 : vector<8x128xf32>
    %cst_131 = arith.constant 1.000000e+00 : f32
    %485 = vector.broadcast %cst_131 : f32 to vector<8x128xf32>
    %486 = arith.addf %485, %484 : vector<8x128xf32>
    %487 = arith.divf %485, %486 : vector<8x128xf32>
    %488 = vector.extract_strided_slice %439 {offsets = [0, 256], sizes = [8, 128], strides = [1, 1]} : vector<8x384xf32> to vector<8x128xf32>
    %489 = vector.extract_strided_slice %445 {offsets = [0, 256], sizes = [8, 128], strides = [1, 1]} : vector<8x384xf32> to vector<8x128xf32>
    %490 = arith.mulf %479, %489 : vector<8x128xf32>
    %491 = arith.addf %488, %490 : vector<8x128xf32>
    %492 = math.tanh %491 : vector<8x128xf32>
    %cst_132 = arith.constant 1.000000e+00 : f32
    %493 = vector.broadcast %cst_132 : f32 to vector<8x128xf32>
    %494 = arith.subf %493, %487 : vector<8x128xf32>
    %495 = arith.mulf %494, %492 : vector<8x128xf32>
    %496 = arith.mulf %487, %426 : vector<8x128xf32>
    %497 = arith.addf %495, %496 : vector<8x128xf32>
    %498 = arith.index_cast %433 : i32 to index
    %c0_133 = arith.constant 0 : index
    %499 = vector.load %arg7[%498, %c0_133] : memref<64x256xf32, #tpu.memory_space<vmem>>, vector<8x128xf32>
    tpu.vector_store %arg7[%498, %c0_133], %471 {strides = array<i32>} : memref<64x256xf32, #tpu.memory_space<vmem>>, vector<8x128xf32>,
    %500 = arith.index_cast %435 : i32 to index
    %c128_134 = arith.constant 128 : index
    %501 = vector.load %arg7[%500, %c128_134] : memref<64x256xf32, #tpu.memory_space<vmem>>, vector<8x128xf32>
    tpu.vector_store %arg7[%500, %c128_134], %497 {strides = array<i32>} : memref<64x256xf32, #tpu.memory_space<vmem>>, vector<8x128xf32>,
    %c7_i32_135 = arith.constant 7 : i32
    %c7_i32_136 = arith.constant 7 : i32
    %502 = arith.subi %c7_i32_136, %c7_i32_135 : i32
    %c8_i32_137 = arith.constant 8 : i32
    %503 = arith.muli %c7_i32_135, %c8_i32_137 : i32
    %504 = tpu.assume_multiple %503, 8 : i32
    %c8_i32_138 = arith.constant 8 : i32
    %505 = arith.muli %502, %c8_i32_138 : i32
    %506 = tpu.assume_multiple %505, 8 : i32
    %507 = arith.index_cast %504 : i32 to index
    %c0_139 = arith.constant 0 : index
    %508 = vector.load %arg6[%507, %c0_139] : memref<64x768xf32, #tpu.memory_space<vmem>>, vector<8x384xf32>
    %509 = arith.index_cast %506 : i32 to index
    %c384_140 = arith.constant 384 : index
    %510 = vector.load %arg6[%509, %c384_140] : memref<64x768xf32, #tpu.memory_space<vmem>>, vector<8x384xf32>
    %511 = arith.truncf %471 : vector<8x128xf32> to vector<8x128xbf16>
    %c0_141 = arith.constant 0 : index
    %c0_142 = arith.constant 0 : index
    %512 = vector.load %arg2[%c0_141, %c0_142] : memref<128x384xbf16, #tpu.memory_space<vmem>>, vector<128x384xbf16>
    %cst_143 = arith.constant dense<0.000000e+00> : vector<8x384xf32>
    %513 = tpu.matmul %511, %512, %cst_143 {dimension_numbers = #tpu.dot_dimension_numbers<[1], [0], [0], [1], [0, 0, 1, 1], [], []>} : vector<8x128xbf16>, vector<128x384xbf16>, vector<8x384xf32> -> vector<8x384xf32>
    %514 = arith.truncf %497 : vector<8x128xf32> to vector<8x128xbf16>
    %c0_144 = arith.constant 0 : index
    %c0_145 = arith.constant 0 : index
    %515 = vector.load %arg3[%c0_144, %c0_145] : memref<128x384xbf16, #tpu.memory_space<vmem>>, vector<128x384xbf16>
    %cst_146 = arith.constant dense<0.000000e+00> : vector<8x384xf32>
    %516 = tpu.matmul %514, %515, %cst_146 {dimension_numbers = #tpu.dot_dimension_numbers<[1], [0], [0], [1], [0, 0, 1, 1], [], []>} : vector<8x128xbf16>, vector<128x384xbf16>, vector<8x384xf32> -> vector<8x384xf32>
    %517 = vector.extract_strided_slice %508 {offsets = [0, 0], sizes = [8, 128], strides = [1, 1]} : vector<8x384xf32> to vector<8x128xf32>
    %518 = vector.extract_strided_slice %513 {offsets = [0, 0], sizes = [8, 128], strides = [1, 1]} : vector<8x384xf32> to vector<8x128xf32>
    %519 = arith.addf %517, %518 : vector<8x128xf32>
    %520 = arith.negf %519 : vector<8x128xf32>
    %521 = math.exp %520 : vector<8x128xf32>
    %cst_147 = arith.constant 1.000000e+00 : f32
    %522 = vector.broadcast %cst_147 : f32 to vector<8x128xf32>
    %523 = arith.addf %522, %521 : vector<8x128xf32>
    %524 = arith.divf %522, %523 : vector<8x128xf32>
    %525 = vector.extract_strided_slice %508 {offsets = [0, 128], sizes = [8, 128], strides = [1, 1]} : vector<8x384xf32> to vector<8x128xf32>
    %526 = vector.extract_strided_slice %513 {offsets = [0, 128], sizes = [8, 128], strides = [1, 1]} : vector<8x384xf32> to vector<8x128xf32>
    %527 = arith.addf %525, %526 : vector<8x128xf32>
    %528 = arith.negf %527 : vector<8x128xf32>
    %529 = math.exp %528 : vector<8x128xf32>
    %cst_148 = arith.constant 1.000000e+00 : f32
    %530 = vector.broadcast %cst_148 : f32 to vector<8x128xf32>
    %531 = arith.addf %530, %529 : vector<8x128xf32>
    %532 = arith.divf %530, %531 : vector<8x128xf32>
    %533 = vector.extract_strided_slice %508 {offsets = [0, 256], sizes = [8, 128], strides = [1, 1]} : vector<8x384xf32> to vector<8x128xf32>
    %534 = vector.extract_strided_slice %513 {offsets = [0, 256], sizes = [8, 128], strides = [1, 1]} : vector<8x384xf32> to vector<8x128xf32>
    %535 = arith.mulf %524, %534 : vector<8x128xf32>
    %536 = arith.addf %533, %535 : vector<8x128xf32>
    %537 = math.tanh %536 : vector<8x128xf32>
    %cst_149 = arith.constant 1.000000e+00 : f32
    %538 = vector.broadcast %cst_149 : f32 to vector<8x128xf32>
    %539 = arith.subf %538, %532 : vector<8x128xf32>
    %540 = arith.mulf %539, %537 : vector<8x128xf32>
    %541 = arith.mulf %532, %471 : vector<8x128xf32>
    %542 = arith.addf %540, %541 : vector<8x128xf32>
    %543 = vector.extract_strided_slice %510 {offsets = [0, 0], sizes = [8, 128], strides = [1, 1]} : vector<8x384xf32> to vector<8x128xf32>
    %544 = vector.extract_strided_slice %516 {offsets = [0, 0], sizes = [8, 128], strides = [1, 1]} : vector<8x384xf32> to vector<8x128xf32>
    %545 = arith.addf %543, %544 : vector<8x128xf32>
    %546 = arith.negf %545 : vector<8x128xf32>
    %547 = math.exp %546 : vector<8x128xf32>
    %cst_150 = arith.constant 1.000000e+00 : f32
    %548 = vector.broadcast %cst_150 : f32 to vector<8x128xf32>
    %549 = arith.addf %548, %547 : vector<8x128xf32>
    %550 = arith.divf %548, %549 : vector<8x128xf32>
    %551 = vector.extract_strided_slice %510 {offsets = [0, 128], sizes = [8, 128], strides = [1, 1]} : vector<8x384xf32> to vector<8x128xf32>
    %552 = vector.extract_strided_slice %516 {offsets = [0, 128], sizes = [8, 128], strides = [1, 1]} : vector<8x384xf32> to vector<8x128xf32>
    %553 = arith.addf %551, %552 : vector<8x128xf32>
    %554 = arith.negf %553 : vector<8x128xf32>
    %555 = math.exp %554 : vector<8x128xf32>
    %cst_151 = arith.constant 1.000000e+00 : f32
    %556 = vector.broadcast %cst_151 : f32 to vector<8x128xf32>
    %557 = arith.addf %556, %555 : vector<8x128xf32>
    %558 = arith.divf %556, %557 : vector<8x128xf32>
    %559 = vector.extract_strided_slice %510 {offsets = [0, 256], sizes = [8, 128], strides = [1, 1]} : vector<8x384xf32> to vector<8x128xf32>
    %560 = vector.extract_strided_slice %516 {offsets = [0, 256], sizes = [8, 128], strides = [1, 1]} : vector<8x384xf32> to vector<8x128xf32>
    %561 = arith.mulf %550, %560 : vector<8x128xf32>
    %562 = arith.addf %559, %561 : vector<8x128xf32>
    %563 = math.tanh %562 : vector<8x128xf32>
    %cst_152 = arith.constant 1.000000e+00 : f32
    %564 = vector.broadcast %cst_152 : f32 to vector<8x128xf32>
    %565 = arith.subf %564, %558 : vector<8x128xf32>
    %566 = arith.mulf %565, %563 : vector<8x128xf32>
    %567 = arith.mulf %558, %497 : vector<8x128xf32>
    %568 = arith.addf %566, %567 : vector<8x128xf32>
    %569 = arith.index_cast %504 : i32 to index
    %c0_153 = arith.constant 0 : index
    %570 = vector.load %arg7[%569, %c0_153] : memref<64x256xf32, #tpu.memory_space<vmem>>, vector<8x128xf32>
    tpu.vector_store %arg7[%569, %c0_153], %542 {strides = array<i32>} : memref<64x256xf32, #tpu.memory_space<vmem>>, vector<8x128xf32>,
    %571 = arith.index_cast %506 : i32 to index
    %c128_154 = arith.constant 128 : index
    %572 = vector.load %arg7[%571, %c128_154] : memref<64x256xf32, #tpu.memory_space<vmem>>, vector<8x128xf32>
    tpu.vector_store %arg7[%571, %c128_154], %568 {strides = array<i32>} : memref<64x256xf32, #tpu.memory_space<vmem>>, vector<8x128xf32>,
    %c8_i32_155 = arith.constant 8 : i32
    %c0_156 = arith.constant 0 : index
    %c0_157 = arith.constant 0 : index
    %573 = vector.load %arg7[%c0_156, %c0_157] : memref<64x256xf32, #tpu.memory_space<vmem>>, vector<64x256xf32>
    %574 = arith.truncf %573 : vector<64x256xf32> to vector<64x256xbf16>
    %c0_158 = arith.constant 0 : index
    %c0_159 = arith.constant 0 : index
    %575 = vector.load %arg4[%c0_158, %c0_159] : memref<256x128xbf16, #tpu.memory_space<vmem>>, vector<256x128xbf16>
    %cst_160 = arith.constant dense<0.000000e+00> : vector<64x128xf32>
    %576 = tpu.matmul %574, %575, %cst_160 {dimension_numbers = #tpu.dot_dimension_numbers<[1], [0], [0], [1], [0, 0, 1, 1], [], []>} : vector<64x256xbf16>, vector<256x128xbf16>, vector<64x128xf32> -> vector<64x128xf32>
    %c0_161 = arith.constant 0 : index
    %c0_162 = arith.constant 0 : index
    %577 = vector.load %arg5[%c0_161, %c0_162] : memref<64x128xf32, #tpu.memory_space<vmem>>, vector<64x128xf32>
    tpu.vector_store %arg5[%c0_161, %c0_162], %576 {strides = array<i32>} : memref<64x128xf32, #tpu.memory_space<vmem>>, vector<64x128xf32>,
    return
  }
}

</mosaic_0001>

<bundles_post_ra>
// kernel: tpu_custom_call.1
= control target key start
LH: loop header
LB: loop body
LE: loop exit
PB: predicated region body
PF: predicated region fallthrough
CT: control target
= control target key end

     0   :  { %10 = vsyncpa [#allocation5], 0  ;;  %s7890_s0 = inlined_call_operand.hbm [shape: bf16[64,128], index: 0, kind: input, shape index: {}]   ;;  %s7891_s1 = inlined_call_operand.hbm [shape: bf16[128,768], index: 1, kind: input, shape index: {}]   ;;  %s7892_s2 = inlined_call_operand.hbm [shape: bf16[128,384], index: 2, kind: input, shape index: {}]   ;;  %s7893_s3 = inlined_call_operand.hbm [shape: bf16[128,384], index: 3, kind: input, shape index: {}]   ;;  %s7894_s4 = inlined_call_operand.hbm [shape: bf16[256,128], index: 4, kind: input, shape index: {}]   ;;  %s7895_s5 = inlined_call_operand.hbm [shape: f32[64,128], index: 5, kind: output, shape index: {}]  }
   0x1   :  { %11 = vsyncpa [#allocation8], 0 }
   0x2   :  { %12 = vsyncpa [#allocation11], 0 }
   0x3   :  { %13 = vsyncpa [#allocation6], 0  ;;  %s6935_s18 = smov [#allocation7]   ;;  %s6795_s22 = scalar_lea.hbm %s7891_s1, 6144 }
   0x4   :  { %s31_s19 = sshll.u32 %s6935_s18, 4  ;;  %p6796_p0 = scmp.ne.s32.totalorder %s7891_s1, %s6795_s22  ;;  %s32_s19 = int_to_ptr.vmem [resolvable:$true] %s31_s19 }
   0x5   :  { %p6799_p1 = scmp.lt.u32.totalorder %s6795_s22, %s7891_s1 }
   0x7   :  { %p6801_p2 = pnand %p6799_p1, %p6796_p0 }
   0x9   :  { %6804 = shalt.err (!%p6801_p2)
}
   0xa   :  { %s6805_s27 = scalar_lea.vmem %s32_s19, 6144  ;;  %p6810_p4 = scmp.lt.s32.totalorder %s32_s19, %s32_s19 }
   0xb   :  { %p6806_p3 = scmp.ne.s32.totalorder %s32_s19, %s6805_s27  ;;  %p6811_p5 = scmp.lt.s32.totalorder %s6805_s27, %s6805_s27 }
   0xd   :  { %p6812_p6 = por %p6811_p5, %p6810_p4 }
   0xf   :  { %p6813_p7 = pnand %p6812_p6, %p6806_p3 }
  0x11   :  { %6816 = shalt.err (!%p6813_p7)
}
  0x12   :  { %s6936_s28 = smov 384   ;;  %s6937_s29 = smov 24  }
  0x13   :  { %37 = dma.hbm_to_vmem [thread:$0]  %s7891_s1, 6144, %s32_s19, [#allocation8], %s6936_s28, %s6936_s28, %s6937_s29  }
  0x14   :  { %s6938_s7 = smov [#allocation10]   ;;  %s6939_s9 = smov [#allocation4]  }
  0x15   :  { %s55_s8 = sshll.u32 %s6938_s7, 4  ;;  %s19_s10 = sshll.u32 %s6939_s9, 4  ;;  %s56_s8 = int_to_ptr.vmem [resolvable:$true] %s55_s8  ;;  %s20_s10 = int_to_ptr.vmem [resolvable:$true] %s19_s10 }
  0x16   :  { %s6817_s13 = scalar_lea.hbm %s7893_s3, 3072 }
  0x17   :  { %p6818_p8 = scmp.ne.s32.totalorder %s7893_s3, %s6817_s13  ;;  %p6821_p9 = scmp.lt.u32.totalorder %s6817_s13, %s7893_s3 }
  0x19   :  { %p6823_p10 = pnand %p6821_p9, %p6818_p8 }
  0x1b   :  { %6826 = shalt.err (!%p6823_p10)
}
  0x1c   :  { %s6827_s1 = scalar_lea.vmem %s56_s8, 3072  ;;  %p6832_p12 = scmp.lt.s32.totalorder %s56_s8, %s56_s8 }
  0x1d   :  { %p6828_p11 = scmp.ne.s32.totalorder %s56_s8, %s6827_s1  ;;  %p6833_p13 = scmp.lt.s32.totalorder %s6827_s1, %s6827_s1 }
  0x1f   :  { %p6834_p0 = por %p6833_p13, %p6832_p12 }
  0x21   :  { %p6835_p1 = pnand %p6834_p0, %p6828_p11 }
  0x23   :  { %6838 = shalt.err (!%p6835_p1)
}
  0x24   :  { %s6940_s18 = smov 192   ;;  %s6941_s19 = smov 12  }
  0x25   :  { %61 = dma.hbm_to_vmem [thread:$0]  %s7893_s3, 3072, %s56_s8, [#allocation11], %s6940_s18, %s6940_s18, %s6941_s19  }
  0x26   :  { %s6839_s24 = scalar_lea.hbm %s7890_s0, 512 }
  0x27   :  { %p6840_p2 = scmp.ne.s32.totalorder %s7890_s0, %s6839_s24  ;;  %p6843_p3 = scmp.lt.u32.totalorder %s6839_s24, %s7890_s0 }
  0x29   :  { %p6845_p4 = pnand %p6843_p3, %p6840_p2 }
  0x2b   :  { %6848 = shalt.err (!%p6845_p4)
}
  0x2c   :  { %s6849_s29 = scalar_lea.vmem %s20_s10, 512  ;;  %p6854_p6 = scmp.lt.s32.totalorder %s20_s10, %s20_s10 }
  0x2d   :  { %p6850_p5 = scmp.ne.s32.totalorder %s20_s10, %s6849_s29  ;;  %p6855_p7 = scmp.lt.s32.totalorder %s6849_s29, %s6849_s29 }
  0x2f   :  { %p6856_p8 = por %p6855_p7, %p6854_p6 }
  0x31   :  { %p6857_p9 = pnand %p6856_p8, %p6850_p5 }
  0x33   :  { %6860 = shalt.err (!%p6857_p9)
}
  0x34   :  { %s6942_s3 = smov 64   ;;  %s6943_s30 = smov 4  }
  0x35   :  { %25 = dma.hbm_to_vmem [thread:$0]  %s7890_s0, 512, %s20_s10, [#allocation5], %s6942_s3, %s6942_s3, %s6943_s30  }
  0x36   :  { %s6944_s8 = smov [#allocation9]   ;;  %s6945_s11 = smov [#allocation12]  }
  0x37   :  { %s43_s9 = sshll.u32 %s6944_s8, 4  ;;  %s67_s12 = sshll.u32 %s6945_s11, 4  ;;  %s44_s9 = int_to_ptr.vmem [resolvable:$true] %s43_s9  ;;  %s68_s12 = int_to_ptr.vmem [resolvable:$true] %s67_s12 }
  0x38   :  { %s6861_s15 = scalar_lea.hbm %s7892_s2, 3072 }
  0x39   :  { %p6862_p10 = scmp.ne.s32.totalorder %s7892_s2, %s6861_s15  ;;  %p6865_p11 = scmp.lt.u32.totalorder %s6861_s15, %s7892_s2 }
  0x3b   :  { %p6867_p12 = pnand %p6865_p11, %p6862_p10 }
  0x3d   :  { %6870 = shalt.err (!%p6867_p12)
}
  0x3e   :  { %s6871_s0 = scalar_lea.vmem %s44_s9, 3072  ;;  %p6876_p0 = scmp.lt.s32.totalorder %s44_s9, %s44_s9 }
  0x3f   :  { %p6872_p13 = scmp.ne.s32.totalorder %s44_s9, %s6871_s0  ;;  %p6877_p1 = scmp.lt.s32.totalorder %s6871_s0, %s6871_s0 }
  0x41   :  { %p6878_p2 = por %p6877_p1, %p6876_p0 }
  0x43   :  { %p6879_p3 = pnand %p6878_p2, %p6872_p13 }
  0x45   :  { %6882 = shalt.err (!%p6879_p3)
}
  0x46   :  { %49 = dma.hbm_to_vmem [thread:$0]  %s7892_s2, 3072, %s44_s9, [#allocation8], %s6940_s18, %s6940_s18, %s6941_s19  }
  0x47   :  { %s6883_s24 = scalar_lea.hbm %s7894_s4, 2048 }
  0x48   :  { %p6884_p4 = scmp.ne.s32.totalorder %s7894_s4, %s6883_s24  ;;  %p6887_p5 = scmp.lt.u32.totalorder %s6883_s24, %s7894_s4 }
  0x4a   :  { %p6889_p6 = pnand %p6887_p5, %p6884_p4 }
  0x4c   :  { %6892 = shalt.err (!%p6889_p6)
}
  0x4d   :  { %s6893_s29 = scalar_lea.vmem %s68_s12, 2048  ;;  %p6898_p8 = scmp.lt.s32.totalorder %s68_s12, %s68_s12 }
  0x4e   :  { %p6894_p7 = scmp.ne.s32.totalorder %s68_s12, %s6893_s29  ;;  %p6899_p9 = scmp.lt.s32.totalorder %s6893_s29, %s6893_s29 }
  0x50   :  { %p6900_p10 = por %p6899_p9, %p6898_p8 }
  0x52   :  { %p6901_p11 = pnand %p6900_p10, %p6894_p7 }
  0x54   :  { %6904 = shalt.err (!%p6901_p11)
}
  0x55   :  { %73 = dma.hbm_to_vmem [thread:$0]  %s7894_s4, 2048, %s68_s12, [#allocation11], %s6942_s3, %s6942_s3, %s6943_s30  }
  0x56   :  { %6927 = dma.done.wait [#allocation5], 512  }
  0x57   :  { %6928 = vsyncadd [#allocation5], 4294966784 }
  0x58   :  { %6929 = dma.done.wait [#allocation8], 9216  }
  0x59   :  { %6930 = vsyncadd [#allocation8], 4294958080 }
  0x5a   :  { %6931 = dma.done.wait [#allocation11], 5120  }
  0x5b   :  { %6932 = vsyncadd [#allocation11], 4294962176  ;;  %v7896_v0 = vmov 0   ;;  %v6258_v1 = vld [vmem:[#allocation7 + $0x4] ss:$24 sps:$4 sm:$0xff]   ;;  %v7075_v44 = vld [vmem:[#allocation4 + $0x8] sm:$0xff]  }
  0x5c   :  { %442 = vmatprep.mubr.bf16.mxu0 %v7896_v0  ;;  %515 = vmatprep.mubr.bf16.mxu1 %v7896_v0  ;;  %v6260_v2 = vld [vmem:[#allocation7 + $0xc] ss:$24 sps:$4 sm:$0xff]   ;;  %v6262_v3 = vld [vmem:[#allocation7] ss:$24 sps:$4 sm:$0xff]   ;;  %v6266_v6 = vld [vmem:[#allocation7 + $0x3c] ss:$24 sps:$4 sm:$0xff]  }
  0x5d   :  { %410 = vmatprep.subr.bf16.mxu0 %v6258_v1  ;;  %v6263_v4 = vld [vmem:[#allocation7 + $0x8] ss:$24 sps:$4 sm:$0xff]   ;;  %483 = vmatprep.subr.bf16.mxu1 %v6260_v2  ;;  %v6264_v5 = vld [vmem:[#allocation7 + $0x34] ss:$24 sps:$4 sm:$0xff]   ;;  %v6269_v8 = vld [vmem:[#allocation7 + $0x38] ss:$24 sps:$4 sm:$0xff]  }
  0x5e   :  { %411 = vmatpush1.bf16.msra.mxu0 %v6262_v3  ;;  %484 = vmatpush1.bf16.msra.mxu1 %v6263_v4  ;;  %v6268_v7 = vld [vmem:[#allocation7 + $0x30] ss:$24 sps:$4 sm:$0xff]   ;;  %v6270_v9 = vld [vmem:[#allocation7 + $0x64] ss:$24 sps:$4 sm:$0xff]   ;;  %v6274_v11 = vld [vmem:[#allocation7 + $0x60] ss:$24 sps:$4 sm:$0xff]  }
  0x5f   :  { %412 = vmatprep.subr.bf16.mxu0 %v6264_v5  ;;  %485 = vmatprep.subr.bf16.mxu1 %v6266_v6  ;;  %v6272_v10 = vld [vmem:[#allocation7 + $0x6c] ss:$24 sps:$4 sm:$0xff]   ;;  %v6275_v12 = vld [vmem:[#allocation7 + $0x68] ss:$24 sps:$4 sm:$0xff]   ;;  %v6278_v14 = vld [vmem:[#allocation7 + $0x9c] ss:$24 sps:$4 sm:$0xff]  }
  0x60   :  { %v6276_v13 = vld [vmem:[#allocation7 + $0x94] ss:$24 sps:$4 sm:$0xff]   ;;  %v6280_v15 = vld [vmem:[#allocation7 + $0x90] ss:$24 sps:$4 sm:$0xff]   ;;  %v6282_v17 = vld [vmem:[#allocation7 + $0xc4] ss:$24 sps:$4 sm:$0xff]  }
  0x61   :  { %v6281_v16 = vld [vmem:[#allocation7 + $0x98] ss:$24 sps:$4 sm:$0xff]   ;;  %v6284_v18 = vld [vmem:[#allocation7 + $0xcc] ss:$24 sps:$4 sm:$0xff]   ;;  %v6287_v20 = vld [vmem:[#allocation7 + $0xc8] ss:$24 sps:$4 sm:$0xff]  }
  0x62   :  { %413 = vmatpush1.bf16.msra.mxu0 %v6268_v7  ;;  %486 = vmatpush1.bf16.msra.mxu1 %v6269_v8  ;;  %v6286_v19 = vld [vmem:[#allocation7 + $0xc0] ss:$24 sps:$4 sm:$0xff]   ;;  %v6288_v21 = vld [vmem:[#allocation7 + $0xf4] ss:$24 sps:$4 sm:$0xff]   ;;  %v6292_v23 = vld [vmem:[#allocation7 + $0xf0] ss:$24 sps:$4 sm:$0xff]  }
  0x63   :  { %414 = vmatprep.subr.bf16.mxu0 %v6270_v9  ;;  %487 = vmatprep.subr.bf16.mxu1 %v6272_v10  ;;  %v6290_v22 = vld [vmem:[#allocation7 + $0xfc] ss:$24 sps:$4 sm:$0xff]   ;;  %v6293_v24 = vld [vmem:[#allocation7 + $0xf8] ss:$24 sps:$4 sm:$0xff]   ;;  %v6296_v26 = vld [vmem:[#allocation7 + $0x12c] ss:$24 sps:$4 sm:$0xff]  }
  0x64   :  { %v6294_v25 = vld [vmem:[#allocation7 + $0x124] ss:$24 sps:$4 sm:$0xff]   ;;  %v6298_v27 = vld [vmem:[#allocation7 + $0x120] ss:$24 sps:$4 sm:$0xff]   ;;  %v6300_v29 = vld [vmem:[#allocation7 + $0x154] ss:$24 sps:$4 sm:$0xff]  }
  0x65   :  { %v6299_v28 = vld [vmem:[#allocation7 + $0x128] ss:$24 sps:$4 sm:$0xff]   ;;  %v6302_v30 = vld [vmem:[#allocation7 + $0x15c] ss:$24 sps:$4 sm:$0xff]   ;;  %v6305_v32 = vld [vmem:[#allocation7 + $0x158] ss:$24 sps:$4 sm:$0xff]  }
  0x66   :  { %415 = vmatpush1.bf16.msra.mxu0 %v6274_v11  ;;  %488 = vmatpush1.bf16.msra.mxu1 %v6275_v12  ;;  %v6304_v31 = vld [vmem:[#allocation7 + $0x150] ss:$24 sps:$4 sm:$0xff]   ;;  %v6309_v33 = vld [vmem:[#allocation7 + $0x14] ss:$24 sps:$4 sm:$0xff]   ;;  %v7058_v35 = vld [vmem:[#allocation4] sm:$0xff]   ;;  %v7898_v9 = vmov 0.0  }
  0x67   :  { %416 = vmatprep.subr.bf16.mxu0 %v6276_v13  ;;  %489 = vmatprep.subr.bf16.mxu1 %v6278_v14  ;;  %v7056_v34 = vld [vmem:[#allocation9 + $0x4] ss:$12 sps:$4 sm:$0xff]   ;;  %v7060_v37 = vld [vmem:[#allocation9] ss:$12 sps:$4 sm:$0xff]   ;;  %v7063_v39 = vld [vmem:[#allocation9 + $0x1c] ss:$12 sps:$4 sm:$0xff]  }
  0x68   :  { %v6307_v36 = vld [vmem:[#allocation7 + $0x10] ss:$24 sps:$4 sm:$0xff]   ;;  %v6315_v38 = vld [vmem:[#allocation7 + $0x44] ss:$24 sps:$4 sm:$0xff]   ;;  %v6313_v40 = vld [vmem:[#allocation7 + $0x40] ss:$24 sps:$4 sm:$0xff]  }
  0x69   :  { %v7068_v41 = vld [vmem:[#allocation9 + $0x18] ss:$12 sps:$4 sm:$0xff]   ;;  %v6322_v42 = vld [vmem:[#allocation7 + $0x74] ss:$24 sps:$4 sm:$0xff]   ;;  %v6320_v45 = vld [vmem:[#allocation7 + $0x70] ss:$24 sps:$4 sm:$0xff]  }
  0x6a   :  { %417 = vmatpush1.bf16.msra.mxu0 %v6280_v15  ;;  %490 = vmatpush1.bf16.msra.mxu1 %v6281_v16  ;;  %v7071_v43 = vld [vmem:[#allocation9 + $0x34] ss:$12 sps:$4 sm:$0xff]   ;;  %v7077_v46 = vld [vmem:[#allocation9 + $0x30] ss:$12 sps:$4 sm:$0xff]   ;;  %v7081_v48 = vld [vmem:[#allocation9 + $0x4c] ss:$12 sps:$4 sm:$0xff]  }
  0x6b   :  { %418 = vmatprep.subr.bf16.mxu0 %v6282_v17  ;;  %491 = vmatprep.subr.bf16.mxu1 %v6284_v18  ;;  %v6328_v47 = vld [vmem:[#allocation7 + $0xa4] ss:$24 sps:$4 sm:$0xff]   ;;  %v6326_v49 = vld [vmem:[#allocation7 + $0xa0] ss:$24 sps:$4 sm:$0xff]   ;;  %v7085_v50 = vld [vmem:[#allocation9 + $0x48] ss:$12 sps:$4 sm:$0xff]  }
  0x6c   :  { %v6335_v51 = vld [vmem:[#allocation7 + $0xd4] ss:$24 sps:$4 sm:$0xff]   ;;  %v7089_v52 = vld [vmem:[#allocation9 + $0x64] ss:$12 sps:$4 sm:$0xff]   ;;  %v7099_v57 = vld [vmem:[#allocation9 + $0x7c] ss:$12 sps:$4 sm:$0xff]  }
  0x6d   :  { %v7093_v53 = vld [vmem:[#allocation4 + $0x10] sm:$0xff]   ;;  %v7095_v55 = vld [vmem:[#allocation9 + $0x60] ss:$12 sps:$4 sm:$0xff]   ;;  %v6341_v56 = vld [vmem:[#allocation7 + $0x104] ss:$24 sps:$4 sm:$0xff]   ;;  %vm6948_vm0 = vmmov 0  }
  0x6e   :  { %419 = vmatpush1.bf16.msra.mxu0 %v6286_v19  ;;  %492 = vmatpush1.bf16.msra.mxu1 %v6287_v20  ;;  %v6333_v54 = vld [vmem:[#allocation7 + $0xd0] ss:$24 sps:$4 sm:$0xff]   ;;  %v6339_v58 = vld [vmem:[#allocation7 + $0x100] ss:$24 sps:$4 sm:$0xff]   ;;  %v6348_v60 = vld [vmem:[#allocation7 + $0x134] ss:$24 sps:$4 sm:$0xff]  }
  0x6f   :  { %420 = vmatprep.subr.bf16.mxu0 %v6288_v21  ;;  %493 = vmatprep.subr.bf16.mxu1 %v6290_v22  ;;  %v7104_v59 = vld [vmem:[#allocation9 + $0x78] ss:$12 sps:$4 sm:$0xff]   ;;  %v7107_v61 = vld [vmem:[#allocation9 + $0x94] ss:$12 sps:$4 sm:$0xff]   ;;  %v6346_v63 = vld [vmem:[#allocation7 + $0x130] ss:$24 sps:$4 sm:$0xff]  }
  0x70   :  { %v7111_v62 = vld [vmem:[#allocation4 + $0x18] sm:$0xff]   ;;  %v7122_v5 = vld [vmem:[#allocation9 + $0xa8] ss:$12 sps:$4 sm:$0xff]   ;;  %v7125_v6 = vld [vmem:[#allocation10 + $0x4] ss:$12 sps:$4 sm:$0xff]   ;;  %s6949_s4 = smov [#allocation13]  }
  0x71   :  { %v7113_v1 = vld [vmem:[#allocation9 + $0x90] ss:$12 sps:$4 sm:$0xff]   ;;  %v7117_v3 = vld [vmem:[#allocation9 + $0xac] ss:$12 sps:$4 sm:$0xff]   ;;  %v6361_v8 = vld [vmem:[#allocation9 + $0x8] ss:$12 sps:$4 sm:$0xff]  }
  0x72   :  { %421 = vmatpush1.bf16.msra.mxu0 %v6292_v23  ;;  %494 = vmatpush1.bf16.msra.mxu1 %v6293_v24  ;;  %v6354_v2 = vld [vmem:[#allocation7 + $0x164] ss:$24 sps:$4 sm:$0xff]   ;;  %v6352_v4 = vld [vmem:[#allocation7 + $0x160] ss:$24 sps:$4 sm:$0xff]   ;;  %v6370_v17 = vld [vmem:[#allocation10 + $0x48] ss:$12 sps:$4 sm:$0xff]  }
  0x73   :  { %422 = vmatprep.subr.bf16.mxu0 %v6294_v25  ;;  %495 = vmatprep.subr.bf16.mxu1 %v6296_v26  ;;  %v6358_v7 = vld [vmem:[#allocation10] ss:$12 sps:$4 sm:$0xff]   ;;  %v6364_v10 = vld [vmem:[#allocation10 + $0x1c] ss:$12 sps:$4 sm:$0xff]   ;;  %v6362_v11 = vld [vmem:[#allocation10 + $0x18] ss:$12 sps:$4 sm:$0xff]  }
  0x74   :  { %v6365_v12 = vld [vmem:[#allocation9 + $0x20] ss:$12 sps:$4 sm:$0xff]   ;;  %v6366_v14 = vld [vmem:[#allocation10 + $0x30] ss:$12 sps:$4 sm:$0xff]   ;;  %v6369_v15 = vld [vmem:[#allocation9 + $0x38] ss:$12 sps:$4 sm:$0xff]  }
  0x75   :  { %v6368_v13 = vld [vmem:[#allocation10 + $0x34] ss:$12 sps:$4 sm:$0xff]   ;;  %v6372_v16 = vld [vmem:[#allocation10 + $0x4c] ss:$12 sps:$4 sm:$0xff]   ;;  %v6373_v18 = vld [vmem:[#allocation9 + $0x50] ss:$12 sps:$4 sm:$0xff]  }
  0x76   :  { %423 = vmatpush1.bf16.msra.mxu0 %v6298_v27  ;;  %496 = vmatpush1.bf16.msra.mxu1 %v6299_v28  ;;  %v6376_v19 = vld [vmem:[#allocation10 + $0x64] ss:$12 sps:$4 sm:$0xff]   ;;  %v6374_v20 = vld [vmem:[#allocation10 + $0x60] ss:$12 sps:$4 sm:$0xff]   ;;  %v6377_v21 = vld [vmem:[#allocation9 + $0x68] ss:$12 sps:$4 sm:$0xff]  }
  0x77   :  { %424 = vmatprep.subr.bf16.mxu0 %v6300_v29  ;;  %497 = vmatprep.subr.bf16.mxu1 %v6302_v30  ;;  %v6380_v22 = vld [vmem:[#allocation10 + $0x7c] ss:$12 sps:$4 sm:$0xff]   ;;  %v6378_v23 = vld [vmem:[#allocation10 + $0x78] ss:$12 sps:$4 sm:$0xff]   ;;  %v6381_v24 = vld [vmem:[#allocation9 + $0x80] ss:$12 sps:$4 sm:$0xff]  }
  0x78   :  { %v6384_v25 = vld [vmem:[#allocation10 + $0x94] ss:$12 sps:$4 sm:$0xff]   ;;  %v6382_v26 = vld [vmem:[#allocation10 + $0x90] ss:$12 sps:$4 sm:$0xff]   ;;  %v6385_v27 = vld [vmem:[#allocation9 + $0x98] ss:$12 sps:$4 sm:$0xff]  }
  0x79   :  { %v7145_v28 = vld [vmem:[#allocation10 + $0xac] ss:$12 sps:$4 sm:$0xff]   ;;  %v7148_v29 = vld [vmem:[#allocation10 + $0xa8] ss:$12 sps:$4 sm:$0xff]   ;;  %v6389_v30 = vld [vmem:[#allocation9 + $0xb0] ss:$12 sps:$4 sm:$0xff]  }
  0x7a   :  { %425 = vmatpush1.bf16.msra.mxu0 %v6304_v31  ;;  %498 = vmatpush1.bf16.msra.mxu1 %v6305_v32  ;;  %v6390_v31 = vld [vmem:[#allocation10 + $0x8] ss:$12 sps:$4 sm:$0xff]   ;;  %v6391_v32 = vld [vmem:[#allocation10 + $0x20] ss:$12 sps:$4 sm:$0xff]   ;;  %s5225_s19 = sshll.u32 %s6949_s4, 4  ;;  %s5226_s19 = int_to_ptr.vmem [resolvable:$true] %s5225_s19 }
  0x7b   :  { %556 = vmatprep.subr.bf16.mxu0 %v6309_v33  ;;  %849 = vmatprep.subr.bf16.mxu1 %v7056_v34  ;;  %v6392_v33 = vld [vmem:[#allocation10 + $0x38] ss:$12 sps:$4 sm:$0xff]   ;;  %s6905_s3 = scalar_lea.vmem %s5226_s19, 1024  ;;  %p6910_p13 = scmp.lt.s32.totalorder %s5226_s19, %s5226_s19 }
  0x7c   :  { %p6906_p12 = scmp.ne.s32.totalorder %s5226_s19, %s6905_s3  ;;  %p6911_p0 = scmp.lt.s32.totalorder %s6905_s3, %s6905_s3 }
  0x7d   :  { %443 = vmatmul.mubr.bf16.vlgmr.msra.gmra.mrb[0].mxu0 %v7058_v35  ;;  %516 = vmatmul.mubr.bf16.vlgmr.msra.gmra.mrb[0].mxu1 %v7058_v35 }
  0x7e   :  { %557 = vmatpush1.bf16.msra.mxu0 %v6307_v36  ;;  %850 = vmatpush1.bf16.msra.mxu1 %v7060_v37  ;;  %v6395_v36 = vld [vmem:[#allocation10 + $0x80] ss:$12 sps:$4 sm:$0xff]   ;;  %p6912_p1 = por %p6911_p0, %p6910_p13 }
  0x7f   :  { %558 = vmatprep.subr.bf16.mxu0 %v6315_v38  ;;  %851 = vmatprep.subr.bf16.mxu1 %v7063_v39  ;;  %v6397_v38 = vld [vmem:[#allocation10 + $0xb0] ss:$12 sps:$4 sm:$0xff]  }
  0x80   :  { %452 = vmatprep.mubr.bf16.mxu0 %v7896_v0  ;;  %525 = vmatprep.mubr.bf16.mxu1 %v7896_v0  ;;  %p6913_p2 = pnand %p6912_p1, %p6906_p12 }
  0x82   :  { %559 = vmatpush1.bf16.msra.mxu0 %v6313_v40  ;;  %852 = vmatpush1.bf16.msra.mxu1 %v7068_v41  ;;  %v6399_v40 = vld [vmem:[#allocation9 + $0x20] ss:$12 sps:$4 sm:$0xff]  }
  0x83   :  { %560 = vmatprep.subr.bf16.mxu0 %v6322_v42  ;;  %853 = vmatprep.subr.bf16.mxu1 %v7071_v43  ;;  %v6401_v42 = vld [vmem:[#allocation9 + $0x50] ss:$12 sps:$4 sm:$0xff]  }
  0x85   :  { %453 = vmatmul.mubr.bf16.gmra.mrb[4].mxu0 %v7075_v44  ;;  %526 = vmatmul.mubr.bf16.gmra.mrb[4].mxu1 %v7075_v44 }
  0x86   :  { %561 = vmatpush1.bf16.msra.mxu0 %v6320_v45  ;;  %854 = vmatpush1.bf16.msra.mxu1 %v7077_v46  ;;  %v6404_v45 = vld [vmem:[#allocation9 + $0x98] ss:$12 sps:$4 sm:$0xff]  }
  0x87   :  { %562 = vmatprep.subr.bf16.mxu0 %v6328_v47  ;;  %855 = vmatprep.subr.bf16.mxu1 %v7081_v48 }
  0x88   :  { %462 = vmatprep.mubr.bf16.mxu0 %v7896_v0  ;;  %535 = vmatprep.mubr.bf16.mxu1 %v7896_v0 }
  0x8a   :  { %563 = vmatpush1.bf16.msra.mxu0 %v6326_v49  ;;  %856 = vmatpush1.bf16.msra.mxu1 %v7085_v50 }
  0x8b   :  { %564 = vmatprep.subr.bf16.mxu0 %v6335_v51  ;;  %857 = vmatprep.subr.bf16.mxu1 %v7089_v52 }
  0x8d   :  { %463 = vmatmul.mubr.bf16.gmra.mrb[8].mxu0 %v7093_v53  ;;  %536 = vmatmul.mubr.bf16.gmra.mrb[8].mxu1 %v7093_v53 }
  0x8e   :  { %565 = vmatpush1.bf16.msra.mxu0 %v6333_v54  ;;  %858 = vmatpush1.bf16.msra.mxu1 %v7095_v55 }
  0x8f   :  { %566 = vmatprep.subr.bf16.mxu0 %v6341_v56  ;;  %859 = vmatprep.subr.bf16.mxu1 %v7099_v57 }
  0x90   :  { %472 = vmatprep.mubr.bf16.mxu0 %v7896_v0  ;;  %545 = vmatprep.mubr.bf16.mxu1 %v7896_v0 }
  0x92   :  { %567 = vmatpush1.bf16.msra.mxu0 %v6339_v58  ;;  %860 = vmatpush1.bf16.msra.mxu1 %v7104_v59 }
  0x93   :  { %568 = vmatprep.subr.bf16.mxu0 %v6348_v60  ;;  %861 = vmatprep.subr.bf16.mxu1 %v7107_v61 }
  0x95   :  { %473 = vmatmul.mubr.bf16.gmra.mrb[12].mxu0 %v7111_v62  ;;  %546 = vmatmul.mubr.bf16.gmra.mrb[12].mxu1 %v7111_v62 }
  0x96   :  { %569 = vmatpush1.bf16.msra.mxu0 %v6346_v63  ;;  %862 = vmatpush1.bf16.msra.mxu1 %v7113_v1 }
  0x97   :  { %570 = vmatprep.subr.bf16.mxu0 %v6354_v2  ;;  %863 = vmatprep.subr.bf16.mxu1 %v7117_v3 }
  0x98   :  { %588 = vmatprep.mubr.bf16.mxu0 %v7896_v0  ;;  %881 = vmatprep.mubr.bf16.mxu1 %v7896_v0 }
  0x9a   :  { %571 = vmatpush1.bf16.msra.mxu0 %v6352_v4  ;;  %864 = vmatpush1.bf16.msra.mxu1 %v7122_v5 }
  0x9b   :  { %5921 = vmatprep.subr.bf16.mxu0 %v7898_v9  ;;  %1090 = vmatprep.subr.bf16.mxu1 %v7125_v6 }
  0x9d   :  { %589 = vmatmul.mubr.bf16.vlgmr.msra.gmra.mrb[16].mxu0 %v7058_v35  ;;  %882 = vmatmul.mubr.bf16.vlgmr.msra.gmra.mrb[16].mxu1 %v7896_v0  ;;  %v6394_v35 = vld [vmem:[#allocation10 + $0x68] ss:$12 sps:$4 sm:$0xff]  }
  0x9e   :  { %5922 = vmatpush3.bf16.msra.mxu0 %v6361_v8  ;;  %1091 = vmatpush1.bf16.msra.mxu1 %v6358_v7 }
  0x9f   :  { %5923 = vmatprep.subr.bf16.mxu0 %v7898_v9  ;;  %1092 = vmatprep.subr.bf16.mxu1 %v6364_v10 }
  0xa0   :  { %598 = vmatprep.mubr.bf16.mxu0 %v7896_v0  ;;  %1122 = vmatprep.mubr.bf16.mxu1 %v7896_v0 }
  0xa2   :  { %5924 = vmatpush3.bf16.msra.mxu0 %v6365_v12  ;;  %1093 = vmatpush1.bf16.msra.mxu1 %v6362_v11 }
  0xa3   :  { %5925 = vmatprep.subr.bf16.mxu0 %v7898_v9  ;;  %1094 = vmatprep.subr.bf16.mxu1 %v6368_v13 }
  0xa5   :  { %599 = vmatmul.mubr.bf16.gmra.mrb[20].mxu0 %v7075_v44  ;;  %v6403_v44 = vld [vmem:[#allocation9 + $0x80] ss:$12 sps:$4 sm:$0xff]  }
  0xa6   :  { %5926 = vmatpush3.bf16.msra.mxu0 %v6369_v15  ;;  %1095 = vmatpush1.bf16.msra.mxu1 %v6366_v14 }
  0xa7   :  { %5927 = vmatprep.subr.bf16.mxu0 %v7898_v9  ;;  %1096 = vmatprep.subr.bf16.mxu1 %v6372_v16 }
  0xa8   :  { %608 = vmatprep.mubr.bf16.mxu0 %v7896_v0 }
  0xaa   :  { %5928 = vmatpush3.bf16.msra.mxu0 %v6373_v18  ;;  %1097 = vmatpush1.bf16.msra.mxu1 %v6370_v17 }
  0xab   :  { %5929 = vmatprep.subr.bf16.mxu0 %v7898_v9  ;;  %1098 = vmatprep.subr.bf16.mxu1 %v6376_v19 }
  0xad   :  { %609 = vmatmul.mubr.bf16.gmra.mrb[24].mxu0 %v7093_v53 }
  0xae   :  { %5930 = vmatpush3.bf16.msra.mxu0 %v6377_v21  ;;  %1099 = vmatpush1.bf16.msra.mxu1 %v6374_v20 }
  0xaf   :  { %5931 = vmatprep.subr.bf16.mxu0 %v7898_v9  ;;  %1100 = vmatprep.subr.bf16.mxu1 %v6380_v22 }
  0xb0   :  { %618 = vmatprep.mubr.bf16.mxu0 %v7896_v0 }
  0xb2   :  { %5932 = vmatpush3.bf16.msra.mxu0 %v6381_v24  ;;  %1101 = vmatpush1.bf16.msra.mxu1 %v6378_v23 }
  0xb3   :  { %5933 = vmatprep.subr.bf16.mxu0 %v7898_v9  ;;  %1102 = vmatprep.subr.bf16.mxu1 %v6384_v25 }
  0xb5   :  { %619 = vmatmul.mubr.bf16.gmra.mrb[28].mxu0 %v7111_v62 }
  0xb6   :  { %5934 = vmatpush3.bf16.msra.mxu0 %v6385_v27  ;;  %1103 = vmatpush1.bf16.msra.mxu1 %v6382_v26 }
  0xb7   :  { %5935 = vmatprep.subr.bf16.mxu0 %v7898_v9  ;;  %1104 = vmatprep.subr.bf16.mxu1 %v7145_v28 }
  0xb8   :  { %5937 = vmatprep.mubr.msk.bf16.mxu0 %vm6948_vm0, %v7898_v9 }
  0xba   :  { %5936 = vmatpush3.bf16.msra.mxu0 %v6389_v30  ;;  %1105 = vmatpush1.bf16.msra.mxu1 %v7148_v29 }
  0xbb   :  { %5941 = vmatprep.subr.bf16.mxu0 %v7898_v9  ;;  %1394 = vmatprep.subr.bf16.mxu1 %v7056_v34  ;;  %v6393_v34 = vld [vmem:[#allocation10 + $0x50] ss:$12 sps:$4 sm:$0xff]  }
  0xbd   :  { %5938 = vmatmul.mubr.bf16.vlgmr.msra.gmra.mrb[32].mxu0 %v7896_v0  ;;  %1123 = vmatmul.mubr.bf16.vlgmr.msra.gmra.mrb[20].mxu1 %v7896_v0 }
  0xbe   :  { %5942 = vmatpush3.bf16.msra.mxu0 %v6390_v31  ;;  %5957 = vmatprep.mubr.msk.bf16.mxu0 %vm6948_vm0, %v7898_v9 }
  0xbf   :  { %5943 = vmatprep.subr.bf16.mxu0 %v7898_v9  ;;  %1395 = vmatpush1.bf16.msra.mxu1 %v7060_v37  ;;  %v6396_v37 = vld [vmem:[#allocation10 + $0x98] ss:$12 sps:$4 sm:$0xff]  }
  0xc0   :  { %1396 = vmatprep.subr.bf16.mxu1 %v7063_v39  ;;  %1426 = vmatprep.mubr.bf16.mxu1 %v7896_v0  ;;  %v6398_v39 = vld [vmem:[#allocation9 + $0x8] ss:$12 sps:$4 sm:$0xff]  }
  0xc2   :  { %5944 = vmatpush3.bf16.msra.mxu0 %v6391_v32 }
  0xc3   :  { %5945 = vmatprep.subr.bf16.mxu0 %v7898_v9  ;;  %1397 = vmatpush1.bf16.msra.mxu1 %v7068_v41  ;;  %v6400_v41 = vld [vmem:[#allocation9 + $0x38] ss:$12 sps:$4 sm:$0xff]  }
  0xc4   :  { %1398 = vmatprep.subr.bf16.mxu1 %v7071_v43  ;;  %v6402_v43 = vld [vmem:[#allocation9 + $0x68] ss:$12 sps:$4 sm:$0xff]  }
  0xc6   :  { %5946 = vmatpush3.bf16.msra.mxu0 %v6392_v33 }
  0xc7   :  { %5947 = vmatprep.subr.bf16.mxu0 %v7898_v9  ;;  %1399 = vmatpush1.bf16.msra.mxu1 %v7077_v46  ;;  %v6405_v46 = vld [vmem:[#allocation9 + $0xb0] ss:$12 sps:$4 sm:$0xff]  }
  0xc8   :  { %1400 = vmatprep.subr.bf16.mxu1 %v7081_v48 }
  0xca   :  { %5948 = vmatpush3.bf16.msra.mxu0 %v6393_v34 }
  0xcb   :  { %5949 = vmatprep.subr.bf16.mxu0 %v7898_v9  ;;  %1401 = vmatpush1.bf16.msra.mxu1 %v7085_v50 }
  0xcc   :  { %1402 = vmatprep.subr.bf16.mxu1 %v7089_v52 }
  0xce   :  { %5950 = vmatpush3.bf16.msra.mxu0 %v6394_v35 }
  0xcf   :  { %5951 = vmatprep.subr.bf16.mxu0 %v7898_v9  ;;  %1403 = vmatpush1.bf16.msra.mxu1 %v7095_v55 }
  0xd0   :  { %1404 = vmatprep.subr.bf16.mxu1 %v7099_v57 }
  0xd2   :  { %5952 = vmatpush3.bf16.msra.mxu0 %v6395_v36 }
  0xd3   :  { %5953 = vmatprep.subr.bf16.mxu0 %v7898_v9  ;;  %1405 = vmatpush1.bf16.msra.mxu1 %v7104_v59 }
  0xd4   :  { %1406 = vmatprep.subr.bf16.mxu1 %v7107_v61 }
  0xd6   :  { %5954 = vmatpush3.bf16.msra.mxu0 %v6396_v37 }
  0xd7   :  { %5955 = vmatprep.subr.bf16.mxu0 %v7898_v9  ;;  %1407 = vmatpush1.bf16.msra.mxu1 %v7113_v1 }
  0xd8   :  { %1408 = vmatprep.subr.bf16.mxu1 %v7117_v3 }
  0xda   :  { %5956 = vmatpush3.bf16.msra.mxu0 %v6397_v38 }
  0xdb   :  { %5961 = vmatprep.subr.bf16.mxu0 %v7898_v9  ;;  %1409 = vmatpush1.bf16.msra.mxu1 %v7122_v5 }
  0xdc   :  { %1636 = vmatprep.subr.bf16.mxu1 %v7125_v6 }
  0xdd   :  { %5958 = vmatmul.mubr.bf16.vlgmr.msra.gmra.mrb[36].mxu0 %v7896_v0 }
  0xde   :  { %5977 = vmatprep.mubr.msk.bf16.mxu0 %vm6948_vm0, %v7898_v9  ;;  %5962 = vmatpush3.bf16.msra.mxu0 %v6398_v39 }
  0xdf   :  { %5963 = vmatprep.subr.bf16.mxu0 %v7898_v9 }
  0xe2   :  { %5964 = vmatpush3.bf16.msra.mxu0 %v6399_v40 }
  0xe3   :  { %5965 = vmatprep.subr.bf16.mxu0 %v7898_v9 }
  0xe6   :  { %5966 = vmatpush3.bf16.msra.mxu0 %v6400_v41 }
  0xe7   :  { %5967 = vmatprep.subr.bf16.mxu0 %v7898_v9 }
  0xea   :  { %5968 = vmatpush3.bf16.msra.mxu0 %v6401_v42 }
  0xeb   :  { %5969 = vmatprep.subr.bf16.mxu0 %v7898_v9 }
  0xee   :  { %5970 = vmatpush3.bf16.msra.mxu0 %v6402_v43 }
  0xef   :  { %5971 = vmatprep.subr.bf16.mxu0 %v7898_v9 }
  0xf2   :  { %5972 = vmatpush3.bf16.msra.mxu0 %v6403_v44 }
  0xf3   :  { %5973 = vmatprep.subr.bf16.mxu0 %v7898_v9 }
  0xf6   :  { %5974 = vmatpush3.bf16.msra.mxu0 %v6404_v45 }
  0xf7   :  { %5975 = vmatprep.subr.bf16.mxu0 %v7898_v9 }
  0xfa   :  { %5976 = vmatpush3.bf16.msra.mxu0 %v6405_v46 }
  0xfb   :  { %5981 = vmatprep.subr.bf16.mxu0 %v7898_v9 }
 0x150   :  { %v444_v47 = vpop.f32.mrb[0].mxu0  ;;  %v7198_v48 = vpop.f32.mrb[0].mxu1 }
 0x151   :  { %v446_v49 = vpop.f32.mrb[1].mxu0  ;;  %v7200_v50 = vpop.f32.mrb[1].mxu1 }
 0x152   :  { %7902 = vst [vmem:[#allocation18_spill] sm:$0xff] %v7200_v50  ;;  %v7202_v51 = vpop.f32.mrb[2].mxu0  ;;  %v7204_v52 = vpop.f32.mrb[2].mxu1 }
 0x153   :  { %v7206_v53 = vpop.f32.mrb[3].mxu0  ;;  %v7208_v54 = vpop.f32.mrb[3].mxu1 }
 0x154   :  { %7903 = vst [vmem:[#allocation19_spill] sm:$0xff] %v7208_v54 }
 0x158   :  { %v7210_v55 = vpop.f32.mrb[4].mxu0  ;;  %v7212_v56 = vpop.f32.mrb[4].mxu1 }
 0x159   :  { %v7214_v57 = vpop.f32.mrb[5].mxu0  ;;  %v7216_v58 = vpop.f32.mrb[5].mxu1 }
 0x15a   :  { %7904 = vst [vmem:[#allocation20_spill] sm:$0xff] %v7216_v58  ;;  %v7218_v59 = vpop.f32.mrb[6].mxu0  ;;  %v7220_v60 = vpop.f32.mrb[6].mxu1 }
 0x15b   :  { %v7222_v61 = vpop.f32.mrb[7].mxu0  ;;  %v7224_v62 = vpop.f32.mrb[7].mxu1 }
 0x15c   :  { %7905 = vst [vmem:[#allocation21_spill] sm:$0xff] %v7224_v62 }
 0x160   :  { %v7226_v63 = vpop.f32.mrb[8].mxu0  ;;  %v7228_v1 = vpop.f32.mrb[8].mxu1 }
 0x161   :  { %7906 = vst [vmem:[#allocation22_spill] sm:$0xff] %v7226_v63  ;;  %7907 = vst [vmem:[#allocation23_spill] sm:$0xff] %v7228_v1  ;;  %v7230_v2 = vpop.f32.mrb[9].mxu0  ;;  %v7232_v3 = vpop.f32.mrb[9].mxu1 }
 0x162   :  { %7908 = vst [vmem:[#allocation24_spill] sm:$0xff] %v7230_v2  ;;  %v7234_v4 = vpop.f32.mrb[10].mxu0  ;;  %v7236_v5 = vpop.f32.mrb[10].mxu1 }
 0x163   :  { %7909 = vst [vmem:[#allocation25_spill] sm:$0xff] %v7234_v4  ;;  %7910 = vst [vmem:[#allocation26_spill] sm:$0xff] %v7236_v5  ;;  %v7238_v6 = vpop.f32.mrb[11].mxu0  ;;  %v7240_v7 = vpop.f32.mrb[11].mxu1 }
 0x164   :  { %7911 = vst [vmem:[#allocation27_spill] sm:$0xff] %v7238_v6 }
 0x168   :  { %v7242_v8 = vpop.f32.mrb[12].mxu0  ;;  %v7244_v10 = vpop.f32.mrb[12].mxu1 }
 0x169   :  { %7912 = vst [vmem:[#allocation28_spill] sm:$0xff] %v7242_v8  ;;  %7913 = vst [vmem:[#allocation29_spill] sm:$0xff] %v7244_v10  ;;  %v7246_v11 = vpop.f32.mrb[13].mxu0  ;;  %v7248_v12 = vpop.f32.mrb[13].mxu1 }
 0x16a   :  { %7914 = vst [vmem:[#allocation30_spill] sm:$0xff] %v7246_v11  ;;  %v7250_v13 = vpop.f32.mrb[14].mxu0  ;;  %v7252_v14 = vpop.f32.mrb[14].mxu1 }
 0x16b   :  { %7915 = vst [vmem:[#allocation31_spill] sm:$0xff] %v7250_v13  ;;  %7916 = vst [vmem:[#allocation32_spill] sm:$0xff] %v7252_v14  ;;  %v7254_v15 = vpop.f32.mrb[15].mxu0  ;;  %v553_v16 = vpop.f32.mrb[15].mxu1 }
 0x16c   :  { %7917 = vst [vmem:[#allocation33_spill] sm:$0xff] %v7254_v15 }
 0x170   :  { %v7256_v17 = vpop.f32.mrb[16].mxu0  ;;  %v883_v18 = vpop.f32.mrb[16].mxu1 }
 0x171   :  { %7918 = vst [vmem:[#allocation34_spill] sm:$0xff] %v7256_v17  ;;  %v1171_v19 = vadd.f32 %v883_v18, %v444_v47  ;;  %v7258_v20 = vpop.f32.mrb[17].mxu0  ;;  %v885_v21 = vpop.f32.mrb[17].mxu1 }
 0x172   :  { %7919 = vst [vmem:[#allocation35_spill] sm:$0xff] %v7258_v20  ;;  %v1178_v22 = vadd.f32 %v885_v21, %v446_v49  ;;  %v7260_v23 = vpop.f32.mrb[18].mxu0  ;;  %v887_v24 = vpop.f32.mrb[18].mxu1 }
 0x173   :  { %7920 = vst [vmem:[#allocation36_spill] sm:$0xff] %v7260_v23  ;;  %v5353_v25 = vmul.f32 -1.442695, %v1171_v19  ;;  %v7262_v26 = vpop.f32.mrb[19].mxu0  ;;  %v888_v27 = vpop.f32.mrb[19].mxu1 }
 0x174   :  { %7921 = vst [vmem:[#allocation37_spill] sm:$0xff] %v7262_v26  ;;  %v5354_v34 = vmul.f32 -1.442695, %v1178_v22 }
 0x175   :  { %6622 = vpow2.f32 %v5353_v25 }
 0x176   :  { %6624 = vpow2.f32 %v5354_v34 }
 0x178   :  { %v7264_v30 = vpop.f32.mrb[20].mxu0 }
 0x179   :  { %7922 = vst [vmem:[#allocation38_spill] sm:$0xff] %v7264_v30  ;;  %v7266_v31 = vpop.f32.mrb[21].mxu0 }
 0x17a   :  { %7923 = vst [vmem:[#allocation39_spill] sm:$0xff] %v7266_v31  ;;  %v7268_v32 = vpop.f32.mrb[22].mxu0 }
 0x17b   :  { %7924 = vst [vmem:[#allocation40_spill] sm:$0xff] %v7268_v32  ;;  %v7270_v33 = vpop.f32.mrb[23].mxu0 }
 0x17c   :  { %7925 = vst [vmem:[#allocation41_spill] sm:$0xff] %v7270_v33 }
 0x17f   :  { %v6623_v35 = vpop.eup %6622 }
 0x180   :  { %v7272_v36 = vpop.f32.mrb[24].mxu0  ;;  %v1175_v38 = vadd.f32 1.0, %v6623_v35  ;;  %v6625_v43 = vpop.eup %6624 }
 0x181   :  { %7926 = vst [vmem:[#allocation42_spill] sm:$0xff] %v7272_v36  ;;  %v7274_v37 = vpop.f32.mrb[25].mxu0  ;;  %v1182_v46 = vadd.f32 1.0, %v6625_v43 }
 0x182   :  { %7927 = vst [vmem:[#allocation43_spill] sm:$0xff] %v7274_v37  ;;  %v7276_v39 = vpop.f32.mrb[26].mxu0  ;;  %6626 = vrcp.f32 %v1175_v38 }
 0x183   :  { %v7278_v40 = vpop.f32.mrb[27].mxu0  ;;  %6628 = vrcp.f32 %v1182_v46 }
 0x188   :  { %v7280_v41 = vpop.f32.mrb[28].mxu0 }
 0x189   :  { %v7282_v42 = vpop.f32.mrb[29].mxu0 }
 0x18a   :  { %v624_v44 = vpop.f32.mrb[30].mxu0 }
 0x18b   :  { %v7284_v45 = vpop.f32.mrb[31].mxu0 }
 0x18c   :  { %v6627_v47 = vpop.eup %6626 }
 0x18d   :  { %v6629_v20 = vpop.eup %6628 }
 0x18e   :  { %v1188_v17 = vsub.f32 1.0, %v6629_v20 }
 0x190   :  { %v924_v49 = vpop.f32.mrb[32].mxu0  ;;  %v1124_v18 = vpop.f32.mrb[20].mxu1 }
 0x191   :  { %v1185_v19 = vmul.f32 %v6627_v47, %v924_v49  ;;  %v1192_v21 = vadd.f32 %v1124_v18, %v553_v16  ;;  %v5939_v22 = vpop.f32.mrb[33].mxu0  ;;  %v1126_v24 = vpop.f32.mrb[21].mxu1  ;;  %v1190_v16 = vmul.f32 0.0, %v6629_v20  ;;  %v6783_v18 = vld [vmem:[#allocation10 + $0x1c] ss:$12 sps:$4 sm:$0xff]  }
 0x192   :  { %v1199_v25 = vadd.f32 %v1126_v24, %v624_v44  ;;  %v927_v27 = vpop.f32.mrb[34].mxu0  ;;  %v1128_v34 = vpop.f32.mrb[22].mxu1  ;;  %v6406_v44 = vld [vmem:[#allocation10 + $0x8] ss:$12 sps:$4 sm:$0xff]   ;;  %v6408_v20 = vld [vmem:[#allocation10 + $0x38] ss:$12 sps:$4 sm:$0xff]  }
 0x193   :  { %v1186_v35 = vadd.f32 %v1185_v19, %v7198_v48  ;;  %v5355_v38 = vmul.f32 -1.442695, %v1192_v21  ;;  %v5940_v0 = vpop.f32.mrb[35].mxu0  ;;  %v1129_v9 = vpop.f32.mrb[23].mxu1  ;;  %v7929_v19 = vmov 0.0  }
 0x194   :  { %v5356_v43 = vmul.f32 -1.442695, %v1199_v25  ;;  %v6782_v0 = vld [vmem:[#allocation10] ss:$12 sps:$4 sm:$0xff]   ;;  %v6786_v24 = vld [vmem:[#allocation10 + $0x30] ss:$12 sps:$4 sm:$0xff]  }
 0x195   :  { %6630 = vtanh.f32 %v1186_v35  ;;  %v6407_v9 = vld [vmem:[#allocation10 + $0x20] ss:$12 sps:$4 sm:$0xff]   ;;  %v6409_v25 = vld [vmem:[#allocation10 + $0x50] ss:$12 sps:$4 sm:$0xff]  }
 0x196   :  { %6632 = vpow2.f32 %v5355_v38  ;;  %v6785_v21 = vld [vmem:[#allocation10 + $0x34] ss:$12 sps:$4 sm:$0xff]   ;;  %v6787_v35 = vld [vmem:[#allocation10 + $0x4c] ss:$12 sps:$4 sm:$0xff]  }
 0x197   :  { %6634 = vpow2.f32 %v5356_v43 }
 0x19f   :  { %v6631_v50 = vpop.eup %6630 }
 0x1a0   :  { %v6633_v14 = vpop.eup %6632  ;;  %v1189_v46 = vmul.f32 %v6631_v50, %v1188_v17  ;;  %v7930_v50 = vmov 0   ;;  %v6784_v17 = vld [vmem:[#allocation10 + $0x18] ss:$12 sps:$4 sm:$0xff]  }
 0x1a1   :  { %v1196_v47 = vadd.f32 1.0, %v6633_v14  ;;  %v6635_v14 = vpop.eup %6634 }
 0x1a2   :  { %v7287_v49 = vadd.f32 %v1190_v16, %v1189_v46  ;;  %v1203_v22 = vadd.f32 1.0, %v6635_v14  ;;  %v6791_v14 = vld [vmem:[#allocation10 + $0x7c] ss:$12 sps:$4 sm:$0xff]  }
 0x1a3   :  { %6636 = vrcp.f32 %v1196_v47 }
 0x1a4   :  { %7928 = vst [vmem:[#allocation44_spill] sm:$0xff] %v7287_v49  ;;  %v1233_v48 = vpack.c.bf16 %v7287_v49, %v7287_v49  ;;  %6638 = vrcp.f32 %v1203_v22 }
 0x1a6   :  { %1427 = vmatmul.mubr.bf16.vlgmr.msra.gmra.mrb[24].mxu1 %v1233_v48  ;;  %5978 = vmatmul.mubr.bf16.vlgmr.msra.gmra.mrb[40].mxu0 %v1233_v48  ;;  %v6410_v48 = vld [vmem:[#allocation10 + $0x68] ss:$12 sps:$4 sm:$0xff]  }
 0x1a7   :  { %1637 = vmatpush1.bf16.msra.mxu1 %v6782_v0  ;;  %5982 = vmatpush3.bf16.msra.mxu0 %v6406_v44  ;;  %v6788_v44 = vld [vmem:[#allocation10 + $0x48] ss:$12 sps:$4 sm:$0xff]   ;;  %v6789_v0 = vld [vmem:[#allocation10 + $0x64] ss:$12 sps:$4 sm:$0xff]  }
 0x1a8   :  { %1638 = vmatprep.subr.bf16.mxu1 %v6783_v18  ;;  %5983 = vmatprep.subr.bf16.mxu0 %v7929_v19  ;;  %v6411_v18 = vld [vmem:[#allocation10 + $0x80] ss:$12 sps:$4 sm:$0xff]  }
 0x1a9   :  { %1668 = vmatprep.mubr.bf16.mxu1 %v7930_v50  ;;  %5997 = vmatprep.mubr.msk.bf16.mxu0 %vm6948_vm0, %v7929_v19 }
 0x1ab   :  { %1639 = vmatpush1.bf16.msra.mxu1 %v6784_v17  ;;  %5984 = vmatpush3.bf16.msra.mxu0 %v6407_v9  ;;  %v6790_v9 = vld [vmem:[#allocation10 + $0x60] ss:$12 sps:$4 sm:$0xff]  }
 0x1ac   :  { %1640 = vmatprep.subr.bf16.mxu1 %v6785_v21  ;;  %5985 = vmatprep.subr.bf16.mxu0 %v7929_v19  ;;  %v6793_v21 = vld [vmem:[#allocation10 + $0x94] ss:$12 sps:$4 sm:$0xff]  }
 0x1ad   :  { %v6637_v27 = vpop.eup %6636 }
 0x1ae   :  { %v6639_v17 = vpop.eup %6638 }
 0x1af   :  { %1641 = vmatpush1.bf16.msra.mxu1 %v6786_v24  ;;  %5986 = vmatpush3.bf16.msra.mxu0 %v6408_v20  ;;  %v6412_v20 = vld [vmem:[#allocation10 + $0x98] ss:$12 sps:$4 sm:$0xff]   ;;  %v1209_v22 = vsub.f32 1.0, %v6639_v17 }
 0x1b0   :  { %v1165_v34 = vpop.f32.mrb[36].mxu0  ;;  %1642 = vmatprep.subr.bf16.mxu1 %v6787_v35  ;;  %5987 = vmatprep.subr.bf16.mxu0 %v7929_v19  ;;  %v1211_v35 = vmul.f32 0.0, %v6639_v17  ;;  %v6429_v17 = vld [vmem:[#allocation9 + $0x50] ss:$12 sps:$4 sm:$0xff]  }
 0x1b1   :  { %v1206_v38 = vmul.f32 %v6637_v27, %v1165_v34  ;;  %v5959_v43 = vpop.f32.mrb[37].mxu0  ;;  %v6413_v27 = vld [vmem:[#allocation10 + $0xb0] ss:$12 sps:$4 sm:$0xff]  }
 0x1b2   :  { %v1168_v46 = vpop.f32.mrb[38].mxu0 }
 0x1b3   :  { %v1207_v16 = vadd.f32 %v1206_v38, %v7284_v45  ;;  %v5960_v47 = vpop.f32.mrb[39].mxu0  ;;  %1643 = vmatpush1.bf16.msra.mxu1 %v6788_v44  ;;  %5988 = vmatpush3.bf16.msra.mxu0 %v6409_v25  ;;  %v6792_v45 = vld [vmem:[#allocation10 + $0x78] ss:$12 sps:$4 sm:$0xff]   ;;  %v6794_v25 = vld [vmem:[#allocation10 + $0x90] ss:$12 sps:$4 sm:$0xff]  }
 0x1b4   :  { %1644 = vmatprep.subr.bf16.mxu1 %v6789_v0  ;;  %5989 = vmatprep.subr.bf16.mxu0 %v7929_v19  ;;  %v7314_v46 = vld [vmem:[#allocation9] ss:$12 sps:$4 sm:$0xff]   ;;  %v7321_v47 = vld [vmem:[#allocation9 + $0x18] ss:$12 sps:$4 sm:$0xff]   ;;  %v7328_v0 = vld [vmem:[#allocation9 + $0x30] ss:$12 sps:$4 sm:$0xff]  }
 0x1b5   :  { %6640 = vtanh.f32 %v1207_v16  ;;  %v6417_v16 = vld [vmem:[#allocation9 + $0x8] ss:$12 sps:$4 sm:$0xff]   ;;  %v6421_v44 = vld [vmem:[#allocation9 + $0x20] ss:$12 sps:$4 sm:$0xff]  }
 0x1b7   :  { %1645 = vmatpush1.bf16.msra.mxu1 %v6790_v9  ;;  %5990 = vmatpush3.bf16.msra.mxu0 %v6410_v48  ;;  %v7325_v48 = vld [vmem:[#allocation9 + $0x34] ss:$12 sps:$4 sm:$0xff]   ;;  %v6425_v9 = vld [vmem:[#allocation9 + $0x38] ss:$12 sps:$4 sm:$0xff]  }
 0x1b8   :  { %1646 = vmatprep.subr.bf16.mxu1 %v6791_v14  ;;  %5991 = vmatprep.subr.bf16.mxu0 %v7929_v19  ;;  %v7335_v14 = vld [vmem:[#allocation9 + $0x48] ss:$12 sps:$4 sm:$0xff]  }
 0x1bb   :  { %1647 = vmatpush1.bf16.msra.mxu1 %v6792_v45  ;;  %5992 = vmatpush3.bf16.msra.mxu0 %v6411_v18  ;;  %v7332_v18 = vld [vmem:[#allocation9 + $0x4c] ss:$12 sps:$4 sm:$0xff]   ;;  %v7339_v45 = vld [vmem:[#allocation9 + $0x64] ss:$12 sps:$4 sm:$0xff]  }
 0x1bc   :  { %1648 = vmatprep.subr.bf16.mxu1 %v6793_v21  ;;  %5993 = vmatprep.subr.bf16.mxu0 %v7929_v19  ;;  %v6433_v21 = vld [vmem:[#allocation9 + $0x68] ss:$12 sps:$4 sm:$0xff]  }
 0x1bf   :  { %v6641_v24 = vpop.eup %6640  ;;  %1649 = vmatpush1.bf16.msra.mxu1 %v6794_v25  ;;  %5994 = vmatpush3.bf16.msra.mxu0 %v6412_v20  ;;  %v7342_v20 = vld [vmem:[#allocation9 + $0x60] ss:$12 sps:$4 sm:$0xff]  }
 0x1c0   :  { %1650 = vmatprep.subr.bf16.mxu1 %v7145_v28  ;;  %5995 = vmatprep.subr.bf16.mxu0 %v7929_v19  ;;  %v1210_v34 = vmul.f32 %v6641_v24, %v1209_v22  ;;  %v7312_v28 = vld [vmem:[#allocation9 + $0x4] ss:$12 sps:$4 sm:$0xff]   ;;  %v7346_v22 = vld [vmem:[#allocation9 + $0x7c] ss:$12 sps:$4 sm:$0xff]   ;;  %v6437_v25 = vld [vmem:[#allocation9 + $0x80] ss:$12 sps:$4 sm:$0xff]  }
 0x1c1   :  { %v7349_v24 = vld [vmem:[#allocation9 + $0x78] ss:$12 sps:$4 sm:$0xff]  }
 0x1c2   :  { %v7303_v38 = vadd.f32 %v1211_v35, %v1210_v34  ;;  %v7356_v34 = vld [vmem:[#allocation9 + $0x90] ss:$12 sps:$4 sm:$0xff]   ;;  %v6441_v35 = vld [vmem:[#allocation9 + $0x98] ss:$12 sps:$4 sm:$0xff]  }
 0x1c3   :  { %1651 = vmatpush1.bf16.msra.mxu1 %v7148_v29  ;;  %5996 = vmatpush3.bf16.msra.mxu0 %v6413_v27  ;;  %v7318_v29 = vld [vmem:[#allocation9 + $0x1c] ss:$12 sps:$4 sm:$0xff]   ;;  %v7353_v27 = vld [vmem:[#allocation9 + $0x94] ss:$12 sps:$4 sm:$0xff]  }
 0x1c4   :  { %7931 = vst [vmem:[#allocation45_spill] sm:$0xff] %v7303_v38  ;;  %v1475_v43 = vpack.c.bf16 %v7303_v38, %v7303_v38  ;;  %6001 = vmatprep.subr.bf16.mxu0 %v7929_v19  ;;  %1940 = vmatprep.subr.bf16.mxu1 %v7312_v28 }
 0x1c6   :  { %1669 = vmatmul.mubr.bf16.vlgmr.msra.gmra.mrb[28].mxu1 %v1475_v43  ;;  %5998 = vmatmul.mubr.bf16.vlgmr.msra.gmra.mrb[44].mxu0 %v1475_v43  ;;  %v7360_v43 = vld [vmem:[#allocation9 + $0xac] ss:$12 sps:$4 sm:$0xff]  }
 0x1c7   :  { %1972 = vmatprep.mubr.bf16.mxu1 %v7930_v50  ;;  %6017 = vmatprep.mubr.msk.bf16.mxu0 %vm6948_vm0, %v7929_v19 }
 0x1c8   :  { %1941 = vmatpush1.bf16.msra.mxu1 %v7314_v46  ;;  %6002 = vmatpush3.bf16.msra.mxu0 %v6417_v16  ;;  %v7363_v16 = vld [vmem:[#allocation9 + $0xa8] ss:$12 sps:$4 sm:$0xff]  }
 0x1c9   :  { %6003 = vmatprep.subr.bf16.mxu0 %v7929_v19  ;;  %1942 = vmatprep.subr.bf16.mxu1 %v7318_v29 }
 0x1cc   :  { %1943 = vmatpush1.bf16.msra.mxu1 %v7321_v47  ;;  %6004 = vmatpush3.bf16.msra.mxu0 %v6421_v44  ;;  %v6445_v44 = vld [vmem:[#allocation9 + $0xb0] ss:$12 sps:$4 sm:$0xff]  }
 0x1cd   :  { %6005 = vmatprep.subr.bf16.mxu0 %v7929_v19  ;;  %1944 = vmatprep.subr.bf16.mxu1 %v7325_v48 }
 0x1d0   :  { %1945 = vmatpush1.bf16.msra.mxu1 %v7328_v0  ;;  %6006 = vmatpush3.bf16.msra.mxu0 %v6425_v9  ;;  %v7367_v9 = vld [vmem:[#allocation10 + $0x4] ss:$12 sps:$4 sm:$0xff]  }
 0x1d1   :  { %6007 = vmatprep.subr.bf16.mxu0 %v7929_v19  ;;  %1946 = vmatprep.subr.bf16.mxu1 %v7332_v18 }
 0x1d4   :  { %1947 = vmatpush1.bf16.msra.mxu1 %v7335_v14  ;;  %6008 = vmatpush3.bf16.msra.mxu0 %v6429_v17 }
 0x1d5   :  { %6009 = vmatprep.subr.bf16.mxu0 %v7929_v19  ;;  %1948 = vmatprep.subr.bf16.mxu1 %v7339_v45 }
 0x1d8   :  { %1949 = vmatpush1.bf16.msra.mxu1 %v7342_v20  ;;  %6010 = vmatpush3.bf16.msra.mxu0 %v6433_v21 }
 0x1d9   :  { %6011 = vmatprep.subr.bf16.mxu0 %v7929_v19  ;;  %1950 = vmatprep.subr.bf16.mxu1 %v7346_v22 }
 0x1dc   :  { %1951 = vmatpush1.bf16.msra.mxu1 %v7349_v24  ;;  %6012 = vmatpush3.bf16.msra.mxu0 %v6437_v25 }
 0x1dd   :  { %6013 = vmatprep.subr.bf16.mxu0 %v7929_v19  ;;  %1952 = vmatprep.subr.bf16.mxu1 %v7353_v27 }
 0x1e0   :  { %1953 = vmatpush1.bf16.msra.mxu1 %v7356_v34  ;;  %6014 = vmatpush3.bf16.msra.mxu0 %v6441_v35 }
 0x1e1   :  { %6015 = vmatprep.subr.bf16.mxu0 %v7929_v19  ;;  %1954 = vmatprep.subr.bf16.mxu1 %v7360_v43 }
 0x1e4   :  { %1955 = vmatpush1.bf16.msra.mxu1 %v7363_v16  ;;  %6016 = vmatpush3.bf16.msra.mxu0 %v6445_v44 }
 0x1e5   :  { %6021 = vmatprep.subr.bf16.mxu0 %v7929_v19  ;;  %2182 = vmatprep.subr.bf16.mxu1 %v7367_v9 }
 0x279   :  { %v1428_v17 = vpop.f32.mrb[24].mxu1  ;;  %v1469_v21 = vpop.f32.mrb[40].mxu0 }
 0x27a   :  { %v1717_v25 = vadd.f32 %v1428_v17, %v7202_v51  ;;  %v1430_v35 = vpop.f32.mrb[25].mxu1  ;;  %v5979_v15 = vpop.f32.mrb[41].mxu0 }
 0x27b   :  { %v1724_v13 = vadd.f32 %v1430_v35, %v7206_v53  ;;  %v1432_v26 = vpop.f32.mrb[26].mxu1  ;;  %v1472_v23 = vpop.f32.mrb[42].mxu0  ;;  %v7379_v35 = vld [vmem:[#allocation10] ss:$12 sps:$4 sm:$0xff]  }
 0x27c   :  { %v5405_v54 = vmul.f32 -1.442695, %v1717_v25  ;;  %v1433_v10 = vpop.f32.mrb[27].mxu1  ;;  %v5980_v11 = vpop.f32.mrb[43].mxu0 }
 0x27d   :  { %v5406_v44 = vmul.f32 -1.442695, %v1724_v13 }
 0x27e   :  { %6642 = vpow2.f32 %v5405_v54 }
 0x27f   :  { %6644 = vpow2.f32 %v5406_v44 }
 0x288   :  { %v6643_v8 = vpop.eup %6642 }
 0x289   :  { %v1721_v31 = vadd.f32 1.0, %v6643_v8  ;;  %v6645_v30 = vpop.eup %6644 }
 0x28a   :  { %v1728_v58 = vadd.f32 1.0, %v6645_v30 }
 0x28b   :  { %6646 = vrcp.f32 %v1721_v31 }
 0x28c   :  { %6648 = vrcp.f32 %v1728_v58 }
 0x295   :  { %v6647_v5 = vpop.eup %6646 }
 0x296   :  { %v1731_v6 = vmul.f32 %v6647_v5, %v1469_v21  ;;  %v6649_v30 = vpop.eup %6648 }
 0x297   :  { %v1734_v58 = vsub.f32 1.0, %v6649_v30 }
 0x298   :  { %v1732_v51 = vadd.f32 %v1731_v6, %v7204_v52  ;;  %v1736_v6 = vmul.f32 %v6649_v30, %v7287_v49  ;;  %v6461_v30 = vld [vmem:[#allocation10 + $0x50] ss:$12 sps:$4 sm:$0xff]  }
 0x299   :  { %v1670_v15 = vpop.f32.mrb[28].mxu1  ;;  %v1711_v53 = vpop.f32.mrb[44].mxu0 }
 0x29a   :  { %6650 = vtanh.f32 %v1732_v51  ;;  %v1738_v23 = vadd.f32 %v1670_v15, %v7248_v12  ;;  %v1672_v10 = vpop.f32.mrb[29].mxu1  ;;  %v5999_v11 = vpop.f32.mrb[45].mxu0  ;;  %v7383_v15 = vld [vmem:[#allocation10 + $0x1c] ss:$12 sps:$4 sm:$0xff]  }
 0x29b   :  { %v1745_v54 = vadd.f32 %v1672_v10, %v7280_v41  ;;  %v1674_v13 = vpop.f32.mrb[30].mxu1  ;;  %v1714_v26 = vpop.f32.mrb[46].mxu0  ;;  %v6449_v41 = vld [vmem:[#allocation10 + $0x8] ss:$12 sps:$4 sm:$0xff]   ;;  %v6453_v10 = vld [vmem:[#allocation10 + $0x20] ss:$12 sps:$4 sm:$0xff]  }
 0x29c   :  { %v5407_v8 = vmul.f32 -1.442695, %v1738_v23  ;;  %v1675_v31 = vpop.f32.mrb[31].mxu1  ;;  %v6000_v17 = vpop.f32.mrb[47].mxu0  ;;  %v7386_v23 = vld [vmem:[#allocation10 + $0x18] ss:$12 sps:$4 sm:$0xff]  }
 0x29d   :  { %v5408_v5 = vmul.f32 -1.442695, %v1745_v54  ;;  %v7390_v11 = vld [vmem:[#allocation10 + $0x34] ss:$12 sps:$4 sm:$0xff]   ;;  %v7396_v13 = vld [vmem:[#allocation10 + $0x30] ss:$12 sps:$4 sm:$0xff]  }
 0x29e   :  { %6652 = vpow2.f32 %v5407_v8  ;;  %v6457_v26 = vld [vmem:[#allocation10 + $0x38] ss:$12 sps:$4 sm:$0xff]   ;;  %v7403_v17 = vld [vmem:[#allocation10 + $0x48] ss:$12 sps:$4 sm:$0xff]  }
 0x29f   :  { %6654 = vpow2.f32 %v5408_v5  ;;  %v7400_v8 = vld [vmem:[#allocation10 + $0x4c] ss:$12 sps:$4 sm:$0xff]  }
 0x2a4   :  { %v6651_v21 = vpop.eup %6650 }
 0x2a5   :  { %v1735_v52 = vmul.f32 %v6651_v21, %v1734_v58  ;;  %v7407_v58 = vld [vmem:[#allocation10 + $0x64] ss:$12 sps:$4 sm:$0xff]  }
 0x2a7   :  { %v7377_v25 = vadd.f32 %v1736_v6, %v1735_v52  ;;  %v7411_v6 = vld [vmem:[#allocation10 + $0x60] ss:$12 sps:$4 sm:$0xff]  }
 0x2a8   :  { %v6653_v12 = vpop.eup %6652 }
 0x2a9   :  { %v1742_v44 = vadd.f32 1.0, %v6653_v12  ;;  %v1779_v51 = vpack.c.bf16 %v7377_v25, %v7377_v25  ;;  %v6655_v54 = vpop.eup %6654  ;;  %v6465_v12 = vld [vmem:[#allocation10 + $0x68] ss:$12 sps:$4 sm:$0xff]  }
 0x2aa   :  { %v1749_v31 = vadd.f32 1.0, %v6655_v54  ;;  %v6473_v54 = vld [vmem:[#allocation10 + $0x98] ss:$12 sps:$4 sm:$0xff]  }
 0x2ab   :  { %6656 = vrcp.f32 %v1742_v44  ;;  %1973 = vmatmul.mubr.bf16.vlgmr.msra.gmra.mrb[32].mxu1 %v1779_v51  ;;  %6018 = vmatmul.mubr.bf16.vlgmr.msra.gmra.mrb[48].mxu0 %v1779_v51  ;;  %v6469_v44 = vld [vmem:[#allocation10 + $0x80] ss:$12 sps:$4 sm:$0xff]  }
 0x2ac   :  { %2183 = vmatpush1.bf16.msra.mxu1 %v7379_v35  ;;  %6022 = vmatpush3.bf16.msra.mxu0 %v6449_v41  ;;  %6658 = vrcp.f32 %v1749_v31  ;;  %v7415_v41 = vld [vmem:[#allocation10 + $0x7c] ss:$12 sps:$4 sm:$0xff]  }
 0x2ad   :  { %2184 = vmatprep.subr.bf16.mxu1 %v7383_v15  ;;  %6023 = vmatprep.subr.bf16.mxu0 %v7929_v19 }
 0x2ae   :  { %2214 = vmatprep.mubr.bf16.mxu1 %v7930_v50  ;;  %6037 = vmatprep.mubr.msk.bf16.mxu0 %vm6948_vm0, %v7929_v19 }
 0x2b0   :  { %2185 = vmatpush1.bf16.msra.mxu1 %v7386_v23  ;;  %6024 = vmatpush3.bf16.msra.mxu0 %v6453_v10  ;;  %v7425_v10 = vld [vmem:[#allocation10 + $0x90] ss:$12 sps:$4 sm:$0xff]  }
 0x2b1   :  { %2186 = vmatprep.subr.bf16.mxu1 %v7390_v11  ;;  %6025 = vmatprep.subr.bf16.mxu0 %v7929_v19 }
 0x2b4   :  { %2187 = vmatpush1.bf16.msra.mxu1 %v7396_v13  ;;  %6026 = vmatpush3.bf16.msra.mxu0 %v6457_v26  ;;  %v7429_v26 = vld [vmem:[#allocation10 + $0xac] ss:$12 sps:$4 sm:$0xff]  }
 0x2b5   :  { %v6657_v5 = vpop.eup %6656  ;;  %2188 = vmatprep.subr.bf16.mxu1 %v7400_v8  ;;  %6027 = vmatprep.subr.bf16.mxu0 %v7929_v19 }
 0x2b6   :  { %v1752_v21 = vmul.f32 %v6657_v5, %v1711_v53  ;;  %v7418_v53 = vld [vmem:[#allocation10 + $0x78] ss:$12 sps:$4 sm:$0xff]   ;;  %v6659_v51 = vpop.eup %6658  ;;  %v7432_v5 = vld [vmem:[#allocation10 + $0xa8] ss:$12 sps:$4 sm:$0xff]  }
 0x2b7   :  { %v1755_v31 = vsub.f32 1.0, %v6659_v51 }
 0x2b8   :  { %v1753_v52 = vadd.f32 %v1752_v21, %v7282_v42  ;;  %2189 = vmatpush1.bf16.msra.mxu1 %v7403_v17  ;;  %6028 = vmatpush3.bf16.msra.mxu0 %v6461_v30  ;;  %v7422_v42 = vld [vmem:[#allocation10 + $0x94] ss:$12 sps:$4 sm:$0xff]   ;;  %v6477_v21 = vld [vmem:[#allocation10 + $0xb0] ss:$12 sps:$4 sm:$0xff]  }
 0x2b9   :  { %2190 = vmatprep.subr.bf16.mxu1 %v7407_v58  ;;  %6029 = vmatprep.subr.bf16.mxu0 %v7929_v19 }
 0x2ba   :  { %6660 = vtanh.f32 %v1753_v52 }
 0x2bc   :  { %2191 = vmatpush1.bf16.msra.mxu1 %v7411_v6  ;;  %6030 = vmatpush3.bf16.msra.mxu0 %v6465_v12  ;;  %v1757_v12 = vmul.f32 %v6659_v51, %v7303_v38  ;;  %v6479_v51 = vld [vmem:[#allocation9 + $0x20] ss:$12 sps:$4 sm:$0xff]  }
 0x2bd   :  { %2192 = vmatprep.subr.bf16.mxu1 %v7415_v41  ;;  %6031 = vmatprep.subr.bf16.mxu0 %v7929_v19 }
 0x2c0   :  { %2193 = vmatpush1.bf16.msra.mxu1 %v7418_v53  ;;  %6032 = vmatpush3.bf16.msra.mxu0 %v6469_v44 }
 0x2c1   :  { %2194 = vmatprep.subr.bf16.mxu1 %v7422_v42  ;;  %6033 = vmatprep.subr.bf16.mxu0 %v7929_v19 }
 0x2c4   :  { %v6661_v30 = vpop.eup %6660  ;;  %2195 = vmatpush1.bf16.msra.mxu1 %v7425_v10  ;;  %6034 = vmatpush3.bf16.msra.mxu0 %v6473_v54  ;;  %v6480_v54 = vld [vmem:[#allocation9 + $0x38] ss:$12 sps:$4 sm:$0xff]  }
 0x2c5   :  { %2196 = vmatprep.subr.bf16.mxu1 %v7429_v26  ;;  %6035 = vmatprep.subr.bf16.mxu0 %v7929_v19  ;;  %v1756_v52 = vmul.f32 %v6661_v30, %v1755_v31  ;;  %v6481_v31 = vld [vmem:[#allocation9 + $0x50] ss:$12 sps:$4 sm:$0xff]   ;;  %v6482_v30 = vld [vmem:[#allocation9 + $0x68] ss:$12 sps:$4 sm:$0xff]  }
 0x2c7   :  { %v7437_v44 = vadd.f32 %v1757_v12, %v1756_v52  ;;  %v6484_v52 = vld [vmem:[#allocation9 + $0x98] ss:$12 sps:$4 sm:$0xff]   ;;  %v6485_v12 = vld [vmem:[#allocation9 + $0xb0] ss:$12 sps:$4 sm:$0xff]  }
 0x2c8   :  { %2197 = vmatpush1.bf16.msra.mxu1 %v7432_v5  ;;  %6036 = vmatpush3.bf16.msra.mxu0 %v6477_v21  ;;  %v6483_v21 = vld [vmem:[#allocation9 + $0x80] ss:$12 sps:$4 sm:$0xff]  }
 0x2c9   :  { %v2021_v49 = vpack.c.bf16 %v7437_v44, %v7437_v44  ;;  %2486 = vmatprep.subr.bf16.mxu1 %v7312_v28  ;;  %6041 = vmatprep.subr.bf16.mxu0 %v7929_v19 }
 0x2cb   :  { %2215 = vmatmul.mubr.bf16.vlgmr.msra.gmra.mrb[36].mxu1 %v2021_v49  ;;  %6038 = vmatmul.mubr.bf16.vlgmr.msra.gmra.mrb[52].mxu0 %v2021_v49  ;;  %v6478_v49 = vld [vmem:[#allocation9 + $0x8] ss:$12 sps:$4 sm:$0xff]  }
 0x2cc   :  { %2487 = vmatpush1.bf16.msra.mxu1 %v7314_v46  ;;  %2518 = vmatprep.mubr.bf16.mxu1 %v7930_v50 }
 0x2cd   :  { %2488 = vmatprep.subr.bf16.mxu1 %v7318_v29  ;;  %6057 = vmatprep.mubr.msk.bf16.mxu0 %vm6948_vm0, %v7929_v19 }
 0x2ce   :  { %6042 = vmatpush3.bf16.msra.mxu0 %v6478_v49 }
 0x2cf   :  { %6043 = vmatprep.subr.bf16.mxu0 %v7929_v19 }
 0x2d0   :  { %2489 = vmatpush1.bf16.msra.mxu1 %v7321_v47 }
 0x2d1   :  { %2490 = vmatprep.subr.bf16.mxu1 %v7325_v48 }
 0x2d2   :  { %6044 = vmatpush3.bf16.msra.mxu0 %v6479_v51 }
 0x2d3   :  { %6045 = vmatprep.subr.bf16.mxu0 %v7929_v19 }
 0x2d4   :  { %2491 = vmatpush1.bf16.msra.mxu1 %v7328_v0 }
 0x2d5   :  { %2492 = vmatprep.subr.bf16.mxu1 %v7332_v18 }
 0x2d6   :  { %6046 = vmatpush3.bf16.msra.mxu0 %v6480_v54 }
 0x2d7   :  { %6047 = vmatprep.subr.bf16.mxu0 %v7929_v19 }
 0x2d8   :  { %2493 = vmatpush1.bf16.msra.mxu1 %v7335_v14 }
 0x2d9   :  { %2494 = vmatprep.subr.bf16.mxu1 %v7339_v45 }
 0x2da   :  { %6048 = vmatpush3.bf16.msra.mxu0 %v6481_v31 }
 0x2db   :  { %6049 = vmatprep.subr.bf16.mxu0 %v7929_v19 }
 0x2dc   :  { %2495 = vmatpush1.bf16.msra.mxu1 %v7342_v20 }
 0x2dd   :  { %2496 = vmatprep.subr.bf16.mxu1 %v7346_v22 }
 0x2de   :  { %6050 = vmatpush3.bf16.msra.mxu0 %v6482_v30 }
 0x2df   :  { %6051 = vmatprep.subr.bf16.mxu0 %v7929_v19 }
 0x2e0   :  { %2497 = vmatpush1.bf16.msra.mxu1 %v7349_v24 }
 0x2e1   :  { %2498 = vmatprep.subr.bf16.mxu1 %v7353_v27 }
 0x2e2   :  { %6052 = vmatpush3.bf16.msra.mxu0 %v6483_v21 }
 0x2e3   :  { %6053 = vmatprep.subr.bf16.mxu0 %v7929_v19 }
 0x2e4   :  { %2499 = vmatpush1.bf16.msra.mxu1 %v7356_v34 }
 0x2e5   :  { %2500 = vmatprep.subr.bf16.mxu1 %v7360_v43 }
 0x2e6   :  { %6054 = vmatpush3.bf16.msra.mxu0 %v6484_v52 }
 0x2e7   :  { %6055 = vmatprep.subr.bf16.mxu0 %v7929_v19 }
 0x2e8   :  { %2501 = vmatpush1.bf16.msra.mxu1 %v7363_v16 }
 0x2e9   :  { %2728 = vmatprep.subr.bf16.mxu1 %v7367_v9 }
 0x2ea   :  { %6056 = vmatpush3.bf16.msra.mxu0 %v6485_v12 }
 0x2eb   :  { %6061 = vmatprep.subr.bf16.mxu0 %v7929_v19 }
 0x37e   :  { %v1974_v49 = vpop.f32.mrb[32].mxu1  ;;  %v2015_v51 = vpop.f32.mrb[48].mxu0 }
 0x37f   :  { %v2263_v54 = vadd.f32 %v1974_v49, %v7210_v55  ;;  %v1976_v31 = vpop.f32.mrb[33].mxu1  ;;  %v6019_v30 = vpop.f32.mrb[49].mxu0 }
 0x380   :  { %v2270_v38 = vadd.f32 %v1976_v31, %v7214_v57  ;;  %v1978_v4 = vpop.f32.mrb[34].mxu1  ;;  %v2018_v21 = vpop.f32.mrb[50].mxu0 }
 0x381   :  { %v5457_v33 = vmul.f32 -1.442695, %v2263_v54  ;;  %v1979_v32 = vpop.f32.mrb[35].mxu1  ;;  %v6020_v62 = vpop.f32.mrb[51].mxu0 }
 0x382   :  { %v5458_v52 = vmul.f32 -1.442695, %v2270_v38 }
 0x383   :  { %6662 = vpow2.f32 %v5457_v33 }
 0x384   :  { %6664 = vpow2.f32 %v5458_v52  ;;  %v6486_v52 = vld [vmem:[#allocation10 + $0x8] ss:$12 sps:$4 sm:$0xff]  }
 0x38d   :  { %v6663_v1 = vpop.eup %6662 }
 0x38e   :  { %v2267_v12 = vadd.f32 1.0, %v6663_v1  ;;  %v6665_v2 = vpop.eup %6664 }
 0x38f   :  { %v2274_v63 = vadd.f32 1.0, %v6665_v2 }
 0x390   :  { %6666 = vrcp.f32 %v2267_v12 }
 0x391   :  { %6668 = vrcp.f32 %v2274_v63 }
 0x39a   :  { %v6667_v37 = vpop.eup %6666 }
 0x39b   :  { %v2277_v36 = vmul.f32 %v6667_v37, %v2015_v51  ;;  %v6669_v2 = vpop.eup %6668 }
 0x39c   :  { %v2280_v63 = vsub.f32 1.0, %v6669_v2 }
 0x39d   :  { %v2278_v55 = vadd.f32 %v2277_v36, %v7212_v56  ;;  %v2282_v36 = vmul.f32 %v6669_v2, %v7377_v25 }
 0x39e   :  { %v2216_v49 = vpop.f32.mrb[36].mxu1  ;;  %v2257_v57 = vpop.f32.mrb[52].mxu0 }
 0x39f   :  { %6670 = vtanh.f32 %v2278_v55  ;;  %v2284_v4 = vadd.f32 %v2216_v49, %v7240_v7  ;;  %v2218_v32 = vpop.f32.mrb[37].mxu1  ;;  %v6039_v62 = vpop.f32.mrb[53].mxu0  ;;  %v6487_v55 = vld [vmem:[#allocation10 + $0x20] ss:$12 sps:$4 sm:$0xff]  }
 0x3a0   :  { %v2291_v33 = vadd.f32 %v2218_v32, %v7276_v39  ;;  %v2220_v38 = vpop.f32.mrb[38].mxu1  ;;  %v2260_v54 = vpop.f32.mrb[54].mxu0  ;;  %v6489_v62 = vld [vmem:[#allocation10 + $0x50] ss:$12 sps:$4 sm:$0xff]  }
 0x3a1   :  { %v5459_v1 = vmul.f32 -1.442695, %v2284_v4  ;;  %v2221_v31 = vpop.f32.mrb[39].mxu1  ;;  %v6040_v30 = vpop.f32.mrb[55].mxu0  ;;  %v6488_v4 = vld [vmem:[#allocation10 + $0x38] ss:$12 sps:$4 sm:$0xff]  }
 0x3a2   :  { %v5460_v37 = vmul.f32 -1.442695, %v2291_v33  ;;  %v6491_v31 = vld [vmem:[#allocation10 + $0x80] ss:$12 sps:$4 sm:$0xff]  }
 0x3a3   :  { %6672 = vpow2.f32 %v5459_v1  ;;  %v6490_v1 = vld [vmem:[#allocation10 + $0x68] ss:$12 sps:$4 sm:$0xff]  }
 0x3a4   :  { %6674 = vpow2.f32 %v5460_v37  ;;  %v6493_v37 = vld [vmem:[#allocation10 + $0xb0] ss:$12 sps:$4 sm:$0xff]  }
 0x3a9   :  { %v6671_v51 = vpop.eup %6670 }
 0x3aa   :  { %v2281_v56 = vmul.f32 %v6671_v51, %v2280_v63 }
 0x3ac   :  { %v7477_v21 = vadd.f32 %v2282_v36, %v2281_v56 }
 0x3ad   :  { %v6673_v7 = vpop.eup %6672 }
 0x3ae   :  { %v2288_v12 = vadd.f32 1.0, %v6673_v7  ;;  %v2325_v39 = vpack.c.bf16 %v7477_v21, %v7477_v21  ;;  %v6675_v49 = vpop.eup %6674 }
 0x3af   :  { %v2295_v32 = vadd.f32 1.0, %v6675_v49 }
 0x3b0   :  { %6676 = vrcp.f32 %v2288_v12  ;;  %2519 = vmatmul.mubr.bf16.vlgmr.msra.gmra.mrb[40].mxu1 %v2325_v39  ;;  %6058 = vmatmul.mubr.bf16.vlgmr.msra.gmra.mrb[56].mxu0 %v2325_v39 }
 0x3b1   :  { %2729 = vmatpush1.bf16.msra.mxu1 %v7379_v35  ;;  %6062 = vmatpush3.bf16.msra.mxu0 %v6486_v52  ;;  %6678 = vrcp.f32 %v2295_v32 }
 0x3b2   :  { %2730 = vmatprep.subr.bf16.mxu1 %v7383_v15  ;;  %6063 = vmatprep.subr.bf16.mxu0 %v7929_v19 }
 0x3b3   :  { %2760 = vmatprep.mubr.bf16.mxu1 %v7930_v50  ;;  %6077 = vmatprep.mubr.msk.bf16.mxu0 %vm6948_vm0, %v7929_v19 }
 0x3b5   :  { %2731 = vmatpush1.bf16.msra.mxu1 %v7386_v23  ;;  %6064 = vmatpush3.bf16.msra.mxu0 %v6487_v55 }
 0x3b6   :  { %2732 = vmatprep.subr.bf16.mxu1 %v7390_v11  ;;  %6065 = vmatprep.subr.bf16.mxu0 %v7929_v19 }
 0x3b9   :  { %2733 = vmatpush1.bf16.msra.mxu1 %v7396_v13  ;;  %6066 = vmatpush3.bf16.msra.mxu0 %v6488_v4 }
 0x3ba   :  { %v6677_v33 = vpop.eup %6676  ;;  %2734 = vmatprep.subr.bf16.mxu1 %v7400_v8  ;;  %6067 = vmatprep.subr.bf16.mxu0 %v7929_v19 }
 0x3bb   :  { %v2298_v38 = vmul.f32 %v6677_v33, %v2257_v57  ;;  %v6679_v57 = vpop.eup %6678 }
 0x3bc   :  { %v2301_v30 = vsub.f32 1.0, %v6679_v57  ;;  %v2303_v51 = vmul.f32 %v6679_v57, %v7437_v44 }
 0x3bd   :  { %v2299_v54 = vadd.f32 %v2298_v38, %v7278_v40  ;;  %2735 = vmatpush1.bf16.msra.mxu1 %v7403_v17  ;;  %6068 = vmatpush3.bf16.msra.mxu0 %v6489_v62  ;;  %v6492_v40 = vld [vmem:[#allocation10 + $0x98] ss:$12 sps:$4 sm:$0xff]  }
 0x3be   :  { %2736 = vmatprep.subr.bf16.mxu1 %v7407_v58  ;;  %6069 = vmatprep.subr.bf16.mxu0 %v7929_v19 }
 0x3bf   :  { %6680 = vtanh.f32 %v2299_v54 }
 0x3c1   :  { %2737 = vmatpush1.bf16.msra.mxu1 %v7411_v6  ;;  %6070 = vmatpush3.bf16.msra.mxu0 %v6490_v1 }
 0x3c2   :  { %2738 = vmatprep.subr.bf16.mxu1 %v7415_v41  ;;  %6071 = vmatprep.subr.bf16.mxu0 %v7929_v19 }
 0x3c5   :  { %2739 = vmatpush1.bf16.msra.mxu1 %v7418_v53  ;;  %6072 = vmatpush3.bf16.msra.mxu0 %v6491_v31  ;;  %v7932_v31 = vld [vmem:[#allocation42_spill] sm:$0xff] }
 0x3c6   :  { %2740 = vmatprep.subr.bf16.mxu1 %v7422_v42  ;;  %6073 = vmatprep.subr.bf16.mxu0 %v7929_v19 }
 0x3c9   :  { %v6681_v2 = vpop.eup %6680  ;;  %2741 = vmatpush1.bf16.msra.mxu1 %v7425_v10  ;;  %6074 = vmatpush3.bf16.msra.mxu0 %v6492_v40 }
 0x3ca   :  { %2742 = vmatprep.subr.bf16.mxu1 %v7429_v26  ;;  %6075 = vmatprep.subr.bf16.mxu0 %v7929_v19  ;;  %v2302_v63 = vmul.f32 %v6681_v2, %v2301_v30 }
 0x3cc   :  { %v7507_v56 = vadd.f32 %v2303_v51, %v2302_v63 }
 0x3cd   :  { %2743 = vmatpush1.bf16.msra.mxu1 %v7432_v5  ;;  %6076 = vmatpush3.bf16.msra.mxu0 %v6493_v37 }
 0x3ce   :  { %v2567_v36 = vpack.c.bf16 %v7507_v56, %v7507_v56  ;;  %3026 = vmatprep.subr.bf16.mxu1 %v7312_v28  ;;  %6081 = vmatprep.subr.bf16.mxu0 %v7929_v19  ;;  %v6494_v28 = vld [vmem:[#allocation9 + $0x8] ss:$12 sps:$4 sm:$0xff]  }
 0x3d0   :  { %2761 = vmatmul.mubr.bf16.vlgmr.msra.gmra.mrb[44].mxu1 %v2567_v36  ;;  %6078 = vmatmul.mubr.bf16.vlgmr.msra.gmra.mrb[60].mxu0 %v2567_v36 }
 0x3d1   :  { %3027 = vmatpush1.bf16.msra.mxu1 %v7314_v46  ;;  %3058 = vmatprep.mubr.bf16.mxu1 %v7930_v50  ;;  %v6495_v46 = vld [vmem:[#allocation9 + $0x20] ss:$12 sps:$4 sm:$0xff]  }
 0x3d2   :  { %3028 = vmatprep.subr.bf16.mxu1 %v7318_v29  ;;  %6097 = vmatprep.mubr.msk.bf16.mxu0 %vm6948_vm0, %v7929_v19  ;;  %v6496_v29 = vld [vmem:[#allocation9 + $0x38] ss:$12 sps:$4 sm:$0xff]  }
 0x3d3   :  { %6082 = vmatpush3.bf16.msra.mxu0 %v6494_v28 }
 0x3d4   :  { %6083 = vmatprep.subr.bf16.mxu0 %v7929_v19 }
 0x3d5   :  { %3029 = vmatpush1.bf16.msra.mxu1 %v7321_v47  ;;  %v6497_v47 = vld [vmem:[#allocation9 + $0x50] ss:$12 sps:$4 sm:$0xff]  }
 0x3d6   :  { %3030 = vmatprep.subr.bf16.mxu1 %v7325_v48  ;;  %v6498_v48 = vld [vmem:[#allocation9 + $0x68] ss:$12 sps:$4 sm:$0xff]  }
 0x3d7   :  { %6084 = vmatpush3.bf16.msra.mxu0 %v6495_v46 }
 0x3d8   :  { %6085 = vmatprep.subr.bf16.mxu0 %v7929_v19 }
 0x3d9   :  { %3031 = vmatpush1.bf16.msra.mxu1 %v7328_v0  ;;  %v6499_v0 = vld [vmem:[#allocation9 + $0x80] ss:$12 sps:$4 sm:$0xff]  }
 0x3da   :  { %3032 = vmatprep.subr.bf16.mxu1 %v7332_v18  ;;  %v6500_v18 = vld [vmem:[#allocation9 + $0x98] ss:$12 sps:$4 sm:$0xff]  }
 0x3db   :  { %6086 = vmatpush3.bf16.msra.mxu0 %v6496_v29 }
 0x3dc   :  { %6087 = vmatprep.subr.bf16.mxu0 %v7929_v19 }
 0x3dd   :  { %3033 = vmatpush1.bf16.msra.mxu1 %v7335_v14  ;;  %v6501_v14 = vld [vmem:[#allocation9 + $0xb0] ss:$12 sps:$4 sm:$0xff]  }
 0x3de   :  { %3034 = vmatprep.subr.bf16.mxu1 %v7339_v45 }
 0x3df   :  { %6088 = vmatpush3.bf16.msra.mxu0 %v6497_v47 }
 0x3e0   :  { %6089 = vmatprep.subr.bf16.mxu0 %v7929_v19 }
 0x3e1   :  { %3035 = vmatpush1.bf16.msra.mxu1 %v7342_v20 }
 0x3e2   :  { %3036 = vmatprep.subr.bf16.mxu1 %v7346_v22 }
 0x3e3   :  { %6090 = vmatpush3.bf16.msra.mxu0 %v6498_v48  ;;  %v6502_v48 = vld [vmem:[#allocation10 + $0x8] ss:$12 sps:$4 sm:$0xff]  }
 0x3e4   :  { %6091 = vmatprep.subr.bf16.mxu0 %v7929_v19 }
 0x3e5   :  { %3037 = vmatpush1.bf16.msra.mxu1 %v7349_v24 }
 0x3e6   :  { %3038 = vmatprep.subr.bf16.mxu1 %v7353_v27 }
 0x3e7   :  { %6092 = vmatpush3.bf16.msra.mxu0 %v6499_v0 }
 0x3e8   :  { %6093 = vmatprep.subr.bf16.mxu0 %v7929_v19 }
 0x3e9   :  { %3039 = vmatpush1.bf16.msra.mxu1 %v7356_v34 }
 0x3ea   :  { %3040 = vmatprep.subr.bf16.mxu1 %v7360_v43 }
 0x3eb   :  { %6094 = vmatpush3.bf16.msra.mxu0 %v6500_v18 }
 0x3ec   :  { %6095 = vmatprep.subr.bf16.mxu0 %v7929_v19 }
 0x3ed   :  { %3041 = vmatpush1.bf16.msra.mxu1 %v7363_v16 }
 0x3ee   :  { %3268 = vmatprep.subr.bf16.mxu1 %v7367_v9 }
 0x3ef   :  { %6096 = vmatpush3.bf16.msra.mxu0 %v6501_v14  ;;  %v6503_v14 = vld [vmem:[#allocation10 + $0x20] ss:$12 sps:$4 sm:$0xff]  }
 0x3f0   :  { %6101 = vmatprep.subr.bf16.mxu0 %v7929_v19 }
 0x483   :  { %v2520_v45 = vpop.f32.mrb[40].mxu1  ;;  %v2561_v20 = vpop.f32.mrb[56].mxu0 }
 0x484   :  { %v2809_v22 = vadd.f32 %v2520_v45, %v7218_v59  ;;  %v2522_v24 = vpop.f32.mrb[41].mxu1  ;;  %v6059_v27 = vpop.f32.mrb[57].mxu0 }
 0x485   :  { %v2816_v34 = vadd.f32 %v2522_v24, %v7222_v61  ;;  %v2524_v43 = vpop.f32.mrb[42].mxu1  ;;  %v2564_v16 = vpop.f32.mrb[58].mxu0  ;;  %v7933_v27 = vld [vmem:[#allocation43_spill] sm:$0xff] }
 0x486   :  { %v5509_v9 = vmul.f32 -1.442695, %v2809_v22  ;;  %v2525_v7 = vpop.f32.mrb[43].mxu1  ;;  %v6060_v52 = vpop.f32.mrb[59].mxu0  ;;  %v6513_v16 = vld [vmem:[#allocation9 + $0x8] ss:$12 sps:$4 sm:$0xff]  }
 0x487   :  { %v5510_v12 = vmul.f32 -1.442695, %v2816_v34  ;;  %v6517_v7 = vld [vmem:[#allocation9 + $0x20] ss:$12 sps:$4 sm:$0xff]  }
 0x488   :  { %6682 = vpow2.f32 %v5509_v9  ;;  %v7595_v9 = vld [vmem:[#allocation9 + $0x18] ss:$12 sps:$4 sm:$0xff]   ;;  %v7599_v52 = vld [vmem:[#allocation9 + $0x34] ss:$12 sps:$4 sm:$0xff]  }
 0x489   :  { %6684 = vpow2.f32 %v5510_v12  ;;  %v7602_v12 = vld [vmem:[#allocation9 + $0x30] ss:$12 sps:$4 sm:$0xff]  }
 0x492   :  { %v6683_v39 = vpop.eup %6682 }
 0x493   :  { %v2813_v55 = vadd.f32 1.0, %v6683_v39  ;;  %v6685_v49 = vpop.eup %6684  ;;  %v6521_v39 = vld [vmem:[#allocation9 + $0x38] ss:$12 sps:$4 sm:$0xff]  }
 0x494   :  { %v2820_v4 = vadd.f32 1.0, %v6685_v49  ;;  %v7609_v49 = vld [vmem:[#allocation9 + $0x48] ss:$12 sps:$4 sm:$0xff]  }
 0x495   :  { %6686 = vrcp.f32 %v2813_v55  ;;  %v7606_v55 = vld [vmem:[#allocation9 + $0x4c] ss:$12 sps:$4 sm:$0xff]  }
 0x496   :  { %6688 = vrcp.f32 %v2820_v4  ;;  %v6525_v4 = vld [vmem:[#allocation9 + $0x50] ss:$12 sps:$4 sm:$0xff]  }
 0x49f   :  { %v6687_v32 = vpop.eup %6686 }
 0x4a0   :  { %v2823_v62 = vmul.f32 %v6687_v32, %v2561_v20  ;;  %v6689_v51 = vpop.eup %6688  ;;  %v6504_v20 = vld [vmem:[#allocation10 + $0x38] ss:$12 sps:$4 sm:$0xff]  }
 0x4a1   :  { %v2826_v28 = vsub.f32 1.0, %v6689_v51  ;;  %v2828_v29 = vmul.f32 %v6689_v51, %v7477_v21  ;;  %v7613_v32 = vld [vmem:[#allocation9 + $0x64] ss:$12 sps:$4 sm:$0xff]  }
 0x4a2   :  { %v2824_v59 = vadd.f32 %v2823_v62, %v7220_v60  ;;  %v7616_v62 = vld [vmem:[#allocation9 + $0x60] ss:$12 sps:$4 sm:$0xff]  }
 0x4a3   :  { %v2762_v33 = vpop.f32.mrb[44].mxu1  ;;  %v2803_v61 = vpop.f32.mrb[60].mxu0  ;;  %v7934_v51 = vld [vmem:[#allocation22_spill] sm:$0xff] }
 0x4a4   :  { %6690 = vtanh.f32 %v2824_v59  ;;  %v2830_v38 = vadd.f32 %v2762_v33, %v7232_v3  ;;  %v2764_v54 = vpop.f32.mrb[45].mxu1  ;;  %v6079_v1 = vpop.f32.mrb[61].mxu0  ;;  %v6529_v59 = vld [vmem:[#allocation9 + $0x68] ss:$12 sps:$4 sm:$0xff]  }
 0x4a5   :  { %v2837_v57 = vadd.f32 %v2764_v54, %v7932_v31  ;;  %v2766_v40 = vpop.f32.mrb[46].mxu1  ;;  %v2806_v30 = vpop.f32.mrb[62].mxu0  ;;  %v7620_v33 = vld [vmem:[#allocation9 + $0x7c] ss:$12 sps:$4 sm:$0xff]   ;;  %v7627_v54 = vld [vmem:[#allocation9 + $0x94] ss:$12 sps:$4 sm:$0xff]  }
 0x4a6   :  { %v5511_v2 = vmul.f32 -1.442695, %v2830_v38  ;;  %v2767_v37 = vpop.f32.mrb[47].mxu1  ;;  %v6080_v63 = vpop.f32.mrb[63].mxu0  ;;  %v6533_v38 = vld [vmem:[#allocation9 + $0x80] ss:$12 sps:$4 sm:$0xff]  }
 0x4a7   :  { %v5512_v36 = vmul.f32 -1.442695, %v2837_v57  ;;  %v7630_v1 = vld [vmem:[#allocation9 + $0x90] ss:$12 sps:$4 sm:$0xff]   ;;  %v6537_v31 = vld [vmem:[#allocation9 + $0x98] ss:$12 sps:$4 sm:$0xff]  }
 0x4a8   :  { %6692 = vpow2.f32 %v5511_v2  ;;  %v7634_v57 = vld [vmem:[#allocation9 + $0xac] ss:$12 sps:$4 sm:$0xff]   ;;  %v7637_v40 = vld [vmem:[#allocation9 + $0xa8] ss:$12 sps:$4 sm:$0xff]   ;;  %v6541_v30 = vld [vmem:[#allocation9 + $0xb0] ss:$12 sps:$4 sm:$0xff]  }
 0x4a9   :  { %6694 = vpow2.f32 %v5512_v36  ;;  %v7641_v2 = vld [vmem:[#allocation10 + $0x4] ss:$12 sps:$4 sm:$0xff]  }
 0x4ae   :  { %v6691_v46 = vpop.eup %6690 }
 0x4af   :  { %v2827_v60 = vmul.f32 %v6691_v46, %v2826_v28 }
 0x4b1   :  { %v7547_v47 = vadd.f32 %v2828_v29, %v2827_v60  ;;  %v7935_v60 = vld [vmem:[#allocation24_spill] sm:$0xff] }
 0x4b2   :  { %v6693_v3 = vpop.eup %6692 }
 0x4b3   :  { %v2834_v0 = vadd.f32 1.0, %v6693_v3  ;;  %v2865_v18 = vpack.c.bf16 %v7547_v47, %v7547_v47  ;;  %v6695_v45 = vpop.eup %6694 }
 0x4b5   :  { %6696 = vrcp.f32 %v2834_v0  ;;  %3059 = vmatmul.mubr.bf16.vlgmr.msra.gmra.mrb[48].mxu1 %v2865_v18  ;;  %6098 = vmatmul.mubr.bf16.vlgmr.msra.gmra.mrb[64].mxu0 %v2865_v18 }
 0x4b6   :  { %3269 = vmatpush1.bf16.msra.mxu1 %v7379_v35  ;;  %6102 = vmatpush3.bf16.msra.mxu0 %v6502_v48  ;;  %v2841_v35 = vadd.f32 1.0, %v6695_v45 }
 0x4b7   :  { %3270 = vmatprep.subr.bf16.mxu1 %v7383_v15  ;;  %6103 = vmatprep.subr.bf16.mxu0 %v7929_v19  ;;  %v6505_v15 = vld [vmem:[#allocation10 + $0x50] ss:$12 sps:$4 sm:$0xff]  }
 0x4b8   :  { %3300 = vmatprep.mubr.bf16.mxu1 %v7930_v50  ;;  %6117 = vmatprep.mubr.msk.bf16.mxu0 %vm6948_vm0, %v7929_v19  ;;  %6698 = vrcp.f32 %v2841_v35 }
 0x4ba   :  { %3271 = vmatpush1.bf16.msra.mxu1 %v7386_v23  ;;  %6104 = vmatpush3.bf16.msra.mxu0 %v6503_v14 }
 0x4bb   :  { %3272 = vmatprep.subr.bf16.mxu1 %v7390_v11  ;;  %6105 = vmatprep.subr.bf16.mxu0 %v7929_v19  ;;  %v6506_v11 = vld [vmem:[#allocation10 + $0x68] ss:$12 sps:$4 sm:$0xff]  }
 0x4be   :  { %3273 = vmatpush1.bf16.msra.mxu1 %v7396_v13  ;;  %6106 = vmatpush3.bf16.msra.mxu0 %v6504_v20  ;;  %v6507_v13 = vld [vmem:[#allocation10 + $0x80] ss:$12 sps:$4 sm:$0xff]  }
 0x4bf   :  { %v6697_v22 = vpop.eup %6696  ;;  %3274 = vmatprep.subr.bf16.mxu1 %v7400_v8  ;;  %6107 = vmatprep.subr.bf16.mxu0 %v7929_v19 }
 0x4c0   :  { %v2844_v24 = vmul.f32 %v6697_v22, %v2803_v61  ;;  %v7623_v61 = vld [vmem:[#allocation9 + $0x78] ss:$12 sps:$4 sm:$0xff]  }
 0x4c2   :  { %v2845_v23 = vadd.f32 %v2844_v24, %v7933_v27  ;;  %3275 = vmatpush1.bf16.msra.mxu1 %v7403_v17  ;;  %6108 = vmatpush3.bf16.msra.mxu0 %v6505_v15  ;;  %v6699_v8 = vpop.eup %6698  ;;  %v6508_v17 = vld [vmem:[#allocation10 + $0x98] ss:$12 sps:$4 sm:$0xff]  }
 0x4c3   :  { %3276 = vmatprep.subr.bf16.mxu1 %v7407_v58  ;;  %6109 = vmatprep.subr.bf16.mxu0 %v7929_v19  ;;  %v2847_v58 = vsub.f32 1.0, %v6699_v8  ;;  %v2849_v43 = vmul.f32 %v6699_v8, %v7507_v56 }
 0x4c4   :  { %6700 = vtanh.f32 %v2845_v23  ;;  %v7936_v23 = vld [vmem:[#allocation23_spill] sm:$0xff] }
 0x4c6   :  { %3277 = vmatpush1.bf16.msra.mxu1 %v7411_v6  ;;  %6110 = vmatpush3.bf16.msra.mxu0 %v6506_v11  ;;  %v6509_v6 = vld [vmem:[#allocation10 + $0xb0] ss:$12 sps:$4 sm:$0xff]  }
 0x4c7   :  { %3278 = vmatprep.subr.bf16.mxu1 %v7415_v41  ;;  %6111 = vmatprep.subr.bf16.mxu0 %v7929_v19 }
 0x4ca   :  { %3279 = vmatpush1.bf16.msra.mxu1 %v7418_v53  ;;  %6112 = vmatpush3.bf16.msra.mxu0 %v6507_v13 }
 0x4cb   :  { %3280 = vmatprep.subr.bf16.mxu1 %v7422_v42  ;;  %6113 = vmatprep.subr.bf16.mxu0 %v7929_v19 }
 0x4ce   :  { %v6701_v34 = vpop.eup %6700  ;;  %3281 = vmatpush1.bf16.msra.mxu1 %v7425_v10  ;;  %6114 = vmatpush3.bf16.msra.mxu0 %v6508_v17  ;;  %v7586_v10 = vld [vmem:[#allocation9 + $0x4] ss:$12 sps:$4 sm:$0xff]   ;;  %v7937_v17 = vld [vmem:[#allocation21_spill] sm:$0xff] }
 0x4cf   :  { %3282 = vmatprep.subr.bf16.mxu1 %v7429_v26  ;;  %6115 = vmatprep.subr.bf16.mxu0 %v7929_v19  ;;  %v2848_v41 = vmul.f32 %v6701_v34, %v2847_v58  ;;  %v7588_v26 = vld [vmem:[#allocation9] ss:$12 sps:$4 sm:$0xff]  }
 0x4d1   :  { %v7577_v53 = vadd.f32 %v2849_v43, %v2848_v41  ;;  %v7938_v41 = vld [vmem:[#allocation40_spill] sm:$0xff] }
 0x4d2   :  { %3283 = vmatpush1.bf16.msra.mxu1 %v7432_v5  ;;  %6116 = vmatpush3.bf16.msra.mxu0 %v6509_v6  ;;  %v7592_v5 = vld [vmem:[#allocation9 + $0x1c] ss:$12 sps:$4 sm:$0xff]  }
 0x4d3   :  { %v3107_v42 = vpack.c.bf16 %v7577_v53, %v7577_v53  ;;  %6121 = vmatprep.subr.bf16.mxu0 %v7929_v19  ;;  %3560 = vmatprep.subr.bf16.mxu1 %v7586_v10 }
 0x4d5   :  { %3301 = vmatmul.mubr.bf16.vlgmr.msra.gmra.mrb[52].mxu1 %v3107_v42  ;;  %6118 = vmatmul.mubr.bf16.vlgmr.msra.gmra.mrb[68].mxu0 %v3107_v42 }
 0x4d6   :  { %3592 = vmatprep.mubr.bf16.mxu1 %v7930_v50  ;;  %6137 = vmatprep.mubr.msk.bf16.mxu0 %vm6948_vm0, %v7929_v19 }
 0x4d7   :  { %3561 = vmatpush1.bf16.msra.mxu1 %v7588_v26  ;;  %6122 = vmatpush3.bf16.msra.mxu0 %v6513_v16 }
 0x4d8   :  { %6123 = vmatprep.subr.bf16.mxu0 %v7929_v19  ;;  %3562 = vmatprep.subr.bf16.mxu1 %v7592_v5 }
 0x4db   :  { %3563 = vmatpush1.bf16.msra.mxu1 %v7595_v9  ;;  %6124 = vmatpush3.bf16.msra.mxu0 %v6517_v7 }
 0x4dc   :  { %6125 = vmatprep.subr.bf16.mxu0 %v7929_v19  ;;  %3564 = vmatprep.subr.bf16.mxu1 %v7599_v52 }
 0x4df   :  { %3565 = vmatpush1.bf16.msra.mxu1 %v7602_v12  ;;  %6126 = vmatpush3.bf16.msra.mxu0 %v6521_v39 }
 0x4e0   :  { %6127 = vmatprep.subr.bf16.mxu0 %v7929_v19  ;;  %3566 = vmatprep.subr.bf16.mxu1 %v7606_v55 }
 0x4e3   :  { %3567 = vmatpush1.bf16.msra.mxu1 %v7609_v49  ;;  %6128 = vmatpush3.bf16.msra.mxu0 %v6525_v4 }
 0x4e4   :  { %6129 = vmatprep.subr.bf16.mxu0 %v7929_v19  ;;  %3568 = vmatprep.subr.bf16.mxu1 %v7613_v32 }
 0x4e7   :  { %3569 = vmatpush1.bf16.msra.mxu1 %v7616_v62  ;;  %6130 = vmatpush3.bf16.msra.mxu0 %v6529_v59 }
 0x4e8   :  { %6131 = vmatprep.subr.bf16.mxu0 %v7929_v19  ;;  %3570 = vmatprep.subr.bf16.mxu1 %v7620_v33 }
 0x4eb   :  { %3571 = vmatpush1.bf16.msra.mxu1 %v7623_v61  ;;  %6132 = vmatpush3.bf16.msra.mxu0 %v6533_v38 }
 0x4ec   :  { %6133 = vmatprep.subr.bf16.mxu0 %v7929_v19  ;;  %3572 = vmatprep.subr.bf16.mxu1 %v7627_v54 }
 0x4ef   :  { %3573 = vmatpush1.bf16.msra.mxu1 %v7630_v1  ;;  %6134 = vmatpush3.bf16.msra.mxu0 %v6537_v31 }
 0x4f0   :  { %6135 = vmatprep.subr.bf16.mxu0 %v7929_v19  ;;  %3574 = vmatprep.subr.bf16.mxu1 %v7634_v57 }
 0x4f3   :  { %3575 = vmatpush1.bf16.msra.mxu1 %v7637_v40  ;;  %6136 = vmatpush3.bf16.msra.mxu0 %v6541_v30 }
 0x4f4   :  { %6141 = vmatprep.subr.bf16.mxu0 %v7929_v19  ;;  %3802 = vmatprep.subr.bf16.mxu1 %v7641_v2 }
 0x588   :  { %v3060_v37 = vpop.f32.mrb[48].mxu1  ;;  %v3101_v63 = vpop.f32.mrb[64].mxu0 }
 0x589   :  { %v3349_v36 = vadd.f32 %v3060_v37, %v7934_v51  ;;  %v3062_v28 = vpop.f32.mrb[49].mxu1  ;;  %v6099_v46 = vpop.f32.mrb[65].mxu0 }
 0x58a   :  { %v3356_v29 = vadd.f32 %v3062_v28, %v7935_v60  ;;  %v3064_v3 = vpop.f32.mrb[50].mxu1  ;;  %v3104_v48 = vpop.f32.mrb[66].mxu0  ;;  %v7653_v28 = vld [vmem:[#allocation10] ss:$12 sps:$4 sm:$0xff]   ;;  %v6545_v46 = vld [vmem:[#allocation10 + $0x8] ss:$12 sps:$4 sm:$0xff]  }
 0x58b   :  { %v5561_v0 = vmul.f32 -1.442695, %v3349_v36  ;;  %v3065_v18 = vpop.f32.mrb[51].mxu1  ;;  %v6100_v14 = vpop.f32.mrb[67].mxu0  ;;  %v7657_v3 = vld [vmem:[#allocation10 + $0x1c] ss:$12 sps:$4 sm:$0xff]  }
 0x58c   :  { %v5562_v45 = vmul.f32 -1.442695, %v3356_v29  ;;  %v7660_v48 = vld [vmem:[#allocation10 + $0x18] ss:$12 sps:$4 sm:$0xff]   ;;  %v7664_v18 = vld [vmem:[#allocation10 + $0x34] ss:$12 sps:$4 sm:$0xff]  }
 0x58d   :  { %6702 = vpow2.f32 %v5561_v0  ;;  %v6549_v0 = vld [vmem:[#allocation10 + $0x20] ss:$12 sps:$4 sm:$0xff]  }
 0x58e   :  { %6704 = vpow2.f32 %v5562_v45  ;;  %v7670_v45 = vld [vmem:[#allocation10 + $0x30] ss:$12 sps:$4 sm:$0xff]  }
 0x597   :  { %v6703_v20 = vpop.eup %6702 }
 0x598   :  { %v3353_v35 = vadd.f32 1.0, %v6703_v20  ;;  %v6705_v15 = vpop.eup %6704  ;;  %v6553_v20 = vld [vmem:[#allocation10 + $0x38] ss:$12 sps:$4 sm:$0xff]  }
 0x599   :  { %v3360_v22 = vadd.f32 1.0, %v6705_v15 }
 0x59a   :  { %6706 = vrcp.f32 %v3353_v35  ;;  %v7674_v35 = vld [vmem:[#allocation10 + $0x4c] ss:$12 sps:$4 sm:$0xff]  }
 0x59b   :  { %6708 = vrcp.f32 %v3360_v22  ;;  %v7677_v22 = vld [vmem:[#allocation10 + $0x48] ss:$12 sps:$4 sm:$0xff]  }
 0x5a4   :  { %v6707_v24 = vpop.eup %6706 }
 0x5a5   :  { %v3363_v27 = vmul.f32 %v6707_v24, %v3101_v63  ;;  %v6709_v59 = vpop.eup %6708  ;;  %v6557_v24 = vld [vmem:[#allocation10 + $0x50] ss:$12 sps:$4 sm:$0xff]  }
 0x5a6   :  { %v3366_v31 = vsub.f32 1.0, %v6709_v59  ;;  %v3368_v63 = vmul.f32 %v6709_v59, %v7547_v47 }
 0x5a7   :  { %v3364_v11 = vadd.f32 %v3363_v27, %v7936_v23  ;;  %v7681_v23 = vld [vmem:[#allocation10 + $0x64] ss:$12 sps:$4 sm:$0xff]  }
 0x5a8   :  { %v3302_v13 = vpop.f32.mrb[52].mxu1  ;;  %v3343_v8 = vpop.f32.mrb[68].mxu0 }
 0x5a9   :  { %6710 = vtanh.f32 %v3364_v11  ;;  %v3370_v58 = vadd.f32 %v3302_v13, %v7937_v17  ;;  %v3304_v34 = vpop.f32.mrb[53].mxu1  ;;  %v6119_v6 = vpop.f32.mrb[69].mxu0  ;;  %v7939_v13 = vld [vmem:[#allocation41_spill] sm:$0xff] }
 0x5aa   :  { %v3377_v43 = vadd.f32 %v3304_v34, %v7938_v41  ;;  %v3306_v42 = vpop.f32.mrb[54].mxu1  ;;  %v3346_v16 = vpop.f32.mrb[70].mxu0  ;;  %v6561_v34 = vld [vmem:[#allocation10 + $0x68] ss:$12 sps:$4 sm:$0xff]   ;;  %v6565_v41 = vld [vmem:[#allocation10 + $0x80] ss:$12 sps:$4 sm:$0xff]  }
 0x5ab   :  { %v5563_v7 = vmul.f32 -1.442695, %v3370_v58  ;;  %v3307_v39 = vpop.f32.mrb[55].mxu1  ;;  %v6120_v4 = vpop.f32.mrb[71].mxu0  ;;  %v7685_v58 = vld [vmem:[#allocation10 + $0x60] ss:$12 sps:$4 sm:$0xff]  }
 0x5ac   :  { %v5564_v38 = vmul.f32 -1.442695, %v3377_v43  ;;  %v7689_v6 = vld [vmem:[#allocation10 + $0x7c] ss:$12 sps:$4 sm:$0xff]   ;;  %v7696_v43 = vld [vmem:[#allocation10 + $0x94] ss:$12 sps:$4 sm:$0xff]  }
 0x5ad   :  { %6712 = vpow2.f32 %v5563_v7  ;;  %v7699_v16 = vld [vmem:[#allocation10 + $0x90] ss:$12 sps:$4 sm:$0xff]   ;;  %v6569_v7 = vld [vmem:[#allocation10 + $0x98] ss:$12 sps:$4 sm:$0xff]  }
 0x5ae   :  { %6714 = vpow2.f32 %v5564_v38  ;;  %v7703_v39 = vld [vmem:[#allocation10 + $0xac] ss:$12 sps:$4 sm:$0xff]   ;;  %v7706_v38 = vld [vmem:[#allocation10 + $0xa8] ss:$12 sps:$4 sm:$0xff]  }
 0x5b3   :  { %v6711_v30 = vpop.eup %6710 }
 0x5b4   :  { %v3367_v37 = vmul.f32 %v6711_v30, %v3366_v31  ;;  %v6573_v31 = vld [vmem:[#allocation10 + $0xb0] ss:$12 sps:$4 sm:$0xff]  }
 0x5b6   :  { %v7651_v51 = vadd.f32 %v3368_v63, %v3367_v37 }
 0x5b7   :  { %v6713_v36 = vpop.eup %6712 }
 0x5b8   :  { %v3374_v60 = vadd.f32 1.0, %v6713_v36  ;;  %v3399_v29 = vpack.c.bf16 %v7651_v51, %v7651_v51  ;;  %v6715_v14 = vpop.eup %6714 }
 0x5b9   :  { %v3381_v15 = vadd.f32 1.0, %v6715_v14  ;;  %v6578_v14 = vld [vmem:[#allocation9 + $0x68] ss:$12 sps:$4 sm:$0xff]  }
 0x5ba   :  { %6716 = vrcp.f32 %v3374_v60  ;;  %3593 = vmatmul.mubr.bf16.vlgmr.msra.gmra.mrb[56].mxu1 %v3399_v29  ;;  %6138 = vmatmul.mubr.bf16.vlgmr.msra.gmra.mrb[72].mxu0 %v3399_v29  ;;  %v6575_v60 = vld [vmem:[#allocation9 + $0x20] ss:$12 sps:$4 sm:$0xff]   ;;  %v6576_v29 = vld [vmem:[#allocation9 + $0x38] ss:$12 sps:$4 sm:$0xff]  }
 0x5bb   :  { %3803 = vmatpush1.bf16.msra.mxu1 %v7653_v28  ;;  %6142 = vmatpush3.bf16.msra.mxu0 %v6545_v46  ;;  %6718 = vrcp.f32 %v3381_v15  ;;  %v6574_v46 = vld [vmem:[#allocation9 + $0x8] ss:$12 sps:$4 sm:$0xff]   ;;  %v6580_v15 = vld [vmem:[#allocation9 + $0x98] ss:$12 sps:$4 sm:$0xff]  }
 0x5bc   :  { %3804 = vmatprep.subr.bf16.mxu1 %v7657_v3  ;;  %6143 = vmatprep.subr.bf16.mxu0 %v7929_v19 }
 0x5bd   :  { %3834 = vmatprep.mubr.bf16.mxu1 %v7930_v50  ;;  %6157 = vmatprep.mubr.msk.bf16.mxu0 %vm6948_vm0, %v7929_v19 }
 0x5bf   :  { %3805 = vmatpush1.bf16.msra.mxu1 %v7660_v48  ;;  %6144 = vmatpush3.bf16.msra.mxu0 %v6549_v0  ;;  %v6577_v0 = vld [vmem:[#allocation9 + $0x50] ss:$12 sps:$4 sm:$0xff]  }
 0x5c0   :  { %3806 = vmatprep.subr.bf16.mxu1 %v7664_v18  ;;  %6145 = vmatprep.subr.bf16.mxu0 %v7929_v19 }
 0x5c3   :  { %3807 = vmatpush1.bf16.msra.mxu1 %v7670_v45  ;;  %6146 = vmatpush3.bf16.msra.mxu0 %v6553_v20  ;;  %v6579_v20 = vld [vmem:[#allocation9 + $0x80] ss:$12 sps:$4 sm:$0xff]  }
 0x5c4   :  { %v6717_v27 = vpop.eup %6716  ;;  %3808 = vmatprep.subr.bf16.mxu1 %v7674_v35  ;;  %6147 = vmatprep.subr.bf16.mxu0 %v7929_v19 }
 0x5c5   :  { %v3384_v11 = vmul.f32 %v6717_v27, %v3343_v8  ;;  %v7692_v8 = vld [vmem:[#allocation10 + $0x78] ss:$12 sps:$4 sm:$0xff]   ;;  %v6719_v42 = vpop.eup %6718 }
 0x5c6   :  { %v3387_v4 = vsub.f32 1.0, %v6719_v42  ;;  %v3389_v37 = vmul.f32 %v6719_v42, %v7577_v53  ;;  %v7941_v42 = vld [vmem:[#allocation27_spill] sm:$0xff] }
 0x5c7   :  { %v3385_v17 = vadd.f32 %v3384_v11, %v7939_v13  ;;  %3809 = vmatpush1.bf16.msra.mxu1 %v7677_v22  ;;  %6148 = vmatpush3.bf16.msra.mxu0 %v6557_v24  ;;  %v6581_v24 = vld [vmem:[#allocation9 + $0xb0] ss:$12 sps:$4 sm:$0xff]  }
 0x5c8   :  { %3810 = vmatprep.subr.bf16.mxu1 %v7681_v23  ;;  %6149 = vmatprep.subr.bf16.mxu0 %v7929_v19  ;;  %v7940_v13 = vld [vmem:[#allocation25_spill] sm:$0xff] }
 0x5c9   :  { %6720 = vtanh.f32 %v3385_v17 }
 0x5cb   :  { %3811 = vmatpush1.bf16.msra.mxu1 %v7685_v58  ;;  %6150 = vmatpush3.bf16.msra.mxu0 %v6561_v34 }
 0x5cc   :  { %3812 = vmatprep.subr.bf16.mxu1 %v7689_v6  ;;  %6151 = vmatprep.subr.bf16.mxu0 %v7929_v19 }
 0x5cf   :  { %3813 = vmatpush1.bf16.msra.mxu1 %v7692_v8  ;;  %6152 = vmatpush3.bf16.msra.mxu0 %v6565_v41 }
 0x5d0   :  { %3814 = vmatprep.subr.bf16.mxu1 %v7696_v43  ;;  %6153 = vmatprep.subr.bf16.mxu0 %v7929_v19 }
 0x5d3   :  { %v6721_v59 = vpop.eup %6720  ;;  %3815 = vmatpush1.bf16.msra.mxu1 %v7699_v16  ;;  %6154 = vmatpush3.bf16.msra.mxu0 %v6569_v7 }
 0x5d4   :  { %3816 = vmatprep.subr.bf16.mxu1 %v7703_v39  ;;  %6155 = vmatprep.subr.bf16.mxu0 %v7929_v19  ;;  %v3388_v30 = vmul.f32 %v6721_v59, %v3387_v4 }
 0x5d6   :  { %v7711_v63 = vadd.f32 %v3389_v37, %v3388_v30 }
 0x5d7   :  { %3817 = vmatpush1.bf16.msra.mxu1 %v7706_v38  ;;  %6156 = vmatpush3.bf16.msra.mxu0 %v6573_v31 }
 0x5d8   :  { %v3641_v36 = vpack.c.bf16 %v7711_v63, %v7711_v63  ;;  %4094 = vmatprep.subr.bf16.mxu1 %v7586_v10  ;;  %6161 = vmatprep.subr.bf16.mxu0 %v7929_v19 }
 0x5da   :  { %3835 = vmatmul.mubr.bf16.vlgmr.msra.gmra.mrb[60].mxu1 %v3641_v36  ;;  %6158 = vmatmul.mubr.bf16.vlgmr.msra.gmra.mrb[76].mxu0 %v3641_v36 }
 0x5db   :  { %4095 = vmatpush1.bf16.msra.mxu1 %v7588_v26  ;;  %4126 = vmatprep.mubr.bf16.mxu1 %v7930_v50 }
 0x5dc   :  { %4096 = vmatprep.subr.bf16.mxu1 %v7592_v5  ;;  %6177 = vmatprep.mubr.msk.bf16.mxu0 %vm6948_vm0, %v7929_v19 }
 0x5dd   :  { %6162 = vmatpush3.bf16.msra.mxu0 %v6574_v46 }
 0x5de   :  { %6163 = vmatprep.subr.bf16.mxu0 %v7929_v19 }
 0x5df   :  { %4097 = vmatpush1.bf16.msra.mxu1 %v7595_v9 }
 0x5e0   :  { %4098 = vmatprep.subr.bf16.mxu1 %v7599_v52 }
 0x5e1   :  { %6164 = vmatpush3.bf16.msra.mxu0 %v6575_v60 }
 0x5e2   :  { %6165 = vmatprep.subr.bf16.mxu0 %v7929_v19 }
 0x5e3   :  { %4099 = vmatpush1.bf16.msra.mxu1 %v7602_v12 }
 0x5e4   :  { %4100 = vmatprep.subr.bf16.mxu1 %v7606_v55 }
 0x5e5   :  { %6166 = vmatpush3.bf16.msra.mxu0 %v6576_v29 }
 0x5e6   :  { %6167 = vmatprep.subr.bf16.mxu0 %v7929_v19 }
 0x5e7   :  { %4101 = vmatpush1.bf16.msra.mxu1 %v7609_v49 }
 0x5e8   :  { %4102 = vmatprep.subr.bf16.mxu1 %v7613_v32 }
 0x5e9   :  { %6168 = vmatpush3.bf16.msra.mxu0 %v6577_v0 }
 0x5ea   :  { %6169 = vmatprep.subr.bf16.mxu0 %v7929_v19 }
 0x5eb   :  { %4103 = vmatpush1.bf16.msra.mxu1 %v7616_v62 }
 0x5ec   :  { %4104 = vmatprep.subr.bf16.mxu1 %v7620_v33 }
 0x5ed   :  { %6170 = vmatpush3.bf16.msra.mxu0 %v6578_v14 }
 0x5ee   :  { %6171 = vmatprep.subr.bf16.mxu0 %v7929_v19 }
 0x5ef   :  { %4105 = vmatpush1.bf16.msra.mxu1 %v7623_v61 }
 0x5f0   :  { %4106 = vmatprep.subr.bf16.mxu1 %v7627_v54 }
 0x5f1   :  { %6172 = vmatpush3.bf16.msra.mxu0 %v6579_v20 }
 0x5f2   :  { %6173 = vmatprep.subr.bf16.mxu0 %v7929_v19 }
 0x5f3   :  { %4107 = vmatpush1.bf16.msra.mxu1 %v7630_v1 }
 0x5f4   :  { %4108 = vmatprep.subr.bf16.mxu1 %v7634_v57 }
 0x5f5   :  { %6174 = vmatpush3.bf16.msra.mxu0 %v6580_v15  ;;  %v7942_v15 = vld [vmem:[#allocation26_spill] sm:$0xff] }
 0x5f6   :  { %6175 = vmatprep.subr.bf16.mxu0 %v7929_v19 }
 0x5f7   :  { %4109 = vmatpush1.bf16.msra.mxu1 %v7637_v40 }
 0x5f8   :  { %4336 = vmatprep.subr.bf16.mxu1 %v7641_v2 }
 0x5f9   :  { %6176 = vmatpush3.bf16.msra.mxu0 %v6581_v24 }
 0x5fa   :  { %6181 = vmatprep.subr.bf16.mxu0 %v7929_v19 }
 0x68d   :  { %v3594_v27 = vpop.f32.mrb[56].mxu1  ;;  %v3635_v11 = vpop.f32.mrb[72].mxu0 }
 0x68e   :  { %v3883_v17 = vadd.f32 %v3594_v27, %v7940_v13  ;;  %v3596_v34 = vpop.f32.mrb[57].mxu1  ;;  %v6139_v41 = vpop.f32.mrb[73].mxu0 }
 0x68f   :  { %v3890_v7 = vadd.f32 %v3596_v34, %v7941_v42  ;;  %v3598_v4 = vpop.f32.mrb[58].mxu1  ;;  %v3638_v59 = vpop.f32.mrb[74].mxu0  ;;  %v7943_v34 = vld [vmem:[#allocation20_spill] sm:$0xff] }
 0x690   :  { %v5613_v31 = vmul.f32 -1.442695, %v3883_v17  ;;  %v3599_v30 = vpop.f32.mrb[59].mxu1  ;;  %v6140_v37 = vpop.f32.mrb[75].mxu0  ;;  %v7944_v4 = vld [vmem:[#allocation38_spill] sm:$0xff] }
 0x691   :  { %v5614_v36 = vmul.f32 -1.442695, %v3890_v7 }
 0x692   :  { %6722 = vpow2.f32 %v5613_v31 }
 0x693   :  { %6724 = vpow2.f32 %v5614_v36 }
 0x69c   :  { %v6723_v46 = vpop.eup %6722 }
 0x69d   :  { %v3887_v60 = vadd.f32 1.0, %v6723_v46  ;;  %v6725_v29 = vpop.eup %6724 }
 0x69e   :  { %v3894_v0 = vadd.f32 1.0, %v6725_v29 }
 0x69f   :  { %6726 = vrcp.f32 %v3887_v60 }
 0x6a0   :  { %6728 = vrcp.f32 %v3894_v0 }
 0x6a9   :  { %v6727_v14 = vpop.eup %6726 }
 0x6aa   :  { %v3897_v20 = vmul.f32 %v6727_v14, %v3635_v11  ;;  %v6729_v46 = vpop.eup %6728 }
 0x6ab   :  { %v3900_v60 = vsub.f32 1.0, %v6729_v46  ;;  %v3902_v14 = vmul.f32 %v6729_v46, %v7651_v51  ;;  %v6587_v46 = vld [vmem:[#allocation10 + $0x80] ss:$12 sps:$4 sm:$0xff]  }
 0x6ac   :  { %v3898_v24 = vadd.f32 %v3897_v20, %v7942_v15 }
 0x6ad   :  { %v3836_v27 = vpop.f32.mrb[60].mxu1  ;;  %v3877_v13 = vpop.f32.mrb[76].mxu0 }
 0x6ae   :  { %6730 = vtanh.f32 %v3898_v24  ;;  %v3904_v17 = vadd.f32 %v3836_v27, %v7943_v34  ;;  %v3838_v41 = vpop.f32.mrb[61].mxu1  ;;  %v6159_v42 = vpop.f32.mrb[77].mxu0  ;;  %v6582_v24 = vld [vmem:[#allocation10 + $0x8] ss:$12 sps:$4 sm:$0xff]  }
 0x6af   :  { %v3911_v7 = vadd.f32 %v3838_v41, %v7944_v4  ;;  %v3840_v59 = vpop.f32.mrb[62].mxu1  ;;  %v3880_v31 = vpop.f32.mrb[78].mxu0  ;;  %v6584_v42 = vld [vmem:[#allocation10 + $0x38] ss:$12 sps:$4 sm:$0xff]  }
 0x6b0   :  { %v5615_v30 = vmul.f32 -1.442695, %v3904_v17  ;;  %v3841_v37 = vpop.f32.mrb[63].mxu1  ;;  %v6160_v36 = vpop.f32.mrb[79].mxu0  ;;  %v6583_v17 = vld [vmem:[#allocation10 + $0x20] ss:$12 sps:$4 sm:$0xff]  }
 0x6b1   :  { %v5616_v11 = vmul.f32 -1.442695, %v3911_v7  ;;  %v6585_v7 = vld [vmem:[#allocation10 + $0x50] ss:$12 sps:$4 sm:$0xff]   ;;  %v6586_v36 = vld [vmem:[#allocation10 + $0x68] ss:$12 sps:$4 sm:$0xff]  }
 0x6b2   :  { %6732 = vpow2.f32 %v5615_v30  ;;  %v7945_v30 = vld [vmem:[#allocation39_spill] sm:$0xff] }
 0x6b3   :  { %6734 = vpow2.f32 %v5616_v11  ;;  %v6588_v11 = vld [vmem:[#allocation10 + $0x98] ss:$12 sps:$4 sm:$0xff]  }
 0x6b8   :  { %v6731_v29 = vpop.eup %6730 }
 0x6b9   :  { %v3901_v0 = vmul.f32 %v6731_v29, %v3900_v60 }
 0x6bb   :  { %v7751_v20 = vadd.f32 %v3902_v14, %v3901_v0  ;;  %v6589_v0 = vld [vmem:[#allocation10 + $0xb0] ss:$12 sps:$4 sm:$0xff]  }
 0x6bc   :  { %v6733_v15 = vpop.eup %6732 }
 0x6bd   :  { %v3908_v27 = vadd.f32 1.0, %v6733_v15  ;;  %v3933_v34 = vpack.c.bf16 %v7751_v20, %v7751_v20  ;;  %v6735_v41 = vpop.eup %6734 }
 0x6be   :  { %v3915_v4 = vadd.f32 1.0, %v6735_v41 }
 0x6bf   :  { %6736 = vrcp.f32 %v3908_v27  ;;  %4127 = vmatmul.mubr.bf16.vlgmr.msra.gmra.mrb[64].mxu1 %v3933_v34  ;;  %6178 = vmatmul.mubr.bf16.vlgmr.msra.gmra.mrb[80].mxu0 %v3933_v34 }
 0x6c0   :  { %4337 = vmatpush1.bf16.msra.mxu1 %v7653_v28  ;;  %6182 = vmatpush3.bf16.msra.mxu0 %v6582_v24  ;;  %6738 = vrcp.f32 %v3915_v4 }
 0x6c1   :  { %4338 = vmatprep.subr.bf16.mxu1 %v7657_v3  ;;  %6183 = vmatprep.subr.bf16.mxu0 %v7929_v19 }
 0x6c2   :  { %4368 = vmatprep.mubr.bf16.mxu1 %v7930_v50  ;;  %6197 = vmatprep.mubr.msk.bf16.mxu0 %vm6948_vm0, %v7929_v19 }
 0x6c4   :  { %4339 = vmatpush1.bf16.msra.mxu1 %v7660_v48  ;;  %6184 = vmatpush3.bf16.msra.mxu0 %v6583_v17 }
 0x6c5   :  { %4340 = vmatprep.subr.bf16.mxu1 %v7664_v18  ;;  %6185 = vmatprep.subr.bf16.mxu0 %v7929_v19 }
 0x6c8   :  { %4341 = vmatpush1.bf16.msra.mxu1 %v7670_v45  ;;  %6186 = vmatpush3.bf16.msra.mxu0 %v6584_v42 }
 0x6c9   :  { %v6737_v59 = vpop.eup %6736  ;;  %4342 = vmatprep.subr.bf16.mxu1 %v7674_v35  ;;  %6187 = vmatprep.subr.bf16.mxu0 %v7929_v19 }
 0x6ca   :  { %v3918_v31 = vmul.f32 %v6737_v59, %v3877_v13  ;;  %v6739_v13 = vpop.eup %6738 }
 0x6cb   :  { %v3921_v60 = vsub.f32 1.0, %v6739_v13  ;;  %v3923_v15 = vmul.f32 %v6739_v13, %v7711_v63 }
 0x6cc   :  { %v3919_v37 = vadd.f32 %v3918_v31, %v7945_v30  ;;  %4343 = vmatpush1.bf16.msra.mxu1 %v7677_v22  ;;  %6188 = vmatpush3.bf16.msra.mxu0 %v6585_v7 }
 0x6cd   :  { %4344 = vmatprep.subr.bf16.mxu1 %v7681_v23  ;;  %6189 = vmatprep.subr.bf16.mxu0 %v7929_v19 }
 0x6ce   :  { %6740 = vtanh.f32 %v3919_v37 }
 0x6d0   :  { %4345 = vmatpush1.bf16.msra.mxu1 %v7685_v58  ;;  %6190 = vmatpush3.bf16.msra.mxu0 %v6586_v36 }
 0x6d1   :  { %4346 = vmatprep.subr.bf16.mxu1 %v7689_v6  ;;  %6191 = vmatprep.subr.bf16.mxu0 %v7929_v19 }
 0x6d4   :  { %4347 = vmatpush1.bf16.msra.mxu1 %v7692_v8  ;;  %6192 = vmatpush3.bf16.msra.mxu0 %v6587_v46  ;;  %v7948_v46 = vld [vmem:[#allocation29_spill] sm:$0xff] }
 0x6d5   :  { %4348 = vmatprep.subr.bf16.mxu1 %v7696_v43  ;;  %6193 = vmatprep.subr.bf16.mxu0 %v7929_v19 }
 0x6d8   :  { %v6741_v29 = vpop.eup %6740  ;;  %4349 = vmatpush1.bf16.msra.mxu1 %v7699_v16  ;;  %6194 = vmatpush3.bf16.msra.mxu0 %v6588_v11 }
 0x6d9   :  { %4350 = vmatprep.subr.bf16.mxu1 %v7703_v39  ;;  %6195 = vmatprep.subr.bf16.mxu0 %v7929_v19  ;;  %v3922_v14 = vmul.f32 %v6741_v29, %v3921_v60  ;;  %v7949_v29 = vld [vmem:[#allocation19_spill] sm:$0xff] }
 0x6db   :  { %v7781_v24 = vadd.f32 %v3923_v15, %v3922_v14 }
 0x6dc   :  { %4351 = vmatpush1.bf16.msra.mxu1 %v7706_v38  ;;  %6196 = vmatpush3.bf16.msra.mxu0 %v6589_v0 }
 0x6dd   :  { %v4175_v27 = vpack.c.bf16 %v7781_v24, %v7781_v24  ;;  %4628 = vmatprep.subr.bf16.mxu1 %v7586_v10  ;;  %6201 = vmatprep.subr.bf16.mxu0 %v7929_v19  ;;  %v6590_v10 = vld [vmem:[#allocation9 + $0x8] ss:$12 sps:$4 sm:$0xff]  }
 0x6df   :  { %4369 = vmatmul.mubr.bf16.vlgmr.msra.gmra.mrb[68].mxu1 %v4175_v27  ;;  %6198 = vmatmul.mubr.bf16.vlgmr.msra.gmra.mrb[84].mxu0 %v4175_v27  ;;  %v7950_v27 = vld [vmem:[#allocation36_spill] sm:$0xff] }
 0x6e0   :  { %4629 = vmatpush1.bf16.msra.mxu1 %v7588_v26  ;;  %4660 = vmatprep.mubr.bf16.mxu1 %v7930_v50  ;;  %v6591_v26 = vld [vmem:[#allocation9 + $0x20] ss:$12 sps:$4 sm:$0xff]  }
 0x6e1   :  { %4630 = vmatprep.subr.bf16.mxu1 %v7592_v5  ;;  %6217 = vmatprep.mubr.msk.bf16.mxu0 %vm6948_vm0, %v7929_v19  ;;  %v6592_v5 = vld [vmem:[#allocation9 + $0x38] ss:$12 sps:$4 sm:$0xff]  }
 0x6e2   :  { %6202 = vmatpush3.bf16.msra.mxu0 %v6590_v10 }
 0x6e3   :  { %6203 = vmatprep.subr.bf16.mxu0 %v7929_v19 }
 0x6e4   :  { %4631 = vmatpush1.bf16.msra.mxu1 %v7595_v9  ;;  %v6593_v9 = vld [vmem:[#allocation9 + $0x50] ss:$12 sps:$4 sm:$0xff]  }
 0x6e5   :  { %4632 = vmatprep.subr.bf16.mxu1 %v7599_v52  ;;  %v6594_v52 = vld [vmem:[#allocation9 + $0x68] ss:$12 sps:$4 sm:$0xff]  }
 0x6e6   :  { %6204 = vmatpush3.bf16.msra.mxu0 %v6591_v26 }
 0x6e7   :  { %6205 = vmatprep.subr.bf16.mxu0 %v7929_v19 }
 0x6e8   :  { %4633 = vmatpush1.bf16.msra.mxu1 %v7602_v12  ;;  %v6595_v12 = vld [vmem:[#allocation9 + $0x80] ss:$12 sps:$4 sm:$0xff]  }
 0x6e9   :  { %4634 = vmatprep.subr.bf16.mxu1 %v7606_v55  ;;  %v6596_v55 = vld [vmem:[#allocation9 + $0x98] ss:$12 sps:$4 sm:$0xff]  }
 0x6ea   :  { %6206 = vmatpush3.bf16.msra.mxu0 %v6592_v5 }
 0x6eb   :  { %6207 = vmatprep.subr.bf16.mxu0 %v7929_v19 }
 0x6ec   :  { %4635 = vmatpush1.bf16.msra.mxu1 %v7609_v49  ;;  %v6597_v49 = vld [vmem:[#allocation9 + $0xb0] ss:$12 sps:$4 sm:$0xff]  }
 0x6ed   :  { %4636 = vmatprep.subr.bf16.mxu1 %v7613_v32 }
 0x6ee   :  { %6208 = vmatpush3.bf16.msra.mxu0 %v6593_v9 }
 0x6ef   :  { %6209 = vmatprep.subr.bf16.mxu0 %v7929_v19 }
 0x6f0   :  { %4637 = vmatpush1.bf16.msra.mxu1 %v7616_v62 }
 0x6f1   :  { %4638 = vmatprep.subr.bf16.mxu1 %v7620_v33  ;;  %v7946_v33 = vld [vmem:[#allocation28_spill] sm:$0xff] }
 0x6f2   :  { %6210 = vmatpush3.bf16.msra.mxu0 %v6594_v52 }
 0x6f3   :  { %6211 = vmatprep.subr.bf16.mxu0 %v7929_v19 }
 0x6f4   :  { %4639 = vmatpush1.bf16.msra.mxu1 %v7623_v61 }
 0x6f5   :  { %4640 = vmatprep.subr.bf16.mxu1 %v7627_v54 }
 0x6f6   :  { %6212 = vmatpush3.bf16.msra.mxu0 %v6595_v12 }
 0x6f7   :  { %6213 = vmatprep.subr.bf16.mxu0 %v7929_v19 }
 0x6f8   :  { %4641 = vmatpush1.bf16.msra.mxu1 %v7630_v1 }
 0x6f9   :  { %4642 = vmatprep.subr.bf16.mxu1 %v7634_v57  ;;  %v7947_v57 = vld [vmem:[#allocation30_spill] sm:$0xff] }
 0x6fa   :  { %6214 = vmatpush3.bf16.msra.mxu0 %v6596_v55 }
 0x6fb   :  { %6215 = vmatprep.subr.bf16.mxu0 %v7929_v19 }
 0x6fc   :  { %4643 = vmatpush1.bf16.msra.mxu1 %v7637_v40 }
 0x6fd   :  { %4870 = vmatprep.subr.bf16.mxu1 %v7641_v2 }
 0x6fe   :  { %6216 = vmatpush3.bf16.msra.mxu0 %v6597_v49 }
 0x6ff   :  { %6221 = vmatprep.subr.bf16.mxu0 %v7929_v19 }
 0x792   :  { %v4128_v32 = vpop.f32.mrb[64].mxu1  ;;  %v4169_v62 = vpop.f32.mrb[80].mxu0 }
 0x793   :  { %v4417_v61 = vadd.f32 %v4128_v32, %v7946_v33  ;;  %v4130_v54 = vpop.f32.mrb[65].mxu1  ;;  %v6179_v1 = vpop.f32.mrb[81].mxu0 }
 0x794   :  { %v4424_v40 = vadd.f32 %v4130_v54, %v7947_v57  ;;  %v4132_v2 = vpop.f32.mrb[66].mxu1  ;;  %v4172_v34 = vpop.f32.mrb[82].mxu0  ;;  %v6598_v57 = vld [vmem:[#allocation10 + $0x8] ss:$12 sps:$4 sm:$0xff]  }
 0x795   :  { %v5665_v17 = vmul.f32 -1.442695, %v4417_v61  ;;  %v4133_v41 = vpop.f32.mrb[67].mxu1  ;;  %v6180_v42 = vpop.f32.mrb[83].mxu0  ;;  %v6599_v34 = vld [vmem:[#allocation10 + $0x20] ss:$12 sps:$4 sm:$0xff]  }
 0x796   :  { %v5666_v4 = vmul.f32 -1.442695, %v4424_v40  ;;  %v6600_v41 = vld [vmem:[#allocation10 + $0x38] ss:$12 sps:$4 sm:$0xff]  }
 0x797   :  { %6742 = vpow2.f32 %v5665_v17 }
 0x798   :  { %6744 = vpow2.f32 %v5666_v4  ;;  %v7951_v4 = vld [vmem:[#allocation37_spill] sm:$0xff] }
 0x7a1   :  { %v6743_v7 = vpop.eup %6742 }
 0x7a2   :  { %v4421_v59 = vadd.f32 1.0, %v6743_v7  ;;  %v6745_v31 = vpop.eup %6744 }
 0x7a3   :  { %v4428_v30 = vadd.f32 1.0, %v6745_v31  ;;  %v6607_v31 = vld [vmem:[#allocation12] sm:$0xff]  }
 0x7a4   :  { %6746 = vrcp.f32 %v4421_v59 }
 0x7a5   :  { %6748 = vrcp.f32 %v4428_v30  ;;  %v6609_v30 = vld [vmem:[#allocation12 + $0x8] sm:$0xff]  }
 0x7ae   :  { %v6747_v37 = vpop.eup %6746 }
 0x7af   :  { %v4431_v36 = vmul.f32 %v6747_v37, %v4169_v62  ;;  %v6749_v55 = vpop.eup %6748  ;;  %v6611_v37 = vld [vmem:[#allocation12 + $0x10] sm:$0xff]  }
 0x7b0   :  { %v4434_v32 = vsub.f32 1.0, %v6749_v55  ;;  %v4436_v61 = vmul.f32 %v6749_v55, %v7751_v20 }
 0x7b1   :  { %v4432_v13 = vadd.f32 %v4431_v36, %v7948_v46  ;;  %v6612_v36 = vld [vmem:[#allocation12 + $0x58] sm:$0xff]   ;;  %v6614_v46 = vld [vmem:[#allocation12 + $0x60] sm:$0xff]  }
 0x7b2   :  { %v4370_v11 = vpop.f32.mrb[68].mxu1  ;;  %v4411_v60 = vpop.f32.mrb[84].mxu0 }
 0x7b3   :  { %6750 = vtanh.f32 %v4432_v13  ;;  %v4438_v0 = vadd.f32 %v4370_v11, %v7949_v29  ;;  %v4372_v14 = vpop.f32.mrb[69].mxu1  ;;  %v6199_v15 = vpop.f32.mrb[85].mxu0  ;;  %v6615_v13 = vld [vmem:[#allocation12 + $0x20] sm:$0xff]   ;;  %v6616_v11 = vld [vmem:[#allocation12 + $0x68] sm:$0xff]   ;;  %v6618_v29 = vld [vmem:[#allocation12 + $0x70] sm:$0xff]  }
 0x7b4   :  { %v4445_v10 = vadd.f32 %v4372_v14, %v7950_v27  ;;  %v4374_v26 = vpop.f32.mrb[70].mxu1  ;;  %v4414_v5 = vpop.f32.mrb[86].mxu0  ;;  %v6620_v14 = vld [vmem:[#allocation12 + $0x78] sm:$0xff]  }
 0x7b5   :  { %v5667_v9 = vmul.f32 -1.442695, %v4438_v0  ;;  %v4375_v52 = vpop.f32.mrb[71].mxu1  ;;  %v6200_v12 = vpop.f32.mrb[87].mxu0  ;;  %v6619_v0 = vld [vmem:[#allocation12 + $0x30] sm:$0xff]   ;;  %v6621_v15 = vld [vmem:[#allocation12 + $0x38] sm:$0xff]  }
 0x7b6   :  { %v5668_v49 = vmul.f32 -1.442695, %v4445_v10  ;;  %v7952_v26 = vld [vmem:[#allocation31_spill] sm:$0xff]  ;;  %v7953_v12 = vld [vmem:[#allocation33_spill] sm:$0xff] }
 0x7b7   :  { %6752 = vpow2.f32 %v5667_v9 }
 0x7b8   :  { %6754 = vpow2.f32 %v5668_v49 }
 0x7bd   :  { %v6751_v62 = vpop.eup %6750 }
 0x7be   :  { %v4435_v33 = vmul.f32 %v6751_v62, %v4434_v32 }
 0x7c0   :  { %v7821_v54 = vadd.f32 %v4436_v61, %v4435_v33 }
 0x7c1   :  { %v6753_v1 = vpop.eup %6752 }
 0x7c2   :  { %v4442_v40 = vadd.f32 1.0, %v6753_v1  ;;  %v4467_v2 = vpack.c.bf16 %v7821_v54, %v7821_v54  ;;  %v6755_v17 = vpop.eup %6754 }
 0x7c4   :  { %6756 = vrcp.f32 %v4442_v40  ;;  %4661 = vmatmul.mubr.bf16.vlgmr.msra.gmra.mrb[72].mxu1 %v4467_v2  ;;  %6218 = vmatmul.mubr.bf16.vlgmr.msra.gmra.mrb[88].mxu0 %v4467_v2 }
 0x7c5   :  { %4871 = vmatpush1.bf16.msra.mxu1 %v7653_v28  ;;  %6222 = vmatpush3.bf16.msra.mxu0 %v6598_v57  ;;  %v4449_v28 = vadd.f32 1.0, %v6755_v17 }
 0x7c6   :  { %4872 = vmatprep.subr.bf16.mxu1 %v7657_v3  ;;  %6223 = vmatprep.subr.bf16.mxu0 %v7929_v19  ;;  %v6601_v3 = vld [vmem:[#allocation10 + $0x50] ss:$12 sps:$4 sm:$0xff]  }
 0x7c7   :  { %4902 = vmatprep.mubr.bf16.mxu1 %v7930_v50  ;;  %6237 = vmatprep.mubr.msk.bf16.mxu0 %vm6948_vm0, %v7929_v19  ;;  %6758 = vrcp.f32 %v4449_v28  ;;  %v7954_v28 = vld [vmem:[#allocation32_spill] sm:$0xff] }
 0x7c9   :  { %4873 = vmatpush1.bf16.msra.mxu1 %v7660_v48  ;;  %6224 = vmatpush3.bf16.msra.mxu0 %v6599_v34 }
 0x7ca   :  { %4874 = vmatprep.subr.bf16.mxu1 %v7664_v18  ;;  %6225 = vmatprep.subr.bf16.mxu0 %v7929_v19  ;;  %v6602_v18 = vld [vmem:[#allocation10 + $0x68] ss:$12 sps:$4 sm:$0xff]  }
 0x7cd   :  { %4875 = vmatpush1.bf16.msra.mxu1 %v7670_v45  ;;  %6226 = vmatpush3.bf16.msra.mxu0 %v6600_v41  ;;  %v6603_v45 = vld [vmem:[#allocation10 + $0x80] ss:$12 sps:$4 sm:$0xff]  }
 0x7ce   :  { %v6757_v42 = vpop.eup %6756  ;;  %4876 = vmatprep.subr.bf16.mxu1 %v7674_v35  ;;  %6227 = vmatprep.subr.bf16.mxu0 %v7929_v19 }
 0x7cf   :  { %v4452_v50 = vmul.f32 %v6757_v42, %v4411_v60  ;;  %v6617_v60 = vld [vmem:[#allocation12 + $0x28] sm:$0xff]  }
 0x7d1   :  { %v4453_v48 = vadd.f32 %v4452_v50, %v7951_v4  ;;  %4877 = vmatpush1.bf16.msra.mxu1 %v7677_v22  ;;  %6228 = vmatpush3.bf16.msra.mxu0 %v6601_v3  ;;  %v6759_v35 = vpop.eup %6758  ;;  %v6604_v22 = vld [vmem:[#allocation10 + $0x98] ss:$12 sps:$4 sm:$0xff]  }
 0x7d2   :  { %4878 = vmatprep.subr.bf16.mxu1 %v7681_v23  ;;  %6229 = vmatprep.subr.bf16.mxu0 %v7929_v19  ;;  %v4455_v23 = vsub.f32 1.0, %v6759_v35  ;;  %v4457_v59 = vmul.f32 %v6759_v35, %v7781_v24  ;;  %v7955_v4 = vld [vmem:[#allocation18_spill] sm:$0xff] }
 0x7d3   :  { %6760 = vtanh.f32 %v4453_v48  ;;  %v7956_v35 = vld [vmem:[#allocation34_spill] sm:$0xff] }
 0x7d5   :  { %4879 = vmatpush1.bf16.msra.mxu1 %v7685_v58  ;;  %6230 = vmatpush3.bf16.msra.mxu0 %v6602_v18  ;;  %v6605_v58 = vld [vmem:[#allocation10 + $0xb0] ss:$12 sps:$4 sm:$0xff]  }
 0x7d6   :  { %4880 = vmatprep.subr.bf16.mxu1 %v7689_v6  ;;  %6231 = vmatprep.subr.bf16.mxu0 %v7929_v19 }
 0x7d9   :  { %4881 = vmatpush1.bf16.msra.mxu1 %v7692_v8  ;;  %6232 = vmatpush3.bf16.msra.mxu0 %v6603_v45 }
 0x7da   :  { %4882 = vmatprep.subr.bf16.mxu1 %v7696_v43  ;;  %6233 = vmatprep.subr.bf16.mxu0 %v7929_v19 }
 0x7dd   :  { %v6761_v7 = vpop.eup %6760  ;;  %4883 = vmatpush1.bf16.msra.mxu1 %v7699_v16  ;;  %6234 = vmatpush3.bf16.msra.mxu0 %v6604_v22  ;;  %v6606_v16 = vld [vmem:[#allocation12 + $0x40] sm:$0xff]  }
 0x7de   :  { %4884 = vmatprep.subr.bf16.mxu1 %v7703_v39  ;;  %6235 = vmatprep.subr.bf16.mxu0 %v7929_v19  ;;  %v4456_v6 = vmul.f32 %v6761_v7, %v4455_v23  ;;  %v6608_v39 = vld [vmem:[#allocation12 + $0x48] sm:$0xff]   ;;  %v6610_v19 = vld [vmem:[#allocation12 + $0x50] sm:$0xff]  }
 0x7e0   :  { %v7851_v8 = vadd.f32 %v4457_v59, %v4456_v6 }
 0x7e1   :  { %4885 = vmatpush1.bf16.msra.mxu1 %v7706_v38  ;;  %6236 = vmatpush3.bf16.msra.mxu0 %v6605_v58  ;;  %v6613_v38 = vld [vmem:[#allocation12 + $0x18] sm:$0xff]  }
 0x7e2   :  { %v4709_v43 = vpack.c.bf16 %v7851_v8, %v7851_v8  ;;  %5881 = vmatprep.subr.bf16.mxu1 %v6606_v16 }
 0x7e4   :  { %4903 = vmatmul.mubr.bf16.vlgmr.msra.gmra.mrb[76].mxu1 %v4709_v43  ;;  %6238 = vmatmul.mubr.bf16.vlgmr.msra.gmra.mrb[92].mxu0 %v4709_v43 }
 0x7e5   :  { %5882 = vmatpush3.bf16.msra.mxu1 %v6607_v31 }
 0x7e6   :  { %5883 = vmatprep.subr.bf16.mxu1 %v6608_v39 }
 0x7e9   :  { %5884 = vmatpush3.bf16.msra.mxu1 %v6609_v30 }
 0x7ea   :  { %5885 = vmatprep.subr.bf16.mxu1 %v6610_v19 }
 0x7ed   :  { %5886 = vmatpush3.bf16.msra.mxu1 %v6611_v37 }
 0x7ee   :  { %5887 = vmatprep.subr.bf16.mxu1 %v6612_v36 }
 0x7f1   :  { %5888 = vmatpush3.bf16.msra.mxu1 %v6613_v38 }
 0x7f2   :  { %5889 = vmatprep.subr.bf16.mxu1 %v6614_v46 }
 0x7f5   :  { %5890 = vmatpush3.bf16.msra.mxu1 %v6615_v13 }
 0x7f6   :  { %5891 = vmatprep.subr.bf16.mxu1 %v6616_v11 }
 0x7f9   :  { %5892 = vmatpush3.bf16.msra.mxu1 %v6617_v60 }
 0x7fa   :  { %5893 = vmatprep.subr.bf16.mxu1 %v6618_v29  ;;  %v7957_v29 = vld [vmem:[#allocation35_spill] sm:$0xff] }
 0x7fd   :  { %5894 = vmatpush3.bf16.msra.mxu1 %v6619_v0 }
 0x7fe   :  { %5895 = vmatprep.subr.bf16.mxu1 %v6620_v14 }
 0x801   :  { %5896 = vmatpush3.bf16.msra.mxu1 %v6621_v15 }
 0x897   :  { %v4662_v27 = vpop.f32.mrb[72].mxu1  ;;  %v4703_v10 = vpop.f32.mrb[88].mxu0 }
 0x898   :  { %v4951_v5 = vadd.f32 %v4662_v27, %v7952_v26  ;;  %v4664_v9 = vpop.f32.mrb[73].mxu1  ;;  %v6219_v52 = vpop.f32.mrb[89].mxu0 }
 0x899   :  { %v4958_v55 = vadd.f32 %v4664_v9, %v7953_v12  ;;  %v4666_v49 = vpop.f32.mrb[74].mxu1  ;;  %v4706_v32 = vpop.f32.mrb[90].mxu0  ;;  %v7958_v52 = vld [vmem:[#allocation44_spill] sm:$0xff] }
 0x89a   :  { %v5717_v62 = vmul.f32 -1.442695, %v4951_v5  ;;  %v4667_v33 = vpop.f32.mrb[75].mxu1  ;;  %v6220_v61 = vpop.f32.mrb[91].mxu0  ;;  %v5011_v12 = vpack.c.bf16 %v7377_v25, %v7958_v52  ;;  %v5013_v49 = vpack.c.bf16 %v7547_v47, %v7477_v21  ;;  %v5016_v32 = vpack.c.bf16 %v7507_v56, %v7577_v53 }
 0x89b   :  { %v5718_v1 = vmul.f32 -1.442695, %v4958_v55  ;;  %v5014_v55 = vpack.c.bf16 %v7711_v63, %v7781_v24 }
 0x89c   :  { %6762 = vpow2.f32 %v5717_v62  ;;  %v7959_v62 = vld [vmem:[#allocation45_spill] sm:$0xff] }
 0x89d   :  { %6764 = vpow2.f32 %v5718_v1  ;;  %v5018_v25 = vpack.c.bf16 %v7959_v62, %v7437_v44 }
 0x8a6   :  { %v6763_v57 = vpop.eup %6762 }
 0x8a7   :  { %v4955_v40 = vadd.f32 1.0, %v6763_v57  ;;  %v6765_v2 = vpop.eup %6764 }
 0x8a8   :  { %v4962_v34 = vadd.f32 1.0, %v6765_v2 }
 0x8a9   :  { %6766 = vrcp.f32 %v4955_v40 }
 0x8aa   :  { %6768 = vrcp.f32 %v4962_v34 }
 0x8b3   :  { %v6767_v17 = vpop.eup %6766 }
 0x8b4   :  { %v4965_v41 = vmul.f32 %v6767_v17, %v4703_v10  ;;  %v6769_v43 = vpop.eup %6768 }
 0x8b5   :  { %v4968_v31 = vsub.f32 1.0, %v6769_v43  ;;  %v4970_v19 = vmul.f32 %v6769_v43, %v7821_v54 }
 0x8b6   :  { %v4966_v3 = vadd.f32 %v4965_v41, %v7954_v28 }
 0x8b7   :  { %v4904_v42 = vpop.f32.mrb[76].mxu1  ;;  %v4945_v50 = vpop.f32.mrb[92].mxu0 }
 0x8b8   :  { %6770 = vtanh.f32 %v4966_v3  ;;  %v4972_v48 = vadd.f32 %v4904_v42, %v7955_v4  ;;  %v4906_v18 = vpop.f32.mrb[77].mxu1  ;;  %v6239_v45 = vpop.f32.mrb[93].mxu0 }
 0x8b9   :  { %v4979_v22 = vadd.f32 %v4906_v18, %v7956_v35  ;;  %v4908_v23 = vpop.f32.mrb[78].mxu1  ;;  %v4948_v7 = vpop.f32.mrb[94].mxu0 }
 0x8ba   :  { %v5719_v58 = vmul.f32 -1.442695, %v4972_v48  ;;  %v4909_v6 = vpop.f32.mrb[79].mxu1  ;;  %v6240_v59 = vpop.f32.mrb[95].mxu0 }
 0x8bb   :  { %v5720_v16 = vmul.f32 -1.442695, %v4979_v22 }
 0x8bc   :  { %6772 = vpow2.f32 %v5719_v58 }
 0x8bd   :  { %6774 = vpow2.f32 %v5720_v16 }
 0x8c2   :  { %v6771_v39 = vpop.eup %6770 }
 0x8c3   :  { %v4969_v30 = vmul.f32 %v6771_v39, %v4968_v31 }
 0x8c5   :  { %v4971_v37 = vadd.f32 %v4970_v19, %v4969_v30 }
 0x8c6   :  { %v6773_v36 = vpop.eup %6772 }
 0x8c7   :  { %v4976_v38 = vadd.f32 1.0, %v6773_v36  ;;  %v6775_v46 = vpop.eup %6774  ;;  %v5017_v63 = vpack.c.bf16 %v4971_v37, %v7821_v54 }
 0x8c8   :  { %v4983_v13 = vadd.f32 1.0, %v6775_v46 }
 0x8c9   :  { %6776 = vrcp.f32 %v4976_v38 }
 0x8ca   :  { %6778 = vrcp.f32 %v4983_v13 }
 0x8d3   :  { %v6777_v11 = vpop.eup %6776 }
 0x8d4   :  { %v4986_v60 = vmul.f32 %v6777_v11, %v4945_v50  ;;  %v6779_v14 = vpop.eup %6778 }
 0x8d5   :  { %v4989_v15 = vsub.f32 1.0, %v6779_v14  ;;  %v4991_v26 = vmul.f32 %v6779_v14, %v7851_v8 }
 0x8d6   :  { %v4987_v0 = vadd.f32 %v4986_v60, %v7957_v29 }
 0x8d8   :  { %6780 = vtanh.f32 %v4987_v0 }
 0x8e2   :  { %v6781_v27 = vpop.eup %6780 }
 0x8e3   :  { %v4990_v10 = vmul.f32 %v6781_v27, %v4989_v15 }
 0x8e5   :  { %v4992_v5 = vadd.f32 %v4991_v26, %v4990_v10 }
 0x8e7   :  { %v5012_v9 = vpack.c.bf16 %v7851_v8, %v4992_v5  ;;  %v5015_v8 = vpack.c.bf16 %v7751_v20, %v7651_v51 }
 0x8e9   :  { %5179 = vmatprep.mubr.bf16.mxu1 %v5012_v9 }
 0x8ea   :  { %5180 = vmatmul.mubr.bf16.vlgmr.msra.gmra.mrb[80].mxu1 %v5011_v12 }
 0x8eb   :  { %5187 = vmatprep.mubr.bf16.mxu1 %v5014_v55 }
 0x8f2   :  { %5188 = vmatmul.mubr.bf16.gmra.mrb[84].mxu1 %v5013_v49 }
 0x8f3   :  { %5195 = vmatprep.mubr.bf16.mxu1 %v5016_v32 }
 0x8fa   :  { %5196 = vmatmul.mubr.bf16.gmra.mrb[88].mxu1 %v5015_v8 }
 0x8fb   :  { %5203 = vmatprep.mubr.bf16.mxu1 %v5018_v25 }
 0x902   :  { %5204 = vmatmul.mubr.bf16.gmra.mrb[92].mxu1 %v5017_v63 }
 0x9bd   :  { %v5897_v24 = vpop.f32.mrb[80].mxu1 }
 0x9be   :  { %v5898_v33 = vpop.f32.mrb[81].mxu1 }
 0x9bf   :  { %v5899_v61 = vadd.f32 %v5898_v33, %v5897_v24  ;;  %v5900_v21 = vpop.f32.mrb[82].mxu1 }
 0x9c0   :  { %v5901_v47 = vpop.f32.mrb[83].mxu1 }
 0x9c1   :  { %5212 = vst [vmem:[#allocation13] sm:$0xff] %v5899_v61  ;;  %v5902_v56 = vadd.f32 %v5901_v47, %v5900_v21 }
 0x9c3   :  { %5213 = vst [vmem:[#allocation13 + $0x8] sm:$0xff] %v5902_v56 }
 0x9c5   :  { %v5903_v53 = vpop.f32.mrb[84].mxu1 }
 0x9c6   :  { %v5904_v1 = vpop.f32.mrb[85].mxu1 }
 0x9c7   :  { %v5905_v57 = vadd.f32 %v5904_v1, %v5903_v53  ;;  %v5906_v51 = vpop.f32.mrb[86].mxu1 }
 0x9c8   :  { %v5907_v20 = vpop.f32.mrb[87].mxu1 }
 0x9c9   :  { %5214 = vst [vmem:[#allocation13 + $0x10] sm:$0xff] %v5905_v57  ;;  %v5908_v44 = vadd.f32 %v5907_v20, %v5906_v51 }
 0x9cb   :  { %5215 = vst [vmem:[#allocation13 + $0x18] sm:$0xff] %v5908_v44 }
 0x9cd   :  { %v5909_v40 = vpop.f32.mrb[88].mxu1 }
 0x9ce   :  { %v5910_v2 = vpop.f32.mrb[89].mxu1 }
 0x9cf   :  { %v5911_v54 = vadd.f32 %v5910_v2, %v5909_v40  ;;  %v5912_v34 = vpop.f32.mrb[90].mxu1 }
 0x9d0   :  { %v5913_v17 = vpop.f32.mrb[91].mxu1 }
 0x9d1   :  { %5216 = vst [vmem:[#allocation13 + $0x20] sm:$0xff] %v5911_v54  ;;  %v5914_v41 = vadd.f32 %v5913_v17, %v5912_v34 }
 0x9d3   :  { %5217 = vst [vmem:[#allocation13 + $0x28] sm:$0xff] %v5914_v41 }
 0x9d5   :  { %v5915_v28 = vpop.f32.mrb[92].mxu1 }
 0x9d6   :  { %v5916_v3 = vpop.f32.mrb[93].mxu1 }
 0x9d7   :  { %v5917_v42 = vadd.f32 %v5916_v3, %v5915_v28  ;;  %v5918_v50 = vpop.f32.mrb[94].mxu1 }
 0x9d8   :  { %v5919_v4 = vpop.f32.mrb[95].mxu1 }
 0x9d9   :  { %5218 = vst [vmem:[#allocation13 + $0x30] sm:$0xff] %v5917_v42  ;;  %v5920_v48 = vadd.f32 %v5919_v4, %v5918_v50 }
 0x9db   :  { %5219 = vst [vmem:[#allocation13 + $0x38] sm:$0xff] %v5920_v48 }
 0x9dc   :  { %6916 = shalt.err (!%p6913_p2)
}
 0x9dd   :  { %s6917_s7 = scalar_lea.hbm %s7895_s5, 1024 }
 0x9de   :  { %p6918_p3 = scmp.ne.s32.totalorder %s7895_s5, %s6917_s7  ;;  %p6921_p4 = scmp.lt.u32.totalorder %s6917_s7, %s7895_s5 }
 0x9e0   :  { %p6923_p5 = pnand %p6921_p4, %p6918_p3 }
 0x9e2   :  { %6926 = shalt.err (!%p6923_p5)
}
 0x9e3   :  { %s6950_s13 = smov 128   ;;  %s6951_s14 = smov 8  }
 0x9e4   :  { %5231 = dma.vmem_to_hbm [thread:$0]  %s5226_s19, 1024, %s7895_s5, [#allocation6], %s6950_s13, %s6950_s13, %s6951_s14  }
 0x9e5   :  { %6933 = dma.done.wait [#allocation6], 1024  }
 0x9e6   :  { %6934 = vsyncadd [#allocation6], 4294966272 }
 0x9e7   :  { %5235 = vsyncpa [#allocation5], 1 }
 0x9e8   :  { %5236 = vsyncpa [#allocation8], 1 }
 0x9e9   :  { %5237 = vsyncpa [#allocation11], 1 }
 0x9ea   :  { %5238 = vsyncpa [#allocation6], 1 }

</bundles_post_ra>
